<compile_context>
chip_gen: v5e
topology: v5e:2x2
jax: 0.10.0
libtpu: 0.0.40
codegen_flags: <defaults>
</compile_context>

<pallas_src>
import functools

import jax
import jax.numpy as jnp
from jax import lax
from jax.experimental import pallas as pl
from jax.experimental.pallas import tpu as pltpu


# -----------------------------------------------------------------------------
# Weight-slab layout: every weight/bias is packed host-side into ONE f32 slab
# (row offsets multiples of 8 for sublane alignment) so the kernel needs a
# single DMA and slices with static offsets.
# -----------------------------------------------------------------------------
def _slab_layout(sg_dim, H, L):
    entries = (
        ("wih1", sg_dim, 8 * H),   # layer-1 input proj, fwd || bwd, (i,f,o,g)
        ("bg1", 1, 8 * H),         # layer-1 combined bias
        ("whh1", 2 * H, 4 * H),    # layer-1 stacked recurrent weights
        ("wih2", 2 * H, 8 * H),    # layer-2 input proj
        ("bg2", 1, 8 * H),
        ("whh2", 2 * H, 4 * H),
        ("w1", 2 * H, L),          # MLP
        ("b1", 1, L),
        ("w2", L, sg_dim),
        ("b2", 1, sg_dim),
    )
    ncols = max(c for _, _, c in entries)
    ncols = ((ncols + 127) // 128) * 128
    layout = {}
    off = 0
    for name, r, c in entries:
        layout[name] = (off, r, c)
        off += ((r + 7) // 8) * 8          # keep row offsets sublane-aligned
    nrows = ((off + 7) // 8) * 8
    return layout, nrows, ncols


# -----------------------------------------------------------------------------
# Fused whole-model kernel: BiLSTM x2 + Linear -> LeakyReLU -> Linear -> Sigmoid
# -----------------------------------------------------------------------------
def _metric_generator_kernel(x_ref, slab_ref, o_ref, y1_ref, y2_ref, h2_ref,
                             *, T, B, H, layout):
    f32 = jnp.float32

    def w(name):
        off, r, c = layout[name]
        return slab_ref[off:off + r, 0:c]

    def bilstm(x2d, wih, whh, bias, y_ref, in_time_major):
        """One bidirectional LSTM layer, fully VMEM/vreg resident.

        x2d   : (T*B, Din) rows time-major (t*B+b) or batch-major (b*T+t)
        wih   : (Din, 8H)  cols [:4H] fwd gates, [4H:] bwd gates, order (i,f,o,g)
        whh   : (2H, 4H)   rows [:H] fwd Whh, rows [H:] bwd Whh
        bias  : (1, 8H)    combined b_ih + b_hh, fwd || bwd
        y_ref : (T*B, 2H)  scratch output, time-major: cols [:H] fwd, [H:] bwd
        """
        # Hoisted input projection: ONE matmul covers every timestep and both
        # directions (row order of x2d is irrelevant for the matmul).
        xw = jnp.dot(x2d, wih, preferred_element_type=f32) + bias      # (T*B, 8H)

        # One-time reorder into the per-step layout: block t holds
        #   rows [:B]  -> fwd gate inputs at time t
        #   rows [B:]  -> bwd gate inputs at time T-1-t
        # so the recurrence reads ONE contiguous static slice per step
        # (no per-step slicing/concats on the serial chain).
        pieces = []
        for t in range(T):
            s = T - 1 - t
            if in_time_major:                       # row(b, t) = t*B + b
                pieces.append(xw[t * B:(t + 1) * B, 0:4 * H])
                pieces.append(xw[s * B:(s + 1) * B, 4 * H:8 * H])
            else:                                   # row(b, t) = b*T + t
                for b in range(B):
                    pieces.append(xw[b * T + t:b * T + t + 1, 0:4 * H])
                for b in range(B):
                    pieces.append(xw[b * T + s:b * T + s + 1, 4 * H:8 * H])
        x_steps = jnp.concatenate(pieces, axis=0)                       # (2TB, 4H)

        # Persistent block-diagonal carry in VMEM scratch:
        #   h2[:B, :H] = h_fwd,  h2[B:, H:] = h_bwd,  off-diagonal stays zero,
        # so both directions share a single MXU push per timestep.
        h2_ref[...] = jnp.zeros_like(h2_ref)
        c = jnp.zeros((2 * B, H), f32)

        for t in range(T):                          # T is tiny & static: unroll
            s = T - 1 - t
            gates = x_steps[t * 2 * B:(t + 1) * 2 * B, :] + jnp.dot(
                h2_ref[...], whh, preferred_element_type=f32)           # (2B, 4H)
            # Gates packed (i, f, o | g): one sigmoid push + one tanh push.
            sig = jax.nn.sigmoid(gates[:, 0:3 * H])
            i_g = sig[:, 0:H]
            f_g = sig[:, H:2 * H]
            o_g = sig[:, 2 * H:3 * H]
            g_g = jnp.tanh(gates[:, 3 * H:4 * H])
            c = f_g * c + i_g * g_g
            h = o_g * jnp.tanh(c)                                       # (2B, H)
            # Two static sub-block stores keep the carry block-diagonal
            # (replaces the per-step lane-concat + mask multiply).
            h2_ref[0:B, 0:H] = h[0:B, :]
            h2_ref[B:2 * B, H:2 * H] = h[B:2 * B, :]
            # Time-major layer output: fwd hidden at t, bwd hidden at s.
            y_ref[t * B:(t + 1) * B, 0:H] = h[0:B, :]
            y_ref[s * B:(s + 1) * B, H:2 * H] = h[B:2 * B, :]

    # Layer 1 consumes the batch-major (B*T, D) input directly.
    bilstm(x_ref[...], w("wih1"), w("whh1"), w("bg1"), y1_ref,
           in_time_major=False)
    # Layer 2 consumes layer 1's time-major output.
    bilstm(y1_ref[...], w("wih2"), w("whh2"), w("bg2"), y2_ref,
           in_time_major=True)

    # MLP head (row-wise): Linear -> LeakyReLU(0.01) -> Linear -> Sigmoid.
    hid = jnp.dot(y2_ref[...], w("w1"), preferred_element_type=jnp.float32) + w("b1")
    hid = jnp.where(hid > 0, hid, 0.01 * hid)
    out = jnp.dot(hid, w("w2"), preferred_element_type=jnp.float32) + w("b2")
    out = jax.nn.sigmoid(out)                                           # (T*B, D)

    # Output store does the time-major -> batch-major bookkeeping with static
    # index arithmetic (replaces the former wrapper-side XLA transpose).
    for b in range(B):
        for t in range(T):
            o_ref[b * T + t:b * T + t + 1, :] = out[t * B + b:t * B + b + 1, :]


def metric_generator_forward(x, slab, *, rnn_hidden_dim, linear_hidden_dim):
    """x: (B, T, sg_dim) -> (B, T, sg_dim), matching MetricGenerator.forward."""
    B, T, D = x.shape
    H = rnn_hidden_dim
    layout, _, _ = _slab_layout(D, H, linear_hidden_dim)

    kernel = functools.partial(_metric_generator_kernel,
                               T=T, B=B, H=H, layout=layout)
    out_flat = pl.pallas_call(
        kernel,
        out_shape=jax.ShapeDtypeStruct((B * T, D), jnp.float32),
        in_specs=[pl.BlockSpec(memory_space=pltpu.MemorySpace.VMEM),
                  pl.BlockSpec(memory_space=pltpu.MemorySpace.VMEM)],
        out_specs=pl.BlockSpec(memory_space=pltpu.MemorySpace.VMEM),
        scratch_shapes=[
            pltpu.VMEM((T * B, 2 * H), jnp.float32),   # layer-1 output (time-major)
            pltpu.VMEM((T * B, 2 * H), jnp.float32),   # layer-2 output (time-major)
            pltpu.VMEM((2 * B, 2 * H), jnp.float32),   # block-diagonal carry
        ],
    )(x.reshape(B * T, D), slab)          # reshapes are free (no transpose)
    return out_flat.reshape(B, T, D)


# -----------------------------------------------------------------------------
# Parameter construction (deterministic, PyTorch-style uniform init) + packing
# -----------------------------------------------------------------------------
def _uniform(key, shape, bound):
    return jax.random.uniform(key, shape, jnp.float32, -bound, bound)


def make_lstm_dir_params(key, input_dim, hidden_dim):
    """PyTorch-shaped params: w_ih (4H,D), w_hh (4H,H), b_ih (4H,), b_hh (4H,)."""
    k = 1.0 / jnp.sqrt(hidden_dim)
    k1, k2, k3, k4 = jax.random.split(key, 4)
    return (_uniform(k1, (4 * hidden_dim, input_dim), k),
            _uniform(k2, (4 * hidden_dim, hidden_dim), k),
            _uniform(k3, (4 * hidden_dim,), k),
            _uniform(k4, (4 * hidden_dim,), k))


def make_linear_params(key, in_dim, out_dim):
    k = 1.0 / jnp.sqrt(in_dim)
    k1, k2 = jax.random.split(key)
    return _uniform(k1, (out_dim, in_dim), k), _uniform(k2, (out_dim,), k)


def init_metric_generator_params(key, sg_dim, rnn_hidden_dim, linear_hidden_dim):
    keys = jax.random.split(key, 6)
    return {
        "l1_fwd": make_lstm_dir_params(keys[0], sg_dim, rnn_hidden_dim),
        "l1_bwd": make_lstm_dir_params(keys[1], sg_dim, rnn_hidden_dim),
        "l2_fwd": make_lstm_dir_params(keys[2], 2 * rnn_hidden_dim, rnn_hidden_dim),
        "l2_bwd": make_lstm_dir_params(keys[3], 2 * rnn_hidden_dim, rnn_hidden_dim),
        "lin1": make_linear_params(keys[4], 2 * rnn_hidden_dim, linear_hidden_dim),
        "lin2": make_linear_params(keys[5], linear_hidden_dim, sg_dim),
    }


def pack_params(raw, sg_dim, rnn_hidden_dim, linear_hidden_dim):
    """PyTorch layout -> single fused weight slab (gate order i,f,o,g)."""
    H = rnn_hidden_dim

    def reorder(a):
        # PyTorch gate order (i, f, g, o) -> kernel order (i, f, o, g) so one
        # sigmoid covers gates[:, :3H] and one tanh covers gates[:, 3H:].
        return jnp.concatenate([a[:2 * H], a[3 * H:4 * H], a[2 * H:3 * H]], axis=0)

    def layer(fwd, bwd):
        w_ih_f, w_hh_f, b_ih_f, b_hh_f = fwd
        w_ih_b, w_hh_b, b_ih_b, b_hh_b = bwd
        wih = jnp.concatenate([reorder(w_ih_f).T, reorder(w_ih_b).T], axis=1)
        whh = jnp.concatenate([reorder(w_hh_f).T, reorder(w_hh_b).T], axis=0)
        bg = jnp.concatenate([reorder(b_ih_f + b_hh_f),
                              reorder(b_ih_b + b_hh_b)]).reshape(1, -1)
        return wih, whh, bg

    wih1, whh1, bg1 = layer(raw["l1_fwd"], raw["l1_bwd"])
    wih2, whh2, bg2 = layer(raw["l2_fwd"], raw["l2_bwd"])
    w1, b1 = raw["lin1"]
    w2, b2 = raw["lin2"]
    tensors = {
        "wih1": wih1, "bg1": bg1, "whh1": whh1,
        "wih2": wih2, "bg2": bg2, "whh2": whh2,
        "w1": w1.T, "b1": b1.reshape(1, -1),
        "w2": w2.T, "b2": b2.reshape(1, -1),
    }
    layout, nrows, ncols = _slab_layout(sg_dim, H, linear_hidden_dim)
    slab = jnp.zeros((nrows, ncols), jnp.float32)
    for name, (off, r, c) in layout.items():
        assert tensors[name].shape == (r, c), (name, tensors[name].shape, (r, c))
        slab = slab.at[off:off + r, 0:c].set(tensors[name])
    return slab


# -----------------------------------------------------------------------------
# Pure-JAX reference (semantics mirror of the PyTorch module) for validation
# -----------------------------------------------------------------------------
def _lstm_dir_ref(x_tbd, w_ih, w_hh, b_ih, b_hh, hidden_dim):
    B = x_tbd.shape[1]

    def step(carry, x_t):
        h, c = carry
        gates = x_t @ w_ih.T + h @ w_hh.T + b_ih + b_hh
        i, f, g, o = jnp.split(gates, 4, axis=-1)
        i, f, o = jax.nn.sigmoid(i), jax.nn.sigmoid(f), jax.nn.sigmoid(o)
        g = jnp.tanh(g)
        c = f * c + i * g
        h = o * jnp.tanh(c)
        return (h, c), h

    init = (jnp.zeros((B, hidden_dim), jnp.float32),
            jnp.zeros((B, hidden_dim), jnp.float32))
    _, ys = lax.scan(step, init, x_tbd)
    return ys


def metric_generator_ref(x, raw, rnn_hidden_dim):
    def bilstm(x_btd, fwd, bwd):
        x_tbd = jnp.transpose(x_btd, (1, 0, 2))
        yf = _lstm_dir_ref(x_tbd, *fwd, rnn_hidden_dim)
        yb = _lstm_dir_ref(x_tbd[::-1], *bwd, rnn_hidden_dim)[::-1]
        return jnp.transpose(jnp.concatenate([yf, yb], axis=-1), (1, 0, 2))

    y = bilstm(x, raw["l1_fwd"], raw["l1_bwd"])
    y = bilstm(y, raw["l2_fwd"], raw["l2_bwd"])
    w1, b1 = raw["lin1"]
    w2, b2 = raw["lin2"]
    h = y @ w1.T + b1
    h = jnp.where(h > 0, h, 0.01 * h)
    return jax.nn.sigmoid(h @ w2.T + b2)


if __name__ == "__main__":
    # Small shapes consistent with the module (scaled-down sg/rnn/linear dims).
    BATCH, SEQ = 2, 8
    SG_DIM, RNN_HIDDEN, LIN_HIDDEN = 32, 16, 48

    key = jax.random.PRNGKey(0)
    kx, kp = jax.random.split(key)
    x = jax.random.normal(kx, (BATCH, SEQ, SG_DIM), jnp.float32)

    raw_params = init_metric_generator_params(kp, SG_DIM, RNN_HIDDEN, LIN_HIDDEN)
    slab = pack_params(raw_params, SG_DIM, RNN_HIDDEN, LIN_HIDDEN)

    fwd = jax.jit(functools.partial(metric_generator_forward,
                                    rnn_hidden_dim=RNN_HIDDEN,
                                    linear_hidden_dim=LIN_HIDDEN))
    out = jax.block_until_ready(fwd(x, slab))

    ref = metric_generator_ref(x, raw_params, RNN_HIDDEN)
    assert out.shape == (BATCH, SEQ, SG_DIM)
    assert jnp.max(jnp.abs(out - ref)) < 2e-3, "mismatch vs JAX reference"

    print("KERNEL_OK")
</pallas_src>

<mosaic_0001>
module attributes {stable_mosaic.version = 11 : i64} {
  func.func @_metric_generator_kernel(%arg0: memref<16x32xf32, #tpu.memory_space<vmem>>, %arg1: memref<240x128xf32, #tpu.memory_space<vmem>>, %arg2: memref<16x32xf32, #tpu.memory_space<vmem>>, %arg3: memref<16x32xf32, #tpu.memory_space<vmem>>, %arg4: memref<16x32xf32, #tpu.memory_space<vmem>>, %arg5: memref<4x32xf32, #tpu.memory_space<vmem>>) attributes {dimension_semantics = [], scalar_prefetch = 0 : i64, scratch_operands = 3 : i64, tpu.core_type = #tpu.core_type<tc>} {
    %c0 = arith.constant 0 : index
    %c0_0 = arith.constant 0 : index
    %0 = vector.load %arg0[%c0, %c0_0] : memref<16x32xf32, #tpu.memory_space<vmem>>, vector<16x32xf32>
    %c0_1 = arith.constant 0 : index
    %c0_2 = arith.constant 0 : index
    %1 = vector.load %arg1[%c0_1, %c0_2] : memref<240x128xf32, #tpu.memory_space<vmem>>, vector<32x128xf32>
    %c40 = arith.constant 40 : index
    %c0_3 = arith.constant 0 : index
    %2 = vector.load %arg1[%c40, %c0_3] : memref<240x128xf32, #tpu.memory_space<vmem>>, vector<32x64xf32>
    %c32 = arith.constant 32 : index
    %c0_4 = arith.constant 0 : index
    %3 = vector.load %arg1[%c32, %c0_4] : memref<240x128xf32, #tpu.memory_space<vmem>>, vector<1x128xf32>
    %cst = arith.constant dense<0.000000e+00> : vector<16x128xf32>
    %4 = tpu.matmul %0, %1, %cst {dimension_numbers = #tpu.dot_dimension_numbers<[1], [0], [0], [1], [0, 0, 1, 1], [], []>} : vector<16x32xf32>, vector<32x128xf32>, vector<16x128xf32> -> vector<16x128xf32>
    %5 = vector.broadcast %3 : vector<1x128xf32> to vector<16x128xf32>
    %6 = arith.addf %4, %5 : vector<16x128xf32>
    %7 = vector.extract_strided_slice %6 {offsets = [0, 0], sizes = [1, 64], strides = [1, 1]} : vector<16x128xf32> to vector<1x64xf32>
    %8 = vector.extract_strided_slice %6 {offsets = [8, 0], sizes = [1, 64], strides = [1, 1]} : vector<16x128xf32> to vector<1x64xf32>
    %9 = vector.extract_strided_slice %6 {offsets = [7, 64], sizes = [1, 64], strides = [1, 1]} : vector<16x128xf32> to vector<1x64xf32>
    %10 = vector.extract_strided_slice %6 {offsets = [15, 64], sizes = [1, 64], strides = [1, 1]} : vector<16x128xf32> to vector<1x64xf32>
    %11 = vector.extract_strided_slice %6 {offsets = [1, 0], sizes = [1, 64], strides = [1, 1]} : vector<16x128xf32> to vector<1x64xf32>
    %12 = vector.extract_strided_slice %6 {offsets = [9, 0], sizes = [1, 64], strides = [1, 1]} : vector<16x128xf32> to vector<1x64xf32>
    %13 = vector.extract_strided_slice %6 {offsets = [6, 64], sizes = [1, 64], strides = [1, 1]} : vector<16x128xf32> to vector<1x64xf32>
    %14 = vector.extract_strided_slice %6 {offsets = [14, 64], sizes = [1, 64], strides = [1, 1]} : vector<16x128xf32> to vector<1x64xf32>
    %15 = vector.extract_strided_slice %6 {offsets = [2, 0], sizes = [1, 64], strides = [1, 1]} : vector<16x128xf32> to vector<1x64xf32>
    %16 = vector.extract_strided_slice %6 {offsets = [10, 0], sizes = [1, 64], strides = [1, 1]} : vector<16x128xf32> to vector<1x64xf32>
    %17 = vector.extract_strided_slice %6 {offsets = [5, 64], sizes = [1, 64], strides = [1, 1]} : vector<16x128xf32> to vector<1x64xf32>
    %18 = vector.extract_strided_slice %6 {offsets = [13, 64], sizes = [1, 64], strides = [1, 1]} : vector<16x128xf32> to vector<1x64xf32>
    %19 = vector.extract_strided_slice %6 {offsets = [3, 0], sizes = [1, 64], strides = [1, 1]} : vector<16x128xf32> to vector<1x64xf32>
    %20 = vector.extract_strided_slice %6 {offsets = [11, 0], sizes = [1, 64], strides = [1, 1]} : vector<16x128xf32> to vector<1x64xf32>
    %21 = vector.extract_strided_slice %6 {offsets = [4, 64], sizes = [1, 64], strides = [1, 1]} : vector<16x128xf32> to vector<1x64xf32>
    %22 = vector.extract_strided_slice %6 {offsets = [12, 64], sizes = [1, 64], strides = [1, 1]} : vector<16x128xf32> to vector<1x64xf32>
    %23 = vector.extract_strided_slice %6 {offsets = [4, 0], sizes = [1, 64], strides = [1, 1]} : vector<16x128xf32> to vector<1x64xf32>
    %24 = vector.extract_strided_slice %6 {offsets = [12, 0], sizes = [1, 64], strides = [1, 1]} : vector<16x128xf32> to vector<1x64xf32>
    %25 = vector.extract_strided_slice %6 {offsets = [3, 64], sizes = [1, 64], strides = [1, 1]} : vector<16x128xf32> to vector<1x64xf32>
    %26 = vector.extract_strided_slice %6 {offsets = [11, 64], sizes = [1, 64], strides = [1, 1]} : vector<16x128xf32> to vector<1x64xf32>
    %27 = vector.extract_strided_slice %6 {offsets = [5, 0], sizes = [1, 64], strides = [1, 1]} : vector<16x128xf32> to vector<1x64xf32>
    %28 = vector.extract_strided_slice %6 {offsets = [13, 0], sizes = [1, 64], strides = [1, 1]} : vector<16x128xf32> to vector<1x64xf32>
    %29 = vector.extract_strided_slice %6 {offsets = [2, 64], sizes = [1, 64], strides = [1, 1]} : vector<16x128xf32> to vector<1x64xf32>
    %30 = vector.extract_strided_slice %6 {offsets = [10, 64], sizes = [1, 64], strides = [1, 1]} : vector<16x128xf32> to vector<1x64xf32>
    %31 = vector.extract_strided_slice %6 {offsets = [6, 0], sizes = [1, 64], strides = [1, 1]} : vector<16x128xf32> to vector<1x64xf32>
    %32 = vector.extract_strided_slice %6 {offsets = [14, 0], sizes = [1, 64], strides = [1, 1]} : vector<16x128xf32> to vector<1x64xf32>
    %33 = vector.extract_strided_slice %6 {offsets = [1, 64], sizes = [1, 64], strides = [1, 1]} : vector<16x128xf32> to vector<1x64xf32>
    %34 = vector.extract_strided_slice %6 {offsets = [9, 64], sizes = [1, 64], strides = [1, 1]} : vector<16x128xf32> to vector<1x64xf32>
    %35 = vector.extract_strided_slice %6 {offsets = [7, 0], sizes = [1, 64], strides = [1, 1]} : vector<16x128xf32> to vector<1x64xf32>
    %36 = vector.extract_strided_slice %6 {offsets = [15, 0], sizes = [1, 64], strides = [1, 1]} : vector<16x128xf32> to vector<1x64xf32>
    %37 = vector.extract_strided_slice %6 {offsets = [0, 64], sizes = [1, 64], strides = [1, 1]} : vector<16x128xf32> to vector<1x64xf32>
    %38 = vector.extract_strided_slice %6 {offsets = [8, 64], sizes = [1, 64], strides = [1, 1]} : vector<16x128xf32> to vector<1x64xf32>
    %39 = tpu.concatenate %7, %8, %9, %10, %11, %12, %13, %14, %15, %16, %17, %18, %19, %20, %21, %22 in 0 : vector<1x64xf32>, vector<1x64xf32>, vector<1x64xf32>, vector<1x64xf32>, vector<1x64xf32>, vector<1x64xf32>, vector<1x64xf32>, vector<1x64xf32>, vector<1x64xf32>, vector<1x64xf32>, vector<1x64xf32>, vector<1x64xf32>, vector<1x64xf32>, vector<1x64xf32>, vector<1x64xf32>, vector<1x64xf32> -> vector<16x64xf32>
    %40 = tpu.concatenate %23, %24, %25, %26, %27, %28, %29, %30, %31, %32, %33, %34, %35, %36, %37, %38 in 0 : vector<1x64xf32>, vector<1x64xf32>, vector<1x64xf32>, vector<1x64xf32>, vector<1x64xf32>, vector<1x64xf32>, vector<1x64xf32>, vector<1x64xf32>, vector<1x64xf32>, vector<1x64xf32>, vector<1x64xf32>, vector<1x64xf32>, vector<1x64xf32>, vector<1x64xf32>, vector<1x64xf32>, vector<1x64xf32> -> vector<16x64xf32>
    %41 = tpu.concatenate %39, %40 in 0 : vector<16x64xf32>, vector<16x64xf32> -> vector<32x64xf32>
    %cst_5 = arith.constant 0.000000e+00 : f32
    %42 = vector.broadcast %cst_5 : f32 to vector<4x32xf32>
    %c0_6 = arith.constant 0 : index
    %c0_7 = arith.constant 0 : index
    %43 = vector.load %arg5[%c0_6, %c0_7] : memref<4x32xf32, #tpu.memory_space<vmem>>, vector<4x32xf32>
    tpu.vector_store %arg5[%c0_6, %c0_7], %42 {strides = array<i32>} : memref<4x32xf32, #tpu.memory_space<vmem>>, vector<4x32xf32>,
    %cst_8 = arith.constant 0.000000e+00 : f32
    %44 = vector.broadcast %cst_8 : f32 to vector<4x16xf32>
    %45 = vector.extract_strided_slice %41 {offsets = [0, 0], sizes = [4, 64], strides = [1, 1]} : vector<32x64xf32> to vector<4x64xf32>
    %c0_9 = arith.constant 0 : index
    %c0_10 = arith.constant 0 : index
    %46 = vector.load %arg5[%c0_9, %c0_10] : memref<4x32xf32, #tpu.memory_space<vmem>>, vector<4x32xf32>
    %cst_11 = arith.constant dense<0.000000e+00> : vector<4x64xf32>
    %47 = tpu.matmul %46, %2, %cst_11 {dimension_numbers = #tpu.dot_dimension_numbers<[1], [0], [0], [1], [0, 0, 1, 1], [], []>} : vector<4x32xf32>, vector<32x64xf32>, vector<4x64xf32> -> vector<4x64xf32>
    %48 = arith.addf %45, %47 : vector<4x64xf32>
    %49 = vector.extract_strided_slice %48 {offsets = [0, 0], sizes = [4, 48], strides = [1, 1]} : vector<4x64xf32> to vector<4x48xf32>
    %50 = arith.negf %49 : vector<4x48xf32>
    %51 = math.exp %50 : vector<4x48xf32>
    %cst_12 = arith.constant 1.000000e+00 : f32
    %52 = vector.broadcast %cst_12 : f32 to vector<4x48xf32>
    %53 = arith.addf %52, %51 : vector<4x48xf32>
    %54 = arith.divf %52, %53 : vector<4x48xf32>
    %55 = vector.extract_strided_slice %54 {offsets = [0, 0], sizes = [4, 16], strides = [1, 1]} : vector<4x48xf32> to vector<4x16xf32>
    %56 = vector.extract_strided_slice %54 {offsets = [0, 16], sizes = [4, 16], strides = [1, 1]} : vector<4x48xf32> to vector<4x16xf32>
    %57 = vector.extract_strided_slice %54 {offsets = [0, 32], sizes = [4, 16], strides = [1, 1]} : vector<4x48xf32> to vector<4x16xf32>
    %58 = vector.extract_strided_slice %48 {offsets = [0, 48], sizes = [4, 16], strides = [1, 1]} : vector<4x64xf32> to vector<4x16xf32>
    %59 = math.tanh %58 : vector<4x16xf32>
    %60 = arith.mulf %56, %44 : vector<4x16xf32>
    %61 = arith.mulf %55, %59 : vector<4x16xf32>
    %62 = arith.addf %60, %61 : vector<4x16xf32>
    %63 = math.tanh %62 : vector<4x16xf32>
    %64 = arith.mulf %57, %63 : vector<4x16xf32>
    %65 = vector.extract_strided_slice %64 {offsets = [0, 0], sizes = [2, 16], strides = [1, 1]} : vector<4x16xf32> to vector<2x16xf32>
    %c0_13 = arith.constant 0 : index
    %c0_14 = arith.constant 0 : index
    %66 = vector.load %arg5[%c0_13, %c0_14] : memref<4x32xf32, #tpu.memory_space<vmem>>, vector<2x16xf32>
    tpu.vector_store %arg5[%c0_13, %c0_14], %65 {strides = array<i32>} : memref<4x32xf32, #tpu.memory_space<vmem>>, vector<2x16xf32>,
    %67 = vector.extract_strided_slice %64 {offsets = [2, 0], sizes = [2, 16], strides = [1, 1]} : vector<4x16xf32> to vector<2x16xf32>
    %c2 = arith.constant 2 : index
    %c16 = arith.constant 16 : index
    %68 = vector.load %arg5[%c2, %c16] : memref<4x32xf32, #tpu.memory_space<vmem>>, vector<2x16xf32>
    tpu.vector_store %arg5[%c2, %c16], %67 {strides = array<i32>} : memref<4x32xf32, #tpu.memory_space<vmem>>, vector<2x16xf32>,
    %69 = vector.extract_strided_slice %64 {offsets = [0, 0], sizes = [2, 16], strides = [1, 1]} : vector<4x16xf32> to vector<2x16xf32>
    %c0_15 = arith.constant 0 : index
    %c0_16 = arith.constant 0 : index
    %70 = vector.load %arg3[%c0_15, %c0_16] : memref<16x32xf32, #tpu.memory_space<vmem>>, vector<2x16xf32>
    tpu.vector_store %arg3[%c0_15, %c0_16], %69 {strides = array<i32>} : memref<16x32xf32, #tpu.memory_space<vmem>>, vector<2x16xf32>,
    %71 = vector.extract_strided_slice %64 {offsets = [2, 0], sizes = [2, 16], strides = [1, 1]} : vector<4x16xf32> to vector<2x16xf32>
    %c14 = arith.constant 14 : index
    %c16_17 = arith.constant 16 : index
    %72 = vector.load %arg3[%c14, %c16_17] : memref<16x32xf32, #tpu.memory_space<vmem>>, vector<2x16xf32>
    tpu.vector_store %arg3[%c14, %c16_17], %71 {strides = array<i32>} : memref<16x32xf32, #tpu.memory_space<vmem>>, vector<2x16xf32>,
    %73 = vector.extract_strided_slice %41 {offsets = [4, 0], sizes = [4, 64], strides = [1, 1]} : vector<32x64xf32> to vector<4x64xf32>
    %c0_18 = arith.constant 0 : index
    %c0_19 = arith.constant 0 : index
    %74 = vector.load %arg5[%c0_18, %c0_19] : memref<4x32xf32, #tpu.memory_space<vmem>>, vector<4x32xf32>
    %cst_20 = arith.constant dense<0.000000e+00> : vector<4x64xf32>
    %75 = tpu.matmul %74, %2, %cst_20 {dimension_numbers = #tpu.dot_dimension_numbers<[1], [0], [0], [1], [0, 0, 1, 1], [], []>} : vector<4x32xf32>, vector<32x64xf32>, vector<4x64xf32> -> vector<4x64xf32>
    %76 = arith.addf %73, %75 : vector<4x64xf32>
    %77 = vector.extract_strided_slice %76 {offsets = [0, 0], sizes = [4, 48], strides = [1, 1]} : vector<4x64xf32> to vector<4x48xf32>
    %78 = arith.negf %77 : vector<4x48xf32>
    %79 = math.exp %78 : vector<4x48xf32>
    %cst_21 = arith.constant 1.000000e+00 : f32
    %80 = vector.broadcast %cst_21 : f32 to vector<4x48xf32>
    %81 = arith.addf %80, %79 : vector<4x48xf32>
    %82 = arith.divf %80, %81 : vector<4x48xf32>
    %83 = vector.extract_strided_slice %82 {offsets = [0, 0], sizes = [4, 16], strides = [1, 1]} : vector<4x48xf32> to vector<4x16xf32>
    %84 = vector.extract_strided_slice %82 {offsets = [0, 16], sizes = [4, 16], strides = [1, 1]} : vector<4x48xf32> to vector<4x16xf32>
    %85 = vector.extract_strided_slice %82 {offsets = [0, 32], sizes = [4, 16], strides = [1, 1]} : vector<4x48xf32> to vector<4x16xf32>
    %86 = vector.extract_strided_slice %76 {offsets = [0, 48], sizes = [4, 16], strides = [1, 1]} : vector<4x64xf32> to vector<4x16xf32>
    %87 = math.tanh %86 : vector<4x16xf32>
    %88 = arith.mulf %84, %62 : vector<4x16xf32>
    %89 = arith.mulf %83, %87 : vector<4x16xf32>
    %90 = arith.addf %88, %89 : vector<4x16xf32>
    %91 = math.tanh %90 : vector<4x16xf32>
    %92 = arith.mulf %85, %91 : vector<4x16xf32>
    %93 = vector.extract_strided_slice %92 {offsets = [0, 0], sizes = [2, 16], strides = [1, 1]} : vector<4x16xf32> to vector<2x16xf32>
    %c0_22 = arith.constant 0 : index
    %c0_23 = arith.constant 0 : index
    %94 = vector.load %arg5[%c0_22, %c0_23] : memref<4x32xf32, #tpu.memory_space<vmem>>, vector<2x16xf32>
    tpu.vector_store %arg5[%c0_22, %c0_23], %93 {strides = array<i32>} : memref<4x32xf32, #tpu.memory_space<vmem>>, vector<2x16xf32>,
    %95 = vector.extract_strided_slice %92 {offsets = [2, 0], sizes = [2, 16], strides = [1, 1]} : vector<4x16xf32> to vector<2x16xf32>
    %c2_24 = arith.constant 2 : index
    %c16_25 = arith.constant 16 : index
    %96 = vector.load %arg5[%c2_24, %c16_25] : memref<4x32xf32, #tpu.memory_space<vmem>>, vector<2x16xf32>
    tpu.vector_store %arg5[%c2_24, %c16_25], %95 {strides = array<i32>} : memref<4x32xf32, #tpu.memory_space<vmem>>, vector<2x16xf32>,
    %97 = vector.extract_strided_slice %92 {offsets = [0, 0], sizes = [2, 16], strides = [1, 1]} : vector<4x16xf32> to vector<2x16xf32>
    %c2_26 = arith.constant 2 : index
    %c0_27 = arith.constant 0 : index
    %98 = vector.load %arg3[%c2_26, %c0_27] : memref<16x32xf32, #tpu.memory_space<vmem>>, vector<2x16xf32>
    tpu.vector_store %arg3[%c2_26, %c0_27], %97 {strides = array<i32>} : memref<16x32xf32, #tpu.memory_space<vmem>>, vector<2x16xf32>,
    %99 = vector.extract_strided_slice %92 {offsets = [2, 0], sizes = [2, 16], strides = [1, 1]} : vector<4x16xf32> to vector<2x16xf32>
    %c12 = arith.constant 12 : index
    %c16_28 = arith.constant 16 : index
    %100 = vector.load %arg3[%c12, %c16_28] : memref<16x32xf32, #tpu.memory_space<vmem>>, vector<2x16xf32>
    tpu.vector_store %arg3[%c12, %c16_28], %99 {strides = array<i32>} : memref<16x32xf32, #tpu.memory_space<vmem>>, vector<2x16xf32>,
    %101 = vector.extract_strided_slice %41 {offsets = [8, 0], sizes = [4, 64], strides = [1, 1]} : vector<32x64xf32> to vector<4x64xf32>
    %c0_29 = arith.constant 0 : index
    %c0_30 = arith.constant 0 : index
    %102 = vector.load %arg5[%c0_29, %c0_30] : memref<4x32xf32, #tpu.memory_space<vmem>>, vector<4x32xf32>
    %cst_31 = arith.constant dense<0.000000e+00> : vector<4x64xf32>
    %103 = tpu.matmul %102, %2, %cst_31 {dimension_numbers = #tpu.dot_dimension_numbers<[1], [0], [0], [1], [0, 0, 1, 1], [], []>} : vector<4x32xf32>, vector<32x64xf32>, vector<4x64xf32> -> vector<4x64xf32>
    %104 = arith.addf %101, %103 : vector<4x64xf32>
    %105 = vector.extract_strided_slice %104 {offsets = [0, 0], sizes = [4, 48], strides = [1, 1]} : vector<4x64xf32> to vector<4x48xf32>
    %106 = arith.negf %105 : vector<4x48xf32>
    %107 = math.exp %106 : vector<4x48xf32>
    %cst_32 = arith.constant 1.000000e+00 : f32
    %108 = vector.broadcast %cst_32 : f32 to vector<4x48xf32>
    %109 = arith.addf %108, %107 : vector<4x48xf32>
    %110 = arith.divf %108, %109 : vector<4x48xf32>
    %111 = vector.extract_strided_slice %110 {offsets = [0, 0], sizes = [4, 16], strides = [1, 1]} : vector<4x48xf32> to vector<4x16xf32>
    %112 = vector.extract_strided_slice %110 {offsets = [0, 16], sizes = [4, 16], strides = [1, 1]} : vector<4x48xf32> to vector<4x16xf32>
    %113 = vector.extract_strided_slice %110 {offsets = [0, 32], sizes = [4, 16], strides = [1, 1]} : vector<4x48xf32> to vector<4x16xf32>
    %114 = vector.extract_strided_slice %104 {offsets = [0, 48], sizes = [4, 16], strides = [1, 1]} : vector<4x64xf32> to vector<4x16xf32>
    %115 = math.tanh %114 : vector<4x16xf32>
    %116 = arith.mulf %112, %90 : vector<4x16xf32>
    %117 = arith.mulf %111, %115 : vector<4x16xf32>
    %118 = arith.addf %116, %117 : vector<4x16xf32>
    %119 = math.tanh %118 : vector<4x16xf32>
    %120 = arith.mulf %113, %119 : vector<4x16xf32>
    %121 = vector.extract_strided_slice %120 {offsets = [0, 0], sizes = [2, 16], strides = [1, 1]} : vector<4x16xf32> to vector<2x16xf32>
    %c0_33 = arith.constant 0 : index
    %c0_34 = arith.constant 0 : index
    %122 = vector.load %arg5[%c0_33, %c0_34] : memref<4x32xf32, #tpu.memory_space<vmem>>, vector<2x16xf32>
    tpu.vector_store %arg5[%c0_33, %c0_34], %121 {strides = array<i32>} : memref<4x32xf32, #tpu.memory_space<vmem>>, vector<2x16xf32>,
    %123 = vector.extract_strided_slice %120 {offsets = [2, 0], sizes = [2, 16], strides = [1, 1]} : vector<4x16xf32> to vector<2x16xf32>
    %c2_35 = arith.constant 2 : index
    %c16_36 = arith.constant 16 : index
    %124 = vector.load %arg5[%c2_35, %c16_36] : memref<4x32xf32, #tpu.memory_space<vmem>>, vector<2x16xf32>
    tpu.vector_store %arg5[%c2_35, %c16_36], %123 {strides = array<i32>} : memref<4x32xf32, #tpu.memory_space<vmem>>, vector<2x16xf32>,
    %125 = vector.extract_strided_slice %120 {offsets = [0, 0], sizes = [2, 16], strides = [1, 1]} : vector<4x16xf32> to vector<2x16xf32>
    %c4 = arith.constant 4 : index
    %c0_37 = arith.constant 0 : index
    %126 = vector.load %arg3[%c4, %c0_37] : memref<16x32xf32, #tpu.memory_space<vmem>>, vector<2x16xf32>
    tpu.vector_store %arg3[%c4, %c0_37], %125 {strides = array<i32>} : memref<16x32xf32, #tpu.memory_space<vmem>>, vector<2x16xf32>,
    %127 = vector.extract_strided_slice %120 {offsets = [2, 0], sizes = [2, 16], strides = [1, 1]} : vector<4x16xf32> to vector<2x16xf32>
    %c10 = arith.constant 10 : index
    %c16_38 = arith.constant 16 : index
    %128 = vector.load %arg3[%c10, %c16_38] : memref<16x32xf32, #tpu.memory_space<vmem>>, vector<2x16xf32>
    tpu.vector_store %arg3[%c10, %c16_38], %127 {strides = array<i32>} : memref<16x32xf32, #tpu.memory_space<vmem>>, vector<2x16xf32>,
    %129 = vector.extract_strided_slice %41 {offsets = [12, 0], sizes = [4, 64], strides = [1, 1]} : vector<32x64xf32> to vector<4x64xf32>
    %c0_39 = arith.constant 0 : index
    %c0_40 = arith.constant 0 : index
    %130 = vector.load %arg5[%c0_39, %c0_40] : memref<4x32xf32, #tpu.memory_space<vmem>>, vector<4x32xf32>
    %cst_41 = arith.constant dense<0.000000e+00> : vector<4x64xf32>
    %131 = tpu.matmul %130, %2, %cst_41 {dimension_numbers = #tpu.dot_dimension_numbers<[1], [0], [0], [1], [0, 0, 1, 1], [], []>} : vector<4x32xf32>, vector<32x64xf32>, vector<4x64xf32> -> vector<4x64xf32>
    %132 = arith.addf %129, %131 : vector<4x64xf32>
    %133 = vector.extract_strided_slice %132 {offsets = [0, 0], sizes = [4, 48], strides = [1, 1]} : vector<4x64xf32> to vector<4x48xf32>
    %134 = arith.negf %133 : vector<4x48xf32>
    %135 = math.exp %134 : vector<4x48xf32>
    %cst_42 = arith.constant 1.000000e+00 : f32
    %136 = vector.broadcast %cst_42 : f32 to vector<4x48xf32>
    %137 = arith.addf %136, %135 : vector<4x48xf32>
    %138 = arith.divf %136, %137 : vector<4x48xf32>
    %139 = vector.extract_strided_slice %138 {offsets = [0, 0], sizes = [4, 16], strides = [1, 1]} : vector<4x48xf32> to vector<4x16xf32>
    %140 = vector.extract_strided_slice %138 {offsets = [0, 16], sizes = [4, 16], strides = [1, 1]} : vector<4x48xf32> to vector<4x16xf32>
    %141 = vector.extract_strided_slice %138 {offsets = [0, 32], sizes = [4, 16], strides = [1, 1]} : vector<4x48xf32> to vector<4x16xf32>
    %142 = vector.extract_strided_slice %132 {offsets = [0, 48], sizes = [4, 16], strides = [1, 1]} : vector<4x64xf32> to vector<4x16xf32>
    %143 = math.tanh %142 : vector<4x16xf32>
    %144 = arith.mulf %140, %118 : vector<4x16xf32>
    %145 = arith.mulf %139, %143 : vector<4x16xf32>
    %146 = arith.addf %144, %145 : vector<4x16xf32>
    %147 = math.tanh %146 : vector<4x16xf32>
    %148 = arith.mulf %141, %147 : vector<4x16xf32>
    %149 = vector.extract_strided_slice %148 {offsets = [0, 0], sizes = [2, 16], strides = [1, 1]} : vector<4x16xf32> to vector<2x16xf32>
    %c0_43 = arith.constant 0 : index
    %c0_44 = arith.constant 0 : index
    %150 = vector.load %arg5[%c0_43, %c0_44] : memref<4x32xf32, #tpu.memory_space<vmem>>, vector<2x16xf32>
    tpu.vector_store %arg5[%c0_43, %c0_44], %149 {strides = array<i32>} : memref<4x32xf32, #tpu.memory_space<vmem>>, vector<2x16xf32>,
    %151 = vector.extract_strided_slice %148 {offsets = [2, 0], sizes = [2, 16], strides = [1, 1]} : vector<4x16xf32> to vector<2x16xf32>
    %c2_45 = arith.constant 2 : index
    %c16_46 = arith.constant 16 : index
    %152 = vector.load %arg5[%c2_45, %c16_46] : memref<4x32xf32, #tpu.memory_space<vmem>>, vector<2x16xf32>
    tpu.vector_store %arg5[%c2_45, %c16_46], %151 {strides = array<i32>} : memref<4x32xf32, #tpu.memory_space<vmem>>, vector<2x16xf32>,
    %153 = vector.extract_strided_slice %148 {offsets = [0, 0], sizes = [2, 16], strides = [1, 1]} : vector<4x16xf32> to vector<2x16xf32>
    %c6 = arith.constant 6 : index
    %c0_47 = arith.constant 0 : index
    %154 = vector.load %arg3[%c6, %c0_47] : memref<16x32xf32, #tpu.memory_space<vmem>>, vector<2x16xf32>
    tpu.vector_store %arg3[%c6, %c0_47], %153 {strides = array<i32>} : memref<16x32xf32, #tpu.memory_space<vmem>>, vector<2x16xf32>,
    %155 = vector.extract_strided_slice %148 {offsets = [2, 0], sizes = [2, 16], strides = [1, 1]} : vector<4x16xf32> to vector<2x16xf32>
    %c8 = arith.constant 8 : index
    %c16_48 = arith.constant 16 : index
    %156 = vector.load %arg3[%c8, %c16_48] : memref<16x32xf32, #tpu.memory_space<vmem>>, vector<2x16xf32>
    tpu.vector_store %arg3[%c8, %c16_48], %155 {strides = array<i32>} : memref<16x32xf32, #tpu.memory_space<vmem>>, vector<2x16xf32>,
    %157 = vector.extract_strided_slice %41 {offsets = [16, 0], sizes = [4, 64], strides = [1, 1]} : vector<32x64xf32> to vector<4x64xf32>
    %c0_49 = arith.constant 0 : index
    %c0_50 = arith.constant 0 : index
    %158 = vector.load %arg5[%c0_49, %c0_50] : memref<4x32xf32, #tpu.memory_space<vmem>>, vector<4x32xf32>
    %cst_51 = arith.constant dense<0.000000e+00> : vector<4x64xf32>
    %159 = tpu.matmul %158, %2, %cst_51 {dimension_numbers = #tpu.dot_dimension_numbers<[1], [0], [0], [1], [0, 0, 1, 1], [], []>} : vector<4x32xf32>, vector<32x64xf32>, vector<4x64xf32> -> vector<4x64xf32>
    %160 = arith.addf %157, %159 : vector<4x64xf32>
    %161 = vector.extract_strided_slice %160 {offsets = [0, 0], sizes = [4, 48], strides = [1, 1]} : vector<4x64xf32> to vector<4x48xf32>
    %162 = arith.negf %161 : vector<4x48xf32>
    %163 = math.exp %162 : vector<4x48xf32>
    %cst_52 = arith.constant 1.000000e+00 : f32
    %164 = vector.broadcast %cst_52 : f32 to vector<4x48xf32>
    %165 = arith.addf %164, %163 : vector<4x48xf32>
    %166 = arith.divf %164, %165 : vector<4x48xf32>
    %167 = vector.extract_strided_slice %166 {offsets = [0, 0], sizes = [4, 16], strides = [1, 1]} : vector<4x48xf32> to vector<4x16xf32>
    %168 = vector.extract_strided_slice %166 {offsets = [0, 16], sizes = [4, 16], strides = [1, 1]} : vector<4x48xf32> to vector<4x16xf32>
    %169 = vector.extract_strided_slice %166 {offsets = [0, 32], sizes = [4, 16], strides = [1, 1]} : vector<4x48xf32> to vector<4x16xf32>
    %170 = vector.extract_strided_slice %160 {offsets = [0, 48], sizes = [4, 16], strides = [1, 1]} : vector<4x64xf32> to vector<4x16xf32>
    %171 = math.tanh %170 : vector<4x16xf32>
    %172 = arith.mulf %168, %146 : vector<4x16xf32>
    %173 = arith.mulf %167, %171 : vector<4x16xf32>
    %174 = arith.addf %172, %173 : vector<4x16xf32>
    %175 = math.tanh %174 : vector<4x16xf32>
    %176 = arith.mulf %169, %175 : vector<4x16xf32>
    %177 = vector.extract_strided_slice %176 {offsets = [0, 0], sizes = [2, 16], strides = [1, 1]} : vector<4x16xf32> to vector<2x16xf32>
    %c0_53 = arith.constant 0 : index
    %c0_54 = arith.constant 0 : index
    %178 = vector.load %arg5[%c0_53, %c0_54] : memref<4x32xf32, #tpu.memory_space<vmem>>, vector<2x16xf32>
    tpu.vector_store %arg5[%c0_53, %c0_54], %177 {strides = array<i32>} : memref<4x32xf32, #tpu.memory_space<vmem>>, vector<2x16xf32>,
    %179 = vector.extract_strided_slice %176 {offsets = [2, 0], sizes = [2, 16], strides = [1, 1]} : vector<4x16xf32> to vector<2x16xf32>
    %c2_55 = arith.constant 2 : index
    %c16_56 = arith.constant 16 : index
    %180 = vector.load %arg5[%c2_55, %c16_56] : memref<4x32xf32, #tpu.memory_space<vmem>>, vector<2x16xf32>
    tpu.vector_store %arg5[%c2_55, %c16_56], %179 {strides = array<i32>} : memref<4x32xf32, #tpu.memory_space<vmem>>, vector<2x16xf32>,
    %181 = vector.extract_strided_slice %176 {offsets = [0, 0], sizes = [2, 16], strides = [1, 1]} : vector<4x16xf32> to vector<2x16xf32>
    %c8_57 = arith.constant 8 : index
    %c0_58 = arith.constant 0 : index
    %182 = vector.load %arg3[%c8_57, %c0_58] : memref<16x32xf32, #tpu.memory_space<vmem>>, vector<2x16xf32>
    tpu.vector_store %arg3[%c8_57, %c0_58], %181 {strides = array<i32>} : memref<16x32xf32, #tpu.memory_space<vmem>>, vector<2x16xf32>,
    %183 = vector.extract_strided_slice %176 {offsets = [2, 0], sizes = [2, 16], strides = [1, 1]} : vector<4x16xf32> to vector<2x16xf32>
    %c6_59 = arith.constant 6 : index
    %c16_60 = arith.constant 16 : index
    %184 = vector.load %arg3[%c6_59, %c16_60] : memref<16x32xf32, #tpu.memory_space<vmem>>, vector<2x16xf32>
    tpu.vector_store %arg3[%c6_59, %c16_60], %183 {strides = array<i32>} : memref<16x32xf32, #tpu.memory_space<vmem>>, vector<2x16xf32>,
    %185 = vector.extract_strided_slice %41 {offsets = [20, 0], sizes = [4, 64], strides = [1, 1]} : vector<32x64xf32> to vector<4x64xf32>
    %c0_61 = arith.constant 0 : index
    %c0_62 = arith.constant 0 : index
    %186 = vector.load %arg5[%c0_61, %c0_62] : memref<4x32xf32, #tpu.memory_space<vmem>>, vector<4x32xf32>
    %cst_63 = arith.constant dense<0.000000e+00> : vector<4x64xf32>
    %187 = tpu.matmul %186, %2, %cst_63 {dimension_numbers = #tpu.dot_dimension_numbers<[1], [0], [0], [1], [0, 0, 1, 1], [], []>} : vector<4x32xf32>, vector<32x64xf32>, vector<4x64xf32> -> vector<4x64xf32>
    %188 = arith.addf %185, %187 : vector<4x64xf32>
    %189 = vector.extract_strided_slice %188 {offsets = [0, 0], sizes = [4, 48], strides = [1, 1]} : vector<4x64xf32> to vector<4x48xf32>
    %190 = arith.negf %189 : vector<4x48xf32>
    %191 = math.exp %190 : vector<4x48xf32>
    %cst_64 = arith.constant 1.000000e+00 : f32
    %192 = vector.broadcast %cst_64 : f32 to vector<4x48xf32>
    %193 = arith.addf %192, %191 : vector<4x48xf32>
    %194 = arith.divf %192, %193 : vector<4x48xf32>
    %195 = vector.extract_strided_slice %194 {offsets = [0, 0], sizes = [4, 16], strides = [1, 1]} : vector<4x48xf32> to vector<4x16xf32>
    %196 = vector.extract_strided_slice %194 {offsets = [0, 16], sizes = [4, 16], strides = [1, 1]} : vector<4x48xf32> to vector<4x16xf32>
    %197 = vector.extract_strided_slice %194 {offsets = [0, 32], sizes = [4, 16], strides = [1, 1]} : vector<4x48xf32> to vector<4x16xf32>
    %198 = vector.extract_strided_slice %188 {offsets = [0, 48], sizes = [4, 16], strides = [1, 1]} : vector<4x64xf32> to vector<4x16xf32>
    %199 = math.tanh %198 : vector<4x16xf32>
    %200 = arith.mulf %196, %174 : vector<4x16xf32>
    %201 = arith.mulf %195, %199 : vector<4x16xf32>
    %202 = arith.addf %200, %201 : vector<4x16xf32>
    %203 = math.tanh %202 : vector<4x16xf32>
    %204 = arith.mulf %197, %203 : vector<4x16xf32>
    %205 = vector.extract_strided_slice %204 {offsets = [0, 0], sizes = [2, 16], strides = [1, 1]} : vector<4x16xf32> to vector<2x16xf32>
    %c0_65 = arith.constant 0 : index
    %c0_66 = arith.constant 0 : index
    %206 = vector.load %arg5[%c0_65, %c0_66] : memref<4x32xf32, #tpu.memory_space<vmem>>, vector<2x16xf32>
    tpu.vector_store %arg5[%c0_65, %c0_66], %205 {strides = array<i32>} : memref<4x32xf32, #tpu.memory_space<vmem>>, vector<2x16xf32>,
    %207 = vector.extract_strided_slice %204 {offsets = [2, 0], sizes = [2, 16], strides = [1, 1]} : vector<4x16xf32> to vector<2x16xf32>
    %c2_67 = arith.constant 2 : index
    %c16_68 = arith.constant 16 : index
    %208 = vector.load %arg5[%c2_67, %c16_68] : memref<4x32xf32, #tpu.memory_space<vmem>>, vector<2x16xf32>
    tpu.vector_store %arg5[%c2_67, %c16_68], %207 {strides = array<i32>} : memref<4x32xf32, #tpu.memory_space<vmem>>, vector<2x16xf32>,
    %209 = vector.extract_strided_slice %204 {offsets = [0, 0], sizes = [2, 16], strides = [1, 1]} : vector<4x16xf32> to vector<2x16xf32>
    %c10_69 = arith.constant 10 : index
    %c0_70 = arith.constant 0 : index
    %210 = vector.load %arg3[%c10_69, %c0_70] : memref<16x32xf32, #tpu.memory_space<vmem>>, vector<2x16xf32>
    tpu.vector_store %arg3[%c10_69, %c0_70], %209 {strides = array<i32>} : memref<16x32xf32, #tpu.memory_space<vmem>>, vector<2x16xf32>,
    %211 = vector.extract_strided_slice %204 {offsets = [2, 0], sizes = [2, 16], strides = [1, 1]} : vector<4x16xf32> to vector<2x16xf32>
    %c4_71 = arith.constant 4 : index
    %c16_72 = arith.constant 16 : index
    %212 = vector.load %arg3[%c4_71, %c16_72] : memref<16x32xf32, #tpu.memory_space<vmem>>, vector<2x16xf32>
    tpu.vector_store %arg3[%c4_71, %c16_72], %211 {strides = array<i32>} : memref<16x32xf32, #tpu.memory_space<vmem>>, vector<2x16xf32>,
    %213 = vector.extract_strided_slice %41 {offsets = [24, 0], sizes = [4, 64], strides = [1, 1]} : vector<32x64xf32> to vector<4x64xf32>
    %c0_73 = arith.constant 0 : index
    %c0_74 = arith.constant 0 : index
    %214 = vector.load %arg5[%c0_73, %c0_74] : memref<4x32xf32, #tpu.memory_space<vmem>>, vector<4x32xf32>
    %cst_75 = arith.constant dense<0.000000e+00> : vector<4x64xf32>
    %215 = tpu.matmul %214, %2, %cst_75 {dimension_numbers = #tpu.dot_dimension_numbers<[1], [0], [0], [1], [0, 0, 1, 1], [], []>} : vector<4x32xf32>, vector<32x64xf32>, vector<4x64xf32> -> vector<4x64xf32>
    %216 = arith.addf %213, %215 : vector<4x64xf32>
    %217 = vector.extract_strided_slice %216 {offsets = [0, 0], sizes = [4, 48], strides = [1, 1]} : vector<4x64xf32> to vector<4x48xf32>
    %218 = arith.negf %217 : vector<4x48xf32>
    %219 = math.exp %218 : vector<4x48xf32>
    %cst_76 = arith.constant 1.000000e+00 : f32
    %220 = vector.broadcast %cst_76 : f32 to vector<4x48xf32>
    %221 = arith.addf %220, %219 : vector<4x48xf32>
    %222 = arith.divf %220, %221 : vector<4x48xf32>
    %223 = vector.extract_strided_slice %222 {offsets = [0, 0], sizes = [4, 16], strides = [1, 1]} : vector<4x48xf32> to vector<4x16xf32>
    %224 = vector.extract_strided_slice %222 {offsets = [0, 16], sizes = [4, 16], strides = [1, 1]} : vector<4x48xf32> to vector<4x16xf32>
    %225 = vector.extract_strided_slice %222 {offsets = [0, 32], sizes = [4, 16], strides = [1, 1]} : vector<4x48xf32> to vector<4x16xf32>
    %226 = vector.extract_strided_slice %216 {offsets = [0, 48], sizes = [4, 16], strides = [1, 1]} : vector<4x64xf32> to vector<4x16xf32>
    %227 = math.tanh %226 : vector<4x16xf32>
    %228 = arith.mulf %224, %202 : vector<4x16xf32>
    %229 = arith.mulf %223, %227 : vector<4x16xf32>
    %230 = arith.addf %228, %229 : vector<4x16xf32>
    %231 = math.tanh %230 : vector<4x16xf32>
    %232 = arith.mulf %225, %231 : vector<4x16xf32>
    %233 = vector.extract_strided_slice %232 {offsets = [0, 0], sizes = [2, 16], strides = [1, 1]} : vector<4x16xf32> to vector<2x16xf32>
    %c0_77 = arith.constant 0 : index
    %c0_78 = arith.constant 0 : index
    %234 = vector.load %arg5[%c0_77, %c0_78] : memref<4x32xf32, #tpu.memory_space<vmem>>, vector<2x16xf32>
    tpu.vector_store %arg5[%c0_77, %c0_78], %233 {strides = array<i32>} : memref<4x32xf32, #tpu.memory_space<vmem>>, vector<2x16xf32>,
    %235 = vector.extract_strided_slice %232 {offsets = [2, 0], sizes = [2, 16], strides = [1, 1]} : vector<4x16xf32> to vector<2x16xf32>
    %c2_79 = arith.constant 2 : index
    %c16_80 = arith.constant 16 : index
    %236 = vector.load %arg5[%c2_79, %c16_80] : memref<4x32xf32, #tpu.memory_space<vmem>>, vector<2x16xf32>
    tpu.vector_store %arg5[%c2_79, %c16_80], %235 {strides = array<i32>} : memref<4x32xf32, #tpu.memory_space<vmem>>, vector<2x16xf32>,
    %237 = vector.extract_strided_slice %232 {offsets = [0, 0], sizes = [2, 16], strides = [1, 1]} : vector<4x16xf32> to vector<2x16xf32>
    %c12_81 = arith.constant 12 : index
    %c0_82 = arith.constant 0 : index
    %238 = vector.load %arg3[%c12_81, %c0_82] : memref<16x32xf32, #tpu.memory_space<vmem>>, vector<2x16xf32>
    tpu.vector_store %arg3[%c12_81, %c0_82], %237 {strides = array<i32>} : memref<16x32xf32, #tpu.memory_space<vmem>>, vector<2x16xf32>,
    %239 = vector.extract_strided_slice %232 {offsets = [2, 0], sizes = [2, 16], strides = [1, 1]} : vector<4x16xf32> to vector<2x16xf32>
    %c2_83 = arith.constant 2 : index
    %c16_84 = arith.constant 16 : index
    %240 = vector.load %arg3[%c2_83, %c16_84] : memref<16x32xf32, #tpu.memory_space<vmem>>, vector<2x16xf32>
    tpu.vector_store %arg3[%c2_83, %c16_84], %239 {strides = array<i32>} : memref<16x32xf32, #tpu.memory_space<vmem>>, vector<2x16xf32>,
    %241 = vector.extract_strided_slice %41 {offsets = [28, 0], sizes = [4, 64], strides = [1, 1]} : vector<32x64xf32> to vector<4x64xf32>
    %c0_85 = arith.constant 0 : index
    %c0_86 = arith.constant 0 : index
    %242 = vector.load %arg5[%c0_85, %c0_86] : memref<4x32xf32, #tpu.memory_space<vmem>>, vector<4x32xf32>
    %cst_87 = arith.constant dense<0.000000e+00> : vector<4x64xf32>
    %243 = tpu.matmul %242, %2, %cst_87 {dimension_numbers = #tpu.dot_dimension_numbers<[1], [0], [0], [1], [0, 0, 1, 1], [], []>} : vector<4x32xf32>, vector<32x64xf32>, vector<4x64xf32> -> vector<4x64xf32>
    %244 = arith.addf %241, %243 : vector<4x64xf32>
    %245 = vector.extract_strided_slice %244 {offsets = [0, 0], sizes = [4, 48], strides = [1, 1]} : vector<4x64xf32> to vector<4x48xf32>
    %246 = arith.negf %245 : vector<4x48xf32>
    %247 = math.exp %246 : vector<4x48xf32>
    %cst_88 = arith.constant 1.000000e+00 : f32
    %248 = vector.broadcast %cst_88 : f32 to vector<4x48xf32>
    %249 = arith.addf %248, %247 : vector<4x48xf32>
    %250 = arith.divf %248, %249 : vector<4x48xf32>
    %251 = vector.extract_strided_slice %250 {offsets = [0, 0], sizes = [4, 16], strides = [1, 1]} : vector<4x48xf32> to vector<4x16xf32>
    %252 = vector.extract_strided_slice %250 {offsets = [0, 16], sizes = [4, 16], strides = [1, 1]} : vector<4x48xf32> to vector<4x16xf32>
    %253 = vector.extract_strided_slice %250 {offsets = [0, 32], sizes = [4, 16], strides = [1, 1]} : vector<4x48xf32> to vector<4x16xf32>
    %254 = vector.extract_strided_slice %244 {offsets = [0, 48], sizes = [4, 16], strides = [1, 1]} : vector<4x64xf32> to vector<4x16xf32>
    %255 = math.tanh %254 : vector<4x16xf32>
    %256 = arith.mulf %252, %230 : vector<4x16xf32>
    %257 = arith.mulf %251, %255 : vector<4x16xf32>
    %258 = arith.addf %256, %257 : vector<4x16xf32>
    %259 = math.tanh %258 : vector<4x16xf32>
    %260 = arith.mulf %253, %259 : vector<4x16xf32>
    %261 = vector.extract_strided_slice %260 {offsets = [0, 0], sizes = [2, 16], strides = [1, 1]} : vector<4x16xf32> to vector<2x16xf32>
    %c0_89 = arith.constant 0 : index
    %c0_90 = arith.constant 0 : index
    %262 = vector.load %arg5[%c0_89, %c0_90] : memref<4x32xf32, #tpu.memory_space<vmem>>, vector<2x16xf32>
    tpu.vector_store %arg5[%c0_89, %c0_90], %261 {strides = array<i32>} : memref<4x32xf32, #tpu.memory_space<vmem>>, vector<2x16xf32>,
    %263 = vector.extract_strided_slice %260 {offsets = [2, 0], sizes = [2, 16], strides = [1, 1]} : vector<4x16xf32> to vector<2x16xf32>
    %c2_91 = arith.constant 2 : index
    %c16_92 = arith.constant 16 : index
    %264 = vector.load %arg5[%c2_91, %c16_92] : memref<4x32xf32, #tpu.memory_space<vmem>>, vector<2x16xf32>
    tpu.vector_store %arg5[%c2_91, %c16_92], %263 {strides = array<i32>} : memref<4x32xf32, #tpu.memory_space<vmem>>, vector<2x16xf32>,
    %265 = vector.extract_strided_slice %260 {offsets = [0, 0], sizes = [2, 16], strides = [1, 1]} : vector<4x16xf32> to vector<2x16xf32>
    %c14_93 = arith.constant 14 : index
    %c0_94 = arith.constant 0 : index
    %266 = vector.load %arg3[%c14_93, %c0_94] : memref<16x32xf32, #tpu.memory_space<vmem>>, vector<2x16xf32>
    tpu.vector_store %arg3[%c14_93, %c0_94], %265 {strides = array<i32>} : memref<16x32xf32, #tpu.memory_space<vmem>>, vector<2x16xf32>,
    %267 = vector.extract_strided_slice %260 {offsets = [2, 0], sizes = [2, 16], strides = [1, 1]} : vector<4x16xf32> to vector<2x16xf32>
    %c0_95 = arith.constant 0 : index
    %c16_96 = arith.constant 16 : index
    %268 = vector.load %arg3[%c0_95, %c16_96] : memref<16x32xf32, #tpu.memory_space<vmem>>, vector<2x16xf32>
    tpu.vector_store %arg3[%c0_95, %c16_96], %267 {strides = array<i32>} : memref<16x32xf32, #tpu.memory_space<vmem>>, vector<2x16xf32>,
    %c0_97 = arith.constant 0 : index
    %c0_98 = arith.constant 0 : index
    %269 = vector.load %arg3[%c0_97, %c0_98] : memref<16x32xf32, #tpu.memory_space<vmem>>, vector<16x32xf32>
    %c72 = arith.constant 72 : index
    %c0_99 = arith.constant 0 : index
    %270 = vector.load %arg1[%c72, %c0_99] : memref<240x128xf32, #tpu.memory_space<vmem>>, vector<32x128xf32>
    %c112 = arith.constant 112 : index
    %c0_100 = arith.constant 0 : index
    %271 = vector.load %arg1[%c112, %c0_100] : memref<240x128xf32, #tpu.memory_space<vmem>>, vector<32x64xf32>
    %c104 = arith.constant 104 : index
    %c0_101 = arith.constant 0 : index
    %272 = vector.load %arg1[%c104, %c0_101] : memref<240x128xf32, #tpu.memory_space<vmem>>, vector<1x128xf32>
    %cst_102 = arith.constant dense<0.000000e+00> : vector<16x128xf32>
    %273 = tpu.matmul %269, %270, %cst_102 {dimension_numbers = #tpu.dot_dimension_numbers<[1], [0], [0], [1], [0, 0, 1, 1], [], []>} : vector<16x32xf32>, vector<32x128xf32>, vector<16x128xf32> -> vector<16x128xf32>
    %274 = vector.broadcast %272 : vector<1x128xf32> to vector<16x128xf32>
    %275 = arith.addf %273, %274 : vector<16x128xf32>
    %276 = vector.extract_strided_slice %275 {offsets = [0, 0], sizes = [2, 64], strides = [1, 1]} : vector<16x128xf32> to vector<2x64xf32>
    %277 = vector.extract_strided_slice %275 {offsets = [14, 64], sizes = [2, 64], strides = [1, 1]} : vector<16x128xf32> to vector<2x64xf32>
    %278 = vector.extract_strided_slice %275 {offsets = [2, 0], sizes = [2, 64], strides = [1, 1]} : vector<16x128xf32> to vector<2x64xf32>
    %279 = vector.extract_strided_slice %275 {offsets = [12, 64], sizes = [2, 64], strides = [1, 1]} : vector<16x128xf32> to vector<2x64xf32>
    %280 = vector.extract_strided_slice %275 {offsets = [4, 0], sizes = [2, 64], strides = [1, 1]} : vector<16x128xf32> to vector<2x64xf32>
    %281 = vector.extract_strided_slice %275 {offsets = [10, 64], sizes = [2, 64], strides = [1, 1]} : vector<16x128xf32> to vector<2x64xf32>
    %282 = vector.extract_strided_slice %275 {offsets = [6, 0], sizes = [2, 64], strides = [1, 1]} : vector<16x128xf32> to vector<2x64xf32>
    %283 = vector.extract_strided_slice %275 {offsets = [8, 64], sizes = [2, 64], strides = [1, 1]} : vector<16x128xf32> to vector<2x64xf32>
    %284 = vector.extract_strided_slice %275 {offsets = [8, 0], sizes = [2, 64], strides = [1, 1]} : vector<16x128xf32> to vector<2x64xf32>
    %285 = vector.extract_strided_slice %275 {offsets = [6, 64], sizes = [2, 64], strides = [1, 1]} : vector<16x128xf32> to vector<2x64xf32>
    %286 = vector.extract_strided_slice %275 {offsets = [10, 0], sizes = [2, 64], strides = [1, 1]} : vector<16x128xf32> to vector<2x64xf32>
    %287 = vector.extract_strided_slice %275 {offsets = [4, 64], sizes = [2, 64], strides = [1, 1]} : vector<16x128xf32> to vector<2x64xf32>
    %288 = vector.extract_strided_slice %275 {offsets = [12, 0], sizes = [2, 64], strides = [1, 1]} : vector<16x128xf32> to vector<2x64xf32>
    %289 = vector.extract_strided_slice %275 {offsets = [2, 64], sizes = [2, 64], strides = [1, 1]} : vector<16x128xf32> to vector<2x64xf32>
    %290 = vector.extract_strided_slice %275 {offsets = [14, 0], sizes = [2, 64], strides = [1, 1]} : vector<16x128xf32> to vector<2x64xf32>
    %291 = vector.extract_strided_slice %275 {offsets = [0, 64], sizes = [2, 64], strides = [1, 1]} : vector<16x128xf32> to vector<2x64xf32>
    %292 = tpu.concatenate %276, %277, %278, %279, %280, %281, %282, %283, %284, %285, %286, %287, %288, %289, %290, %291 in 0 : vector<2x64xf32>, vector<2x64xf32>, vector<2x64xf32>, vector<2x64xf32>, vector<2x64xf32>, vector<2x64xf32>, vector<2x64xf32>, vector<2x64xf32>, vector<2x64xf32>, vector<2x64xf32>, vector<2x64xf32>, vector<2x64xf32>, vector<2x64xf32>, vector<2x64xf32>, vector<2x64xf32>, vector<2x64xf32> -> vector<32x64xf32>
    %cst_103 = arith.constant 0.000000e+00 : f32
    %293 = vector.broadcast %cst_103 : f32 to vector<4x32xf32>
    %c0_104 = arith.constant 0 : index
    %c0_105 = arith.constant 0 : index
    %294 = vector.load %arg5[%c0_104, %c0_105] : memref<4x32xf32, #tpu.memory_space<vmem>>, vector<4x32xf32>
    tpu.vector_store %arg5[%c0_104, %c0_105], %293 {strides = array<i32>} : memref<4x32xf32, #tpu.memory_space<vmem>>, vector<4x32xf32>,
    %cst_106 = arith.constant 0.000000e+00 : f32
    %295 = vector.broadcast %cst_106 : f32 to vector<4x16xf32>
    %296 = vector.extract_strided_slice %292 {offsets = [0, 0], sizes = [4, 64], strides = [1, 1]} : vector<32x64xf32> to vector<4x64xf32>
    %c0_107 = arith.constant 0 : index
    %c0_108 = arith.constant 0 : index
    %297 = vector.load %arg5[%c0_107, %c0_108] : memref<4x32xf32, #tpu.memory_space<vmem>>, vector<4x32xf32>
    %cst_109 = arith.constant dense<0.000000e+00> : vector<4x64xf32>
    %298 = tpu.matmul %297, %271, %cst_109 {dimension_numbers = #tpu.dot_dimension_numbers<[1], [0], [0], [1], [0, 0, 1, 1], [], []>} : vector<4x32xf32>, vector<32x64xf32>, vector<4x64xf32> -> vector<4x64xf32>
    %299 = arith.addf %296, %298 : vector<4x64xf32>
    %300 = vector.extract_strided_slice %299 {offsets = [0, 0], sizes = [4, 48], strides = [1, 1]} : vector<4x64xf32> to vector<4x48xf32>
    %301 = arith.negf %300 : vector<4x48xf32>
    %302 = math.exp %301 : vector<4x48xf32>
    %cst_110 = arith.constant 1.000000e+00 : f32
    %303 = vector.broadcast %cst_110 : f32 to vector<4x48xf32>
    %304 = arith.addf %303, %302 : vector<4x48xf32>
    %305 = arith.divf %303, %304 : vector<4x48xf32>
    %306 = vector.extract_strided_slice %305 {offsets = [0, 0], sizes = [4, 16], strides = [1, 1]} : vector<4x48xf32> to vector<4x16xf32>
    %307 = vector.extract_strided_slice %305 {offsets = [0, 16], sizes = [4, 16], strides = [1, 1]} : vector<4x48xf32> to vector<4x16xf32>
    %308 = vector.extract_strided_slice %305 {offsets = [0, 32], sizes = [4, 16], strides = [1, 1]} : vector<4x48xf32> to vector<4x16xf32>
    %309 = vector.extract_strided_slice %299 {offsets = [0, 48], sizes = [4, 16], strides = [1, 1]} : vector<4x64xf32> to vector<4x16xf32>
    %310 = math.tanh %309 : vector<4x16xf32>
    %311 = arith.mulf %307, %295 : vector<4x16xf32>
    %312 = arith.mulf %306, %310 : vector<4x16xf32>
    %313 = arith.addf %311, %312 : vector<4x16xf32>
    %314 = math.tanh %313 : vector<4x16xf32>
    %315 = arith.mulf %308, %314 : vector<4x16xf32>
    %316 = vector.extract_strided_slice %315 {offsets = [0, 0], sizes = [2, 16], strides = [1, 1]} : vector<4x16xf32> to vector<2x16xf32>
    %c0_111 = arith.constant 0 : index
    %c0_112 = arith.constant 0 : index
    %317 = vector.load %arg5[%c0_111, %c0_112] : memref<4x32xf32, #tpu.memory_space<vmem>>, vector<2x16xf32>
    tpu.vector_store %arg5[%c0_111, %c0_112], %316 {strides = array<i32>} : memref<4x32xf32, #tpu.memory_space<vmem>>, vector<2x16xf32>,
    %318 = vector.extract_strided_slice %315 {offsets = [2, 0], sizes = [2, 16], strides = [1, 1]} : vector<4x16xf32> to vector<2x16xf32>
    %c2_113 = arith.constant 2 : index
    %c16_114 = arith.constant 16 : index
    %319 = vector.load %arg5[%c2_113, %c16_114] : memref<4x32xf32, #tpu.memory_space<vmem>>, vector<2x16xf32>
    tpu.vector_store %arg5[%c2_113, %c16_114], %318 {strides = array<i32>} : memref<4x32xf32, #tpu.memory_space<vmem>>, vector<2x16xf32>,
    %320 = vector.extract_strided_slice %315 {offsets = [0, 0], sizes = [2, 16], strides = [1, 1]} : vector<4x16xf32> to vector<2x16xf32>
    %c0_115 = arith.constant 0 : index
    %c0_116 = arith.constant 0 : index
    %321 = vector.load %arg4[%c0_115, %c0_116] : memref<16x32xf32, #tpu.memory_space<vmem>>, vector<2x16xf32>
    tpu.vector_store %arg4[%c0_115, %c0_116], %320 {strides = array<i32>} : memref<16x32xf32, #tpu.memory_space<vmem>>, vector<2x16xf32>,
    %322 = vector.extract_strided_slice %315 {offsets = [2, 0], sizes = [2, 16], strides = [1, 1]} : vector<4x16xf32> to vector<2x16xf32>
    %c14_117 = arith.constant 14 : index
    %c16_118 = arith.constant 16 : index
    %323 = vector.load %arg4[%c14_117, %c16_118] : memref<16x32xf32, #tpu.memory_space<vmem>>, vector<2x16xf32>
    tpu.vector_store %arg4[%c14_117, %c16_118], %322 {strides = array<i32>} : memref<16x32xf32, #tpu.memory_space<vmem>>, vector<2x16xf32>,
    %324 = vector.extract_strided_slice %292 {offsets = [4, 0], sizes = [4, 64], strides = [1, 1]} : vector<32x64xf32> to vector<4x64xf32>
    %c0_119 = arith.constant 0 : index
    %c0_120 = arith.constant 0 : index
    %325 = vector.load %arg5[%c0_119, %c0_120] : memref<4x32xf32, #tpu.memory_space<vmem>>, vector<4x32xf32>
    %cst_121 = arith.constant dense<0.000000e+00> : vector<4x64xf32>
    %326 = tpu.matmul %325, %271, %cst_121 {dimension_numbers = #tpu.dot_dimension_numbers<[1], [0], [0], [1], [0, 0, 1, 1], [], []>} : vector<4x32xf32>, vector<32x64xf32>, vector<4x64xf32> -> vector<4x64xf32>
    %327 = arith.addf %324, %326 : vector<4x64xf32>
    %328 = vector.extract_strided_slice %327 {offsets = [0, 0], sizes = [4, 48], strides = [1, 1]} : vector<4x64xf32> to vector<4x48xf32>
    %329 = arith.negf %328 : vector<4x48xf32>
    %330 = math.exp %329 : vector<4x48xf32>
    %cst_122 = arith.constant 1.000000e+00 : f32
    %331 = vector.broadcast %cst_122 : f32 to vector<4x48xf32>
    %332 = arith.addf %331, %330 : vector<4x48xf32>
    %333 = arith.divf %331, %332 : vector<4x48xf32>
    %334 = vector.extract_strided_slice %333 {offsets = [0, 0], sizes = [4, 16], strides = [1, 1]} : vector<4x48xf32> to vector<4x16xf32>
    %335 = vector.extract_strided_slice %333 {offsets = [0, 16], sizes = [4, 16], strides = [1, 1]} : vector<4x48xf32> to vector<4x16xf32>
    %336 = vector.extract_strided_slice %333 {offsets = [0, 32], sizes = [4, 16], strides = [1, 1]} : vector<4x48xf32> to vector<4x16xf32>
    %337 = vector.extract_strided_slice %327 {offsets = [0, 48], sizes = [4, 16], strides = [1, 1]} : vector<4x64xf32> to vector<4x16xf32>
    %338 = math.tanh %337 : vector<4x16xf32>
    %339 = arith.mulf %335, %313 : vector<4x16xf32>
    %340 = arith.mulf %334, %338 : vector<4x16xf32>
    %341 = arith.addf %339, %340 : vector<4x16xf32>
    %342 = math.tanh %341 : vector<4x16xf32>
    %343 = arith.mulf %336, %342 : vector<4x16xf32>
    %344 = vector.extract_strided_slice %343 {offsets = [0, 0], sizes = [2, 16], strides = [1, 1]} : vector<4x16xf32> to vector<2x16xf32>
    %c0_123 = arith.constant 0 : index
    %c0_124 = arith.constant 0 : index
    %345 = vector.load %arg5[%c0_123, %c0_124] : memref<4x32xf32, #tpu.memory_space<vmem>>, vector<2x16xf32>
    tpu.vector_store %arg5[%c0_123, %c0_124], %344 {strides = array<i32>} : memref<4x32xf32, #tpu.memory_space<vmem>>, vector<2x16xf32>,
    %346 = vector.extract_strided_slice %343 {offsets = [2, 0], sizes = [2, 16], strides = [1, 1]} : vector<4x16xf32> to vector<2x16xf32>
    %c2_125 = arith.constant 2 : index
    %c16_126 = arith.constant 16 : index
    %347 = vector.load %arg5[%c2_125, %c16_126] : memref<4x32xf32, #tpu.memory_space<vmem>>, vector<2x16xf32>
    tpu.vector_store %arg5[%c2_125, %c16_126], %346 {strides = array<i32>} : memref<4x32xf32, #tpu.memory_space<vmem>>, vector<2x16xf32>,
    %348 = vector.extract_strided_slice %343 {offsets = [0, 0], sizes = [2, 16], strides = [1, 1]} : vector<4x16xf32> to vector<2x16xf32>
    %c2_127 = arith.constant 2 : index
    %c0_128 = arith.constant 0 : index
    %349 = vector.load %arg4[%c2_127, %c0_128] : memref<16x32xf32, #tpu.memory_space<vmem>>, vector<2x16xf32>
    tpu.vector_store %arg4[%c2_127, %c0_128], %348 {strides = array<i32>} : memref<16x32xf32, #tpu.memory_space<vmem>>, vector<2x16xf32>,
    %350 = vector.extract_strided_slice %343 {offsets = [2, 0], sizes = [2, 16], strides = [1, 1]} : vector<4x16xf32> to vector<2x16xf32>
    %c12_129 = arith.constant 12 : index
    %c16_130 = arith.constant 16 : index
    %351 = vector.load %arg4[%c12_129, %c16_130] : memref<16x32xf32, #tpu.memory_space<vmem>>, vector<2x16xf32>
    tpu.vector_store %arg4[%c12_129, %c16_130], %350 {strides = array<i32>} : memref<16x32xf32, #tpu.memory_space<vmem>>, vector<2x16xf32>,
    %352 = vector.extract_strided_slice %292 {offsets = [8, 0], sizes = [4, 64], strides = [1, 1]} : vector<32x64xf32> to vector<4x64xf32>
    %c0_131 = arith.constant 0 : index
    %c0_132 = arith.constant 0 : index
    %353 = vector.load %arg5[%c0_131, %c0_132] : memref<4x32xf32, #tpu.memory_space<vmem>>, vector<4x32xf32>
    %cst_133 = arith.constant dense<0.000000e+00> : vector<4x64xf32>
    %354 = tpu.matmul %353, %271, %cst_133 {dimension_numbers = #tpu.dot_dimension_numbers<[1], [0], [0], [1], [0, 0, 1, 1], [], []>} : vector<4x32xf32>, vector<32x64xf32>, vector<4x64xf32> -> vector<4x64xf32>
    %355 = arith.addf %352, %354 : vector<4x64xf32>
    %356 = vector.extract_strided_slice %355 {offsets = [0, 0], sizes = [4, 48], strides = [1, 1]} : vector<4x64xf32> to vector<4x48xf32>
    %357 = arith.negf %356 : vector<4x48xf32>
    %358 = math.exp %357 : vector<4x48xf32>
    %cst_134 = arith.constant 1.000000e+00 : f32
    %359 = vector.broadcast %cst_134 : f32 to vector<4x48xf32>
    %360 = arith.addf %359, %358 : vector<4x48xf32>
    %361 = arith.divf %359, %360 : vector<4x48xf32>
    %362 = vector.extract_strided_slice %361 {offsets = [0, 0], sizes = [4, 16], strides = [1, 1]} : vector<4x48xf32> to vector<4x16xf32>
    %363 = vector.extract_strided_slice %361 {offsets = [0, 16], sizes = [4, 16], strides = [1, 1]} : vector<4x48xf32> to vector<4x16xf32>
    %364 = vector.extract_strided_slice %361 {offsets = [0, 32], sizes = [4, 16], strides = [1, 1]} : vector<4x48xf32> to vector<4x16xf32>
    %365 = vector.extract_strided_slice %355 {offsets = [0, 48], sizes = [4, 16], strides = [1, 1]} : vector<4x64xf32> to vector<4x16xf32>
    %366 = math.tanh %365 : vector<4x16xf32>
    %367 = arith.mulf %363, %341 : vector<4x16xf32>
    %368 = arith.mulf %362, %366 : vector<4x16xf32>
    %369 = arith.addf %367, %368 : vector<4x16xf32>
    %370 = math.tanh %369 : vector<4x16xf32>
    %371 = arith.mulf %364, %370 : vector<4x16xf32>
    %372 = vector.extract_strided_slice %371 {offsets = [0, 0], sizes = [2, 16], strides = [1, 1]} : vector<4x16xf32> to vector<2x16xf32>
    %c0_135 = arith.constant 0 : index
    %c0_136 = arith.constant 0 : index
    %373 = vector.load %arg5[%c0_135, %c0_136] : memref<4x32xf32, #tpu.memory_space<vmem>>, vector<2x16xf32>
    tpu.vector_store %arg5[%c0_135, %c0_136], %372 {strides = array<i32>} : memref<4x32xf32, #tpu.memory_space<vmem>>, vector<2x16xf32>,
    %374 = vector.extract_strided_slice %371 {offsets = [2, 0], sizes = [2, 16], strides = [1, 1]} : vector<4x16xf32> to vector<2x16xf32>
    %c2_137 = arith.constant 2 : index
    %c16_138 = arith.constant 16 : index
    %375 = vector.load %arg5[%c2_137, %c16_138] : memref<4x32xf32, #tpu.memory_space<vmem>>, vector<2x16xf32>
    tpu.vector_store %arg5[%c2_137, %c16_138], %374 {strides = array<i32>} : memref<4x32xf32, #tpu.memory_space<vmem>>, vector<2x16xf32>,
    %376 = vector.extract_strided_slice %371 {offsets = [0, 0], sizes = [2, 16], strides = [1, 1]} : vector<4x16xf32> to vector<2x16xf32>
    %c4_139 = arith.constant 4 : index
    %c0_140 = arith.constant 0 : index
    %377 = vector.load %arg4[%c4_139, %c0_140] : memref<16x32xf32, #tpu.memory_space<vmem>>, vector<2x16xf32>
    tpu.vector_store %arg4[%c4_139, %c0_140], %376 {strides = array<i32>} : memref<16x32xf32, #tpu.memory_space<vmem>>, vector<2x16xf32>,
    %378 = vector.extract_strided_slice %371 {offsets = [2, 0], sizes = [2, 16], strides = [1, 1]} : vector<4x16xf32> to vector<2x16xf32>
    %c10_141 = arith.constant 10 : index
    %c16_142 = arith.constant 16 : index
    %379 = vector.load %arg4[%c10_141, %c16_142] : memref<16x32xf32, #tpu.memory_space<vmem>>, vector<2x16xf32>
    tpu.vector_store %arg4[%c10_141, %c16_142], %378 {strides = array<i32>} : memref<16x32xf32, #tpu.memory_space<vmem>>, vector<2x16xf32>,
    %380 = vector.extract_strided_slice %292 {offsets = [12, 0], sizes = [4, 64], strides = [1, 1]} : vector<32x64xf32> to vector<4x64xf32>
    %c0_143 = arith.constant 0 : index
    %c0_144 = arith.constant 0 : index
    %381 = vector.load %arg5[%c0_143, %c0_144] : memref<4x32xf32, #tpu.memory_space<vmem>>, vector<4x32xf32>
    %cst_145 = arith.constant dense<0.000000e+00> : vector<4x64xf32>
    %382 = tpu.matmul %381, %271, %cst_145 {dimension_numbers = #tpu.dot_dimension_numbers<[1], [0], [0], [1], [0, 0, 1, 1], [], []>} : vector<4x32xf32>, vector<32x64xf32>, vector<4x64xf32> -> vector<4x64xf32>
    %383 = arith.addf %380, %382 : vector<4x64xf32>
    %384 = vector.extract_strided_slice %383 {offsets = [0, 0], sizes = [4, 48], strides = [1, 1]} : vector<4x64xf32> to vector<4x48xf32>
    %385 = arith.negf %384 : vector<4x48xf32>
    %386 = math.exp %385 : vector<4x48xf32>
    %cst_146 = arith.constant 1.000000e+00 : f32
    %387 = vector.broadcast %cst_146 : f32 to vector<4x48xf32>
    %388 = arith.addf %387, %386 : vector<4x48xf32>
    %389 = arith.divf %387, %388 : vector<4x48xf32>
    %390 = vector.extract_strided_slice %389 {offsets = [0, 0], sizes = [4, 16], strides = [1, 1]} : vector<4x48xf32> to vector<4x16xf32>
    %391 = vector.extract_strided_slice %389 {offsets = [0, 16], sizes = [4, 16], strides = [1, 1]} : vector<4x48xf32> to vector<4x16xf32>
    %392 = vector.extract_strided_slice %389 {offsets = [0, 32], sizes = [4, 16], strides = [1, 1]} : vector<4x48xf32> to vector<4x16xf32>
    %393 = vector.extract_strided_slice %383 {offsets = [0, 48], sizes = [4, 16], strides = [1, 1]} : vector<4x64xf32> to vector<4x16xf32>
    %394 = math.tanh %393 : vector<4x16xf32>
    %395 = arith.mulf %391, %369 : vector<4x16xf32>
    %396 = arith.mulf %390, %394 : vector<4x16xf32>
    %397 = arith.addf %395, %396 : vector<4x16xf32>
    %398 = math.tanh %397 : vector<4x16xf32>
    %399 = arith.mulf %392, %398 : vector<4x16xf32>
    %400 = vector.extract_strided_slice %399 {offsets = [0, 0], sizes = [2, 16], strides = [1, 1]} : vector<4x16xf32> to vector<2x16xf32>
    %c0_147 = arith.constant 0 : index
    %c0_148 = arith.constant 0 : index
    %401 = vector.load %arg5[%c0_147, %c0_148] : memref<4x32xf32, #tpu.memory_space<vmem>>, vector<2x16xf32>
    tpu.vector_store %arg5[%c0_147, %c0_148], %400 {strides = array<i32>} : memref<4x32xf32, #tpu.memory_space<vmem>>, vector<2x16xf32>,
    %402 = vector.extract_strided_slice %399 {offsets = [2, 0], sizes = [2, 16], strides = [1, 1]} : vector<4x16xf32> to vector<2x16xf32>
    %c2_149 = arith.constant 2 : index
    %c16_150 = arith.constant 16 : index
    %403 = vector.load %arg5[%c2_149, %c16_150] : memref<4x32xf32, #tpu.memory_space<vmem>>, vector<2x16xf32>
    tpu.vector_store %arg5[%c2_149, %c16_150], %402 {strides = array<i32>} : memref<4x32xf32, #tpu.memory_space<vmem>>, vector<2x16xf32>,
    %404 = vector.extract_strided_slice %399 {offsets = [0, 0], sizes = [2, 16], strides = [1, 1]} : vector<4x16xf32> to vector<2x16xf32>
    %c6_151 = arith.constant 6 : index
    %c0_152 = arith.constant 0 : index
    %405 = vector.load %arg4[%c6_151, %c0_152] : memref<16x32xf32, #tpu.memory_space<vmem>>, vector<2x16xf32>
    tpu.vector_store %arg4[%c6_151, %c0_152], %404 {strides = array<i32>} : memref<16x32xf32, #tpu.memory_space<vmem>>, vector<2x16xf32>,
    %406 = vector.extract_strided_slice %399 {offsets = [2, 0], sizes = [2, 16], strides = [1, 1]} : vector<4x16xf32> to vector<2x16xf32>
    %c8_153 = arith.constant 8 : index
    %c16_154 = arith.constant 16 : index
    %407 = vector.load %arg4[%c8_153, %c16_154] : memref<16x32xf32, #tpu.memory_space<vmem>>, vector<2x16xf32>
    tpu.vector_store %arg4[%c8_153, %c16_154], %406 {strides = array<i32>} : memref<16x32xf32, #tpu.memory_space<vmem>>, vector<2x16xf32>,
    %408 = vector.extract_strided_slice %292 {offsets = [16, 0], sizes = [4, 64], strides = [1, 1]} : vector<32x64xf32> to vector<4x64xf32>
    %c0_155 = arith.constant 0 : index
    %c0_156 = arith.constant 0 : index
    %409 = vector.load %arg5[%c0_155, %c0_156] : memref<4x32xf32, #tpu.memory_space<vmem>>, vector<4x32xf32>
    %cst_157 = arith.constant dense<0.000000e+00> : vector<4x64xf32>
    %410 = tpu.matmul %409, %271, %cst_157 {dimension_numbers = #tpu.dot_dimension_numbers<[1], [0], [0], [1], [0, 0, 1, 1], [], []>} : vector<4x32xf32>, vector<32x64xf32>, vector<4x64xf32> -> vector<4x64xf32>
    %411 = arith.addf %408, %410 : vector<4x64xf32>
    %412 = vector.extract_strided_slice %411 {offsets = [0, 0], sizes = [4, 48], strides = [1, 1]} : vector<4x64xf32> to vector<4x48xf32>
    %413 = arith.negf %412 : vector<4x48xf32>
    %414 = math.exp %413 : vector<4x48xf32>
    %cst_158 = arith.constant 1.000000e+00 : f32
    %415 = vector.broadcast %cst_158 : f32 to vector<4x48xf32>
    %416 = arith.addf %415, %414 : vector<4x48xf32>
    %417 = arith.divf %415, %416 : vector<4x48xf32>
    %418 = vector.extract_strided_slice %417 {offsets = [0, 0], sizes = [4, 16], strides = [1, 1]} : vector<4x48xf32> to vector<4x16xf32>
    %419 = vector.extract_strided_slice %417 {offsets = [0, 16], sizes = [4, 16], strides = [1, 1]} : vector<4x48xf32> to vector<4x16xf32>
    %420 = vector.extract_strided_slice %417 {offsets = [0, 32], sizes = [4, 16], strides = [1, 1]} : vector<4x48xf32> to vector<4x16xf32>
    %421 = vector.extract_strided_slice %411 {offsets = [0, 48], sizes = [4, 16], strides = [1, 1]} : vector<4x64xf32> to vector<4x16xf32>
    %422 = math.tanh %421 : vector<4x16xf32>
    %423 = arith.mulf %419, %397 : vector<4x16xf32>
    %424 = arith.mulf %418, %422 : vector<4x16xf32>
    %425 = arith.addf %423, %424 : vector<4x16xf32>
    %426 = math.tanh %425 : vector<4x16xf32>
    %427 = arith.mulf %420, %426 : vector<4x16xf32>
    %428 = vector.extract_strided_slice %427 {offsets = [0, 0], sizes = [2, 16], strides = [1, 1]} : vector<4x16xf32> to vector<2x16xf32>
    %c0_159 = arith.constant 0 : index
    %c0_160 = arith.constant 0 : index
    %429 = vector.load %arg5[%c0_159, %c0_160] : memref<4x32xf32, #tpu.memory_space<vmem>>, vector<2x16xf32>
    tpu.vector_store %arg5[%c0_159, %c0_160], %428 {strides = array<i32>} : memref<4x32xf32, #tpu.memory_space<vmem>>, vector<2x16xf32>,
    %430 = vector.extract_strided_slice %427 {offsets = [2, 0], sizes = [2, 16], strides = [1, 1]} : vector<4x16xf32> to vector<2x16xf32>
    %c2_161 = arith.constant 2 : index
    %c16_162 = arith.constant 16 : index
    %431 = vector.load %arg5[%c2_161, %c16_162] : memref<4x32xf32, #tpu.memory_space<vmem>>, vector<2x16xf32>
    tpu.vector_store %arg5[%c2_161, %c16_162], %430 {strides = array<i32>} : memref<4x32xf32, #tpu.memory_space<vmem>>, vector<2x16xf32>,
    %432 = vector.extract_strided_slice %427 {offsets = [0, 0], sizes = [2, 16], strides = [1, 1]} : vector<4x16xf32> to vector<2x16xf32>
    %c8_163 = arith.constant 8 : index
    %c0_164 = arith.constant 0 : index
    %433 = vector.load %arg4[%c8_163, %c0_164] : memref<16x32xf32, #tpu.memory_space<vmem>>, vector<2x16xf32>
    tpu.vector_store %arg4[%c8_163, %c0_164], %432 {strides = array<i32>} : memref<16x32xf32, #tpu.memory_space<vmem>>, vector<2x16xf32>,
    %434 = vector.extract_strided_slice %427 {offsets = [2, 0], sizes = [2, 16], strides = [1, 1]} : vector<4x16xf32> to vector<2x16xf32>
    %c6_165 = arith.constant 6 : index
    %c16_166 = arith.constant 16 : index
    %435 = vector.load %arg4[%c6_165, %c16_166] : memref<16x32xf32, #tpu.memory_space<vmem>>, vector<2x16xf32>
    tpu.vector_store %arg4[%c6_165, %c16_166], %434 {strides = array<i32>} : memref<16x32xf32, #tpu.memory_space<vmem>>, vector<2x16xf32>,
    %436 = vector.extract_strided_slice %292 {offsets = [20, 0], sizes = [4, 64], strides = [1, 1]} : vector<32x64xf32> to vector<4x64xf32>
    %c0_167 = arith.constant 0 : index
    %c0_168 = arith.constant 0 : index
    %437 = vector.load %arg5[%c0_167, %c0_168] : memref<4x32xf32, #tpu.memory_space<vmem>>, vector<4x32xf32>
    %cst_169 = arith.constant dense<0.000000e+00> : vector<4x64xf32>
    %438 = tpu.matmul %437, %271, %cst_169 {dimension_numbers = #tpu.dot_dimension_numbers<[1], [0], [0], [1], [0, 0, 1, 1], [], []>} : vector<4x32xf32>, vector<32x64xf32>, vector<4x64xf32> -> vector<4x64xf32>
    %439 = arith.addf %436, %438 : vector<4x64xf32>
    %440 = vector.extract_strided_slice %439 {offsets = [0, 0], sizes = [4, 48], strides = [1, 1]} : vector<4x64xf32> to vector<4x48xf32>
    %441 = arith.negf %440 : vector<4x48xf32>
    %442 = math.exp %441 : vector<4x48xf32>
    %cst_170 = arith.constant 1.000000e+00 : f32
    %443 = vector.broadcast %cst_170 : f32 to vector<4x48xf32>
    %444 = arith.addf %443, %442 : vector<4x48xf32>
    %445 = arith.divf %443, %444 : vector<4x48xf32>
    %446 = vector.extract_strided_slice %445 {offsets = [0, 0], sizes = [4, 16], strides = [1, 1]} : vector<4x48xf32> to vector<4x16xf32>
    %447 = vector.extract_strided_slice %445 {offsets = [0, 16], sizes = [4, 16], strides = [1, 1]} : vector<4x48xf32> to vector<4x16xf32>
    %448 = vector.extract_strided_slice %445 {offsets = [0, 32], sizes = [4, 16], strides = [1, 1]} : vector<4x48xf32> to vector<4x16xf32>
    %449 = vector.extract_strided_slice %439 {offsets = [0, 48], sizes = [4, 16], strides = [1, 1]} : vector<4x64xf32> to vector<4x16xf32>
    %450 = math.tanh %449 : vector<4x16xf32>
    %451 = arith.mulf %447, %425 : vector<4x16xf32>
    %452 = arith.mulf %446, %450 : vector<4x16xf32>
    %453 = arith.addf %451, %452 : vector<4x16xf32>
    %454 = math.tanh %453 : vector<4x16xf32>
    %455 = arith.mulf %448, %454 : vector<4x16xf32>
    %456 = vector.extract_strided_slice %455 {offsets = [0, 0], sizes = [2, 16], strides = [1, 1]} : vector<4x16xf32> to vector<2x16xf32>
    %c0_171 = arith.constant 0 : index
    %c0_172 = arith.constant 0 : index
    %457 = vector.load %arg5[%c0_171, %c0_172] : memref<4x32xf32, #tpu.memory_space<vmem>>, vector<2x16xf32>
    tpu.vector_store %arg5[%c0_171, %c0_172], %456 {strides = array<i32>} : memref<4x32xf32, #tpu.memory_space<vmem>>, vector<2x16xf32>,
    %458 = vector.extract_strided_slice %455 {offsets = [2, 0], sizes = [2, 16], strides = [1, 1]} : vector<4x16xf32> to vector<2x16xf32>
    %c2_173 = arith.constant 2 : index
    %c16_174 = arith.constant 16 : index
    %459 = vector.load %arg5[%c2_173, %c16_174] : memref<4x32xf32, #tpu.memory_space<vmem>>, vector<2x16xf32>
    tpu.vector_store %arg5[%c2_173, %c16_174], %458 {strides = array<i32>} : memref<4x32xf32, #tpu.memory_space<vmem>>, vector<2x16xf32>,
    %460 = vector.extract_strided_slice %455 {offsets = [0, 0], sizes = [2, 16], strides = [1, 1]} : vector<4x16xf32> to vector<2x16xf32>
    %c10_175 = arith.constant 10 : index
    %c0_176 = arith.constant 0 : index
    %461 = vector.load %arg4[%c10_175, %c0_176] : memref<16x32xf32, #tpu.memory_space<vmem>>, vector<2x16xf32>
    tpu.vector_store %arg4[%c10_175, %c0_176], %460 {strides = array<i32>} : memref<16x32xf32, #tpu.memory_space<vmem>>, vector<2x16xf32>,
    %462 = vector.extract_strided_slice %455 {offsets = [2, 0], sizes = [2, 16], strides = [1, 1]} : vector<4x16xf32> to vector<2x16xf32>
    %c4_177 = arith.constant 4 : index
    %c16_178 = arith.constant 16 : index
    %463 = vector.load %arg4[%c4_177, %c16_178] : memref<16x32xf32, #tpu.memory_space<vmem>>, vector<2x16xf32>
    tpu.vector_store %arg4[%c4_177, %c16_178], %462 {strides = array<i32>} : memref<16x32xf32, #tpu.memory_space<vmem>>, vector<2x16xf32>,
    %464 = vector.extract_strided_slice %292 {offsets = [24, 0], sizes = [4, 64], strides = [1, 1]} : vector<32x64xf32> to vector<4x64xf32>
    %c0_179 = arith.constant 0 : index
    %c0_180 = arith.constant 0 : index
    %465 = vector.load %arg5[%c0_179, %c0_180] : memref<4x32xf32, #tpu.memory_space<vmem>>, vector<4x32xf32>
    %cst_181 = arith.constant dense<0.000000e+00> : vector<4x64xf32>
    %466 = tpu.matmul %465, %271, %cst_181 {dimension_numbers = #tpu.dot_dimension_numbers<[1], [0], [0], [1], [0, 0, 1, 1], [], []>} : vector<4x32xf32>, vector<32x64xf32>, vector<4x64xf32> -> vector<4x64xf32>
    %467 = arith.addf %464, %466 : vector<4x64xf32>
    %468 = vector.extract_strided_slice %467 {offsets = [0, 0], sizes = [4, 48], strides = [1, 1]} : vector<4x64xf32> to vector<4x48xf32>
    %469 = arith.negf %468 : vector<4x48xf32>
    %470 = math.exp %469 : vector<4x48xf32>
    %cst_182 = arith.constant 1.000000e+00 : f32
    %471 = vector.broadcast %cst_182 : f32 to vector<4x48xf32>
    %472 = arith.addf %471, %470 : vector<4x48xf32>
    %473 = arith.divf %471, %472 : vector<4x48xf32>
    %474 = vector.extract_strided_slice %473 {offsets = [0, 0], sizes = [4, 16], strides = [1, 1]} : vector<4x48xf32> to vector<4x16xf32>
    %475 = vector.extract_strided_slice %473 {offsets = [0, 16], sizes = [4, 16], strides = [1, 1]} : vector<4x48xf32> to vector<4x16xf32>
    %476 = vector.extract_strided_slice %473 {offsets = [0, 32], sizes = [4, 16], strides = [1, 1]} : vector<4x48xf32> to vector<4x16xf32>
    %477 = vector.extract_strided_slice %467 {offsets = [0, 48], sizes = [4, 16], strides = [1, 1]} : vector<4x64xf32> to vector<4x16xf32>
    %478 = math.tanh %477 : vector<4x16xf32>
    %479 = arith.mulf %475, %453 : vector<4x16xf32>
    %480 = arith.mulf %474, %478 : vector<4x16xf32>
    %481 = arith.addf %479, %480 : vector<4x16xf32>
    %482 = math.tanh %481 : vector<4x16xf32>
    %483 = arith.mulf %476, %482 : vector<4x16xf32>
    %484 = vector.extract_strided_slice %483 {offsets = [0, 0], sizes = [2, 16], strides = [1, 1]} : vector<4x16xf32> to vector<2x16xf32>
    %c0_183 = arith.constant 0 : index
    %c0_184 = arith.constant 0 : index
    %485 = vector.load %arg5[%c0_183, %c0_184] : memref<4x32xf32, #tpu.memory_space<vmem>>, vector<2x16xf32>
    tpu.vector_store %arg5[%c0_183, %c0_184], %484 {strides = array<i32>} : memref<4x32xf32, #tpu.memory_space<vmem>>, vector<2x16xf32>,
    %486 = vector.extract_strided_slice %483 {offsets = [2, 0], sizes = [2, 16], strides = [1, 1]} : vector<4x16xf32> to vector<2x16xf32>
    %c2_185 = arith.constant 2 : index
    %c16_186 = arith.constant 16 : index
    %487 = vector.load %arg5[%c2_185, %c16_186] : memref<4x32xf32, #tpu.memory_space<vmem>>, vector<2x16xf32>
    tpu.vector_store %arg5[%c2_185, %c16_186], %486 {strides = array<i32>} : memref<4x32xf32, #tpu.memory_space<vmem>>, vector<2x16xf32>,
    %488 = vector.extract_strided_slice %483 {offsets = [0, 0], sizes = [2, 16], strides = [1, 1]} : vector<4x16xf32> to vector<2x16xf32>
    %c12_187 = arith.constant 12 : index
    %c0_188 = arith.constant 0 : index
    %489 = vector.load %arg4[%c12_187, %c0_188] : memref<16x32xf32, #tpu.memory_space<vmem>>, vector<2x16xf32>
    tpu.vector_store %arg4[%c12_187, %c0_188], %488 {strides = array<i32>} : memref<16x32xf32, #tpu.memory_space<vmem>>, vector<2x16xf32>,
    %490 = vector.extract_strided_slice %483 {offsets = [2, 0], sizes = [2, 16], strides = [1, 1]} : vector<4x16xf32> to vector<2x16xf32>
    %c2_189 = arith.constant 2 : index
    %c16_190 = arith.constant 16 : index
    %491 = vector.load %arg4[%c2_189, %c16_190] : memref<16x32xf32, #tpu.memory_space<vmem>>, vector<2x16xf32>
    tpu.vector_store %arg4[%c2_189, %c16_190], %490 {strides = array<i32>} : memref<16x32xf32, #tpu.memory_space<vmem>>, vector<2x16xf32>,
    %492 = vector.extract_strided_slice %292 {offsets = [28, 0], sizes = [4, 64], strides = [1, 1]} : vector<32x64xf32> to vector<4x64xf32>
    %c0_191 = arith.constant 0 : index
    %c0_192 = arith.constant 0 : index
    %493 = vector.load %arg5[%c0_191, %c0_192] : memref<4x32xf32, #tpu.memory_space<vmem>>, vector<4x32xf32>
    %cst_193 = arith.constant dense<0.000000e+00> : vector<4x64xf32>
    %494 = tpu.matmul %493, %271, %cst_193 {dimension_numbers = #tpu.dot_dimension_numbers<[1], [0], [0], [1], [0, 0, 1, 1], [], []>} : vector<4x32xf32>, vector<32x64xf32>, vector<4x64xf32> -> vector<4x64xf32>
    %495 = arith.addf %492, %494 : vector<4x64xf32>
    %496 = vector.extract_strided_slice %495 {offsets = [0, 0], sizes = [4, 48], strides = [1, 1]} : vector<4x64xf32> to vector<4x48xf32>
    %497 = arith.negf %496 : vector<4x48xf32>
    %498 = math.exp %497 : vector<4x48xf32>
    %cst_194 = arith.constant 1.000000e+00 : f32
    %499 = vector.broadcast %cst_194 : f32 to vector<4x48xf32>
    %500 = arith.addf %499, %498 : vector<4x48xf32>
    %501 = arith.divf %499, %500 : vector<4x48xf32>
    %502 = vector.extract_strided_slice %501 {offsets = [0, 0], sizes = [4, 16], strides = [1, 1]} : vector<4x48xf32> to vector<4x16xf32>
    %503 = vector.extract_strided_slice %501 {offsets = [0, 16], sizes = [4, 16], strides = [1, 1]} : vector<4x48xf32> to vector<4x16xf32>
    %504 = vector.extract_strided_slice %501 {offsets = [0, 32], sizes = [4, 16], strides = [1, 1]} : vector<4x48xf32> to vector<4x16xf32>
    %505 = vector.extract_strided_slice %495 {offsets = [0, 48], sizes = [4, 16], strides = [1, 1]} : vector<4x64xf32> to vector<4x16xf32>
    %506 = math.tanh %505 : vector<4x16xf32>
    %507 = arith.mulf %503, %481 : vector<4x16xf32>
    %508 = arith.mulf %502, %506 : vector<4x16xf32>
    %509 = arith.addf %507, %508 : vector<4x16xf32>
    %510 = math.tanh %509 : vector<4x16xf32>
    %511 = arith.mulf %504, %510 : vector<4x16xf32>
    %512 = vector.extract_strided_slice %511 {offsets = [0, 0], sizes = [2, 16], strides = [1, 1]} : vector<4x16xf32> to vector<2x16xf32>
    %c0_195 = arith.constant 0 : index
    %c0_196 = arith.constant 0 : index
    %513 = vector.load %arg5[%c0_195, %c0_196] : memref<4x32xf32, #tpu.memory_space<vmem>>, vector<2x16xf32>
    tpu.vector_store %arg5[%c0_195, %c0_196], %512 {strides = array<i32>} : memref<4x32xf32, #tpu.memory_space<vmem>>, vector<2x16xf32>,
    %514 = vector.extract_strided_slice %511 {offsets = [2, 0], sizes = [2, 16], strides = [1, 1]} : vector<4x16xf32> to vector<2x16xf32>
    %c2_197 = arith.constant 2 : index
    %c16_198 = arith.constant 16 : index
    %515 = vector.load %arg5[%c2_197, %c16_198] : memref<4x32xf32, #tpu.memory_space<vmem>>, vector<2x16xf32>
    tpu.vector_store %arg5[%c2_197, %c16_198], %514 {strides = array<i32>} : memref<4x32xf32, #tpu.memory_space<vmem>>, vector<2x16xf32>,
    %516 = vector.extract_strided_slice %511 {offsets = [0, 0], sizes = [2, 16], strides = [1, 1]} : vector<4x16xf32> to vector<2x16xf32>
    %c14_199 = arith.constant 14 : index
    %c0_200 = arith.constant 0 : index
    %517 = vector.load %arg4[%c14_199, %c0_200] : memref<16x32xf32, #tpu.memory_space<vmem>>, vector<2x16xf32>
    tpu.vector_store %arg4[%c14_199, %c0_200], %516 {strides = array<i32>} : memref<16x32xf32, #tpu.memory_space<vmem>>, vector<2x16xf32>,
    %518 = vector.extract_strided_slice %511 {offsets = [2, 0], sizes = [2, 16], strides = [1, 1]} : vector<4x16xf32> to vector<2x16xf32>
    %c0_201 = arith.constant 0 : index
    %c16_202 = arith.constant 16 : index
    %519 = vector.load %arg4[%c0_201, %c16_202] : memref<16x32xf32, #tpu.memory_space<vmem>>, vector<2x16xf32>
    tpu.vector_store %arg4[%c0_201, %c16_202], %518 {strides = array<i32>} : memref<16x32xf32, #tpu.memory_space<vmem>>, vector<2x16xf32>,
    %c0_203 = arith.constant 0 : index
    %c0_204 = arith.constant 0 : index
    %520 = vector.load %arg4[%c0_203, %c0_204] : memref<16x32xf32, #tpu.memory_space<vmem>>, vector<16x32xf32>
    %c144 = arith.constant 144 : index
    %c0_205 = arith.constant 0 : index
    %521 = vector.load %arg1[%c144, %c0_205] : memref<240x128xf32, #tpu.memory_space<vmem>>, vector<32x48xf32>
    %cst_206 = arith.constant dense<0.000000e+00> : vector<16x48xf32>
    %522 = tpu.matmul %520, %521, %cst_206 {dimension_numbers = #tpu.dot_dimension_numbers<[1], [0], [0], [1], [0, 0, 1, 1], [], []>} : vector<16x32xf32>, vector<32x48xf32>, vector<16x48xf32> -> vector<16x48xf32>
    %c176 = arith.constant 176 : index
    %c0_207 = arith.constant 0 : index
    %523 = vector.load %arg1[%c176, %c0_207] : memref<240x128xf32, #tpu.memory_space<vmem>>, vector<1x48xf32>
    %524 = vector.broadcast %523 : vector<1x48xf32> to vector<16x48xf32>
    %525 = arith.addf %522, %524 : vector<16x48xf32>
    %cst_208 = arith.constant 0.000000e+00 : f32
    %526 = vector.broadcast %cst_208 : f32 to vector<16x48xf32>
    %527 = arith.cmpf ogt, %525, %526 : vector<16x48xf32>
    %cst_209 = arith.constant 0.00999999977 : f32
    %528 = vector.broadcast %cst_209 : f32 to vector<16x48xf32>
    %529 = arith.mulf %528, %525 : vector<16x48xf32>
    %530 = arith.select %527, %525, %529 : vector<16x48xi1>, vector<16x48xf32>
    %c184 = arith.constant 184 : index
    %c0_210 = arith.constant 0 : index
    %531 = vector.load %arg1[%c184, %c0_210] : memref<240x128xf32, #tpu.memory_space<vmem>>, vector<48x32xf32>
    %cst_211 = arith.constant dense<0.000000e+00> : vector<16x32xf32>
    %532 = tpu.matmul %530, %531, %cst_211 {dimension_numbers = #tpu.dot_dimension_numbers<[1], [0], [0], [1], [0, 0, 1, 1], [], []>} : vector<16x48xf32>, vector<48x32xf32>, vector<16x32xf32> -> vector<16x32xf32>
    %c232 = arith.constant 232 : index
    %c0_212 = arith.constant 0 : index
    %533 = vector.load %arg1[%c232, %c0_212] : memref<240x128xf32, #tpu.memory_space<vmem>>, vector<1x32xf32>
    %534 = vector.broadcast %533 : vector<1x32xf32> to vector<16x32xf32>
    %535 = arith.addf %532, %534 : vector<16x32xf32>
    %536 = arith.negf %535 : vector<16x32xf32>
    %537 = math.exp %536 : vector<16x32xf32>
    %cst_213 = arith.constant 1.000000e+00 : f32
    %538 = vector.broadcast %cst_213 : f32 to vector<16x32xf32>
    %539 = arith.addf %538, %537 : vector<16x32xf32>
    %540 = arith.divf %538, %539 : vector<16x32xf32>
    %541 = vector.extract_strided_slice %540 {offsets = [0, 0], sizes = [1, 32], strides = [1, 1]} : vector<16x32xf32> to vector<1x32xf32>
    %c0_214 = arith.constant 0 : index
    %c0_215 = arith.constant 0 : index
    %542 = vector.load %arg2[%c0_214, %c0_215] : memref<16x32xf32, #tpu.memory_space<vmem>>, vector<1x32xf32>
    tpu.vector_store %arg2[%c0_214, %c0_215], %541 {strides = array<i32>} : memref<16x32xf32, #tpu.memory_space<vmem>>, vector<1x32xf32>,
    %543 = vector.extract_strided_slice %540 {offsets = [2, 0], sizes = [1, 32], strides = [1, 1]} : vector<16x32xf32> to vector<1x32xf32>
    %c1 = arith.constant 1 : index
    %c0_216 = arith.constant 0 : index
    %544 = vector.load %arg2[%c1, %c0_216] : memref<16x32xf32, #tpu.memory_space<vmem>>, vector<1x32xf32>
    tpu.vector_store %arg2[%c1, %c0_216], %543 {strides = array<i32>} : memref<16x32xf32, #tpu.memory_space<vmem>>, vector<1x32xf32>,
    %545 = vector.extract_strided_slice %540 {offsets = [4, 0], sizes = [1, 32], strides = [1, 1]} : vector<16x32xf32> to vector<1x32xf32>
    %c2_217 = arith.constant 2 : index
    %c0_218 = arith.constant 0 : index
    %546 = vector.load %arg2[%c2_217, %c0_218] : memref<16x32xf32, #tpu.memory_space<vmem>>, vector<1x32xf32>
    tpu.vector_store %arg2[%c2_217, %c0_218], %545 {strides = array<i32>} : memref<16x32xf32, #tpu.memory_space<vmem>>, vector<1x32xf32>,
    %547 = vector.extract_strided_slice %540 {offsets = [6, 0], sizes = [1, 32], strides = [1, 1]} : vector<16x32xf32> to vector<1x32xf32>
    %c3 = arith.constant 3 : index
    %c0_219 = arith.constant 0 : index
    %548 = vector.load %arg2[%c3, %c0_219] : memref<16x32xf32, #tpu.memory_space<vmem>>, vector<1x32xf32>
    tpu.vector_store %arg2[%c3, %c0_219], %547 {strides = array<i32>} : memref<16x32xf32, #tpu.memory_space<vmem>>, vector<1x32xf32>,
    %549 = vector.extract_strided_slice %540 {offsets = [8, 0], sizes = [1, 32], strides = [1, 1]} : vector<16x32xf32> to vector<1x32xf32>
    %c4_220 = arith.constant 4 : index
    %c0_221 = arith.constant 0 : index
    %550 = vector.load %arg2[%c4_220, %c0_221] : memref<16x32xf32, #tpu.memory_space<vmem>>, vector<1x32xf32>
    tpu.vector_store %arg2[%c4_220, %c0_221], %549 {strides = array<i32>} : memref<16x32xf32, #tpu.memory_space<vmem>>, vector<1x32xf32>,
    %551 = vector.extract_strided_slice %540 {offsets = [10, 0], sizes = [1, 32], strides = [1, 1]} : vector<16x32xf32> to vector<1x32xf32>
    %c5 = arith.constant 5 : index
    %c0_222 = arith.constant 0 : index
    %552 = vector.load %arg2[%c5, %c0_222] : memref<16x32xf32, #tpu.memory_space<vmem>>, vector<1x32xf32>
    tpu.vector_store %arg2[%c5, %c0_222], %551 {strides = array<i32>} : memref<16x32xf32, #tpu.memory_space<vmem>>, vector<1x32xf32>,
    %553 = vector.extract_strided_slice %540 {offsets = [12, 0], sizes = [1, 32], strides = [1, 1]} : vector<16x32xf32> to vector<1x32xf32>
    %c6_223 = arith.constant 6 : index
    %c0_224 = arith.constant 0 : index
    %554 = vector.load %arg2[%c6_223, %c0_224] : memref<16x32xf32, #tpu.memory_space<vmem>>, vector<1x32xf32>
    tpu.vector_store %arg2[%c6_223, %c0_224], %553 {strides = array<i32>} : memref<16x32xf32, #tpu.memory_space<vmem>>, vector<1x32xf32>,
    %555 = vector.extract_strided_slice %540 {offsets = [14, 0], sizes = [1, 32], strides = [1, 1]} : vector<16x32xf32> to vector<1x32xf32>
    %c7 = arith.constant 7 : index
    %c0_225 = arith.constant 0 : index
    %556 = vector.load %arg2[%c7, %c0_225] : memref<16x32xf32, #tpu.memory_space<vmem>>, vector<1x32xf32>
    tpu.vector_store %arg2[%c7, %c0_225], %555 {strides = array<i32>} : memref<16x32xf32, #tpu.memory_space<vmem>>, vector<1x32xf32>,
    %557 = vector.extract_strided_slice %540 {offsets = [1, 0], sizes = [1, 32], strides = [1, 1]} : vector<16x32xf32> to vector<1x32xf32>
    %c8_226 = arith.constant 8 : index
    %c0_227 = arith.constant 0 : index
    %558 = vector.load %arg2[%c8_226, %c0_227] : memref<16x32xf32, #tpu.memory_space<vmem>>, vector<1x32xf32>
    tpu.vector_store %arg2[%c8_226, %c0_227], %557 {strides = array<i32>} : memref<16x32xf32, #tpu.memory_space<vmem>>, vector<1x32xf32>,
    %559 = vector.extract_strided_slice %540 {offsets = [3, 0], sizes = [1, 32], strides = [1, 1]} : vector<16x32xf32> to vector<1x32xf32>
    %c9 = arith.constant 9 : index
    %c0_228 = arith.constant 0 : index
    %560 = vector.load %arg2[%c9, %c0_228] : memref<16x32xf32, #tpu.memory_space<vmem>>, vector<1x32xf32>
    tpu.vector_store %arg2[%c9, %c0_228], %559 {strides = array<i32>} : memref<16x32xf32, #tpu.memory_space<vmem>>, vector<1x32xf32>,
    %561 = vector.extract_strided_slice %540 {offsets = [5, 0], sizes = [1, 32], strides = [1, 1]} : vector<16x32xf32> to vector<1x32xf32>
    %c10_229 = arith.constant 10 : index
    %c0_230 = arith.constant 0 : index
    %562 = vector.load %arg2[%c10_229, %c0_230] : memref<16x32xf32, #tpu.memory_space<vmem>>, vector<1x32xf32>
    tpu.vector_store %arg2[%c10_229, %c0_230], %561 {strides = array<i32>} : memref<16x32xf32, #tpu.memory_space<vmem>>, vector<1x32xf32>,
    %563 = vector.extract_strided_slice %540 {offsets = [7, 0], sizes = [1, 32], strides = [1, 1]} : vector<16x32xf32> to vector<1x32xf32>
    %c11 = arith.constant 11 : index
    %c0_231 = arith.constant 0 : index
    %564 = vector.load %arg2[%c11, %c0_231] : memref<16x32xf32, #tpu.memory_space<vmem>>, vector<1x32xf32>
    tpu.vector_store %arg2[%c11, %c0_231], %563 {strides = array<i32>} : memref<16x32xf32, #tpu.memory_space<vmem>>, vector<1x32xf32>,
    %565 = vector.extract_strided_slice %540 {offsets = [9, 0], sizes = [1, 32], strides = [1, 1]} : vector<16x32xf32> to vector<1x32xf32>
    %c12_232 = arith.constant 12 : index
    %c0_233 = arith.constant 0 : index
    %566 = vector.load %arg2[%c12_232, %c0_233] : memref<16x32xf32, #tpu.memory_space<vmem>>, vector<1x32xf32>
    tpu.vector_store %arg2[%c12_232, %c0_233], %565 {strides = array<i32>} : memref<16x32xf32, #tpu.memory_space<vmem>>, vector<1x32xf32>,
    %567 = vector.extract_strided_slice %540 {offsets = [11, 0], sizes = [1, 32], strides = [1, 1]} : vector<16x32xf32> to vector<1x32xf32>
    %c13 = arith.constant 13 : index
    %c0_234 = arith.constant 0 : index
    %568 = vector.load %arg2[%c13, %c0_234] : memref<16x32xf32, #tpu.memory_space<vmem>>, vector<1x32xf32>
    tpu.vector_store %arg2[%c13, %c0_234], %567 {strides = array<i32>} : memref<16x32xf32, #tpu.memory_space<vmem>>, vector<1x32xf32>,
    %569 = vector.extract_strided_slice %540 {offsets = [13, 0], sizes = [1, 32], strides = [1, 1]} : vector<16x32xf32> to vector<1x32xf32>
    %c14_235 = arith.constant 14 : index
    %c0_236 = arith.constant 0 : index
    %570 = vector.load %arg2[%c14_235, %c0_236] : memref<16x32xf32, #tpu.memory_space<vmem>>, vector<1x32xf32>
    tpu.vector_store %arg2[%c14_235, %c0_236], %569 {strides = array<i32>} : memref<16x32xf32, #tpu.memory_space<vmem>>, vector<1x32xf32>,
    %571 = vector.extract_strided_slice %540 {offsets = [15, 0], sizes = [1, 32], strides = [1, 1]} : vector<16x32xf32> to vector<1x32xf32>
    %c15 = arith.constant 15 : index
    %c0_237 = arith.constant 0 : index
    %572 = vector.load %arg2[%c15, %c0_237] : memref<16x32xf32, #tpu.memory_space<vmem>>, vector<1x32xf32>
    tpu.vector_store %arg2[%c15, %c0_237], %571 {strides = array<i32>} : memref<16x32xf32, #tpu.memory_space<vmem>>, vector<1x32xf32>,
    return
  }
}

</mosaic_0001>

<bundles_post_ra>
// kernel: metric_generator_forward.1
= control target key start
LH: loop header
LB: loop body
LE: loop exit
PB: predicated region body
PF: predicated region fallthrough
CT: control target
= control target key end

     0   :  { %7 = vsyncpa [#allocation6], 0  ;;  %s2363_s0 = inlined_call_operand.hbm [shape: f32[16,32], index: 0, kind: input, shape index: {}]   ;;  %s2364_s1 = inlined_call_operand.hbm [shape: f32[240,128], index: 1, kind: input, shape index: {}]   ;;  %s2365_s2 = inlined_call_operand.hbm [shape: f32[16,32], index: 2, kind: output, shape index: {}]  }
   0x1   :  { %8 = vsyncpa [#allocation9], 0 }
   0x2   :  { %9 = vsyncpa [#allocation7], 0  ;;  %s14_s11 = sshll.u32 %s2363_s0, 4  ;;  %s1969_s12 = smov [#allocation5]   ;;  %s15_s11 = int_to_ptr.hbm [resolvable:$true] %s14_s11 }
   0x3   :  { %s16_s13 = sshll.u32 %s1969_s12, 4  ;;  %s27_s16 = sshll.u32 %s2364_s1, 4  ;;  %s17_s13 = int_to_ptr.vmem [resolvable:$true] %s16_s13  ;;  %s28_s16 = int_to_ptr.hbm [resolvable:$true] %s27_s16 }
   0x4   :  { %s1970_s17 = smov 128   ;;  %s1971_s18 = smov 8  }
   0x5   :  { %22 = dma.hbm_to_vmem [thread:$0]  %s15_s11, 256, %s17_s13, [#allocation6], %s1970_s17, %s1970_s17, %s1971_s18  }
   0x6   :  { %s1972_s19 = smov [#allocation8]  }
   0x7   :  { %s29_s20 = sshll.u32 %s1972_s19, 4  ;;  %s30_s20 = int_to_ptr.vmem [resolvable:$true] %s29_s20 }
   0x8   :  { %35 = dma.hbm_to_vmem [thread:$0]  %s28_s16, 3840, %s30_s20, [#allocation9], %s1970_s17, %s1970_s17, %s1971_s18  }
   0x9   :  { %1963 = dma.done.wait [#allocation6], 256  }
   0xa   :  { %1964 = vsyncadd [#allocation6], 4294967040 }
   0xb   :  { %1965 = dma.done.wait [#allocation9], 3840  }
   0xc   :  { %1966 = vsyncadd [#allocation9], 4294963456  ;;  %v49_v0 = vld [vmem:[#allocation8 + $0x18] sm:$0xff]  ;;  %v48_v1 = vld [vmem:[#allocation8 + $0x10] sm:$0xff]  ;;  %vm56_vm0 = vcmask 261120   ;;  %vm2366_vm1 = vcmask 257024  }
   0xd   :  { %75 = vmatpush.msra.mxu0 %v49_v0  ;;  %1736 = vmatpush.msra.mxu3 %v49_v0  ;;  %v47_v2 = vld [vmem:[#allocation8 + $0x8] sm:$0xff]  ;;  %v53_v3 = vld [vmem:[#allocation8 + $0x40] sm:$0xff]  ;;  %v52_v4 = vld [vmem:[#allocation8 + $0x38] sm:$0xff]  ;;  %v1973_v9 = vmov 0.0   ;;  %s1974_s0 = smov 64   ;;  %vm130_vm2 = vcmask 1040384  }
   0xe   :  { %v46_v5 = vld [vmem:[#allocation8] sm:$0xff]  ;;  %217 = vmatpush.msra.mxu2 %v53_v3  ;;  %449 = vmatpush.msra.mxu1 %v53_v3  ;;  %v44_v6 = vld [vmem:[#allocation5] sm:$0xff]  ;;  %v45_v7 = vld [vmem:[#allocation5 + $0x8] sm:$0xff]  ;;  %200 = vst.msk [vmem:[#allocation4] sm:$0xf] %vm2366_vm1, %v1973_v9  ;;  %vm132_vm3 = vcmask 1041408  }
   0xf   :  { %76 = vmatpush.msra.mxu0 %v48_v1  ;;  %1737 = vmatpush.msra.mxu3 %v48_v1  ;;  %v51_v8 = vld [vmem:[#allocation8 + $0x30] sm:$0xff]  ;;  %v50_v10 = vld [vmem:[#allocation8 + $0x28] sm:$0xff]  ;;  %v1751_v12 = vld [vmem:[#allocation8 + $0x20] ss:$0 sm:$0xff]  ;;  %vm134_vm4 = vcmask 1042432   ;;  %vm136_vm5 = vcmask 1043456  }
  0x10   :  { %218 = vmatpush.msra.mxu2 %v52_v4  ;;  %450 = vmatpush.msra.mxu1 %v52_v4  ;;  %vm138_vm6 = vcmask 1044480   ;;  %vm140_vm7 = vcmask 1045504   ;;  %vm142_vm8 = vcmask 1046528   ;;  %s1975_s1 = smov 80   ;;  %s1976_s21 = smov 16   ;;  %vm272_vm13 = vcmask 257154  }
  0x11   :  { %77 = vmatpush.msra.mxu0 %v47_v2  ;;  %1738 = vmatpush.msra.mxu3 %v47_v2  ;;  %s1977_s22 = smov 112   ;;  %s1978_s23 = smov 96   ;;  %vm267_vm14 = vcmask 123904  }
  0x12   :  { %219 = vmatpush.msra.mxu2 %v51_v8  ;;  %451 = vmatpush.msra.mxu1 %v51_v8  ;;  %s1979_s24 = smov [#allocation10]   ;;  %s1680_s28 = sshll.u32 %s2365_s2, 4  ;;  %s1681_s28 = int_to_ptr.hbm [resolvable:$true] %s1680_s28 }
  0x13   :  { %78 = vmatpush.msra.mxu0 %v46_v5  ;;  %1739 = vmatpush.msra.mxu3 %v46_v5  ;;  %s1678_s25 = sshll.u32 %s1979_s24, 4  ;;  %s1679_s25 = int_to_ptr.vmem [resolvable:$true] %s1678_s25 }
  0x14   :  { %1694 = vmatmul.msk.f32.vlgmr.msra.gmra.mxu0 %vm56_vm0, %v44_v6  ;;  %1695 = vmatmul.msk.f32.vlgmr.msra.gmra.mxu3 %vm56_vm0, %v45_v7 }
  0x15   :  { %373 = vmatpush.msrb.mxu3 %v53_v3  ;;  %683 = vmatpush.msrb.mxu0 %v53_v3  ;;  %v201_v11 = vld [vmem:[#allocation4] sm:$0xf] }
  0x16   :  { %220 = vmatpush.msra.mxu2 %v50_v10  ;;  %452 = vmatpush.msra.mxu1 %v50_v10 }
  0x17   :  { %374 = vmatpush.msrb.mxu3 %v52_v4  ;;  %684 = vmatpush.msrb.mxu0 %v52_v4 }
  0x18   :  { %1696 = vmatmul.msk.f32.vlgmr.msra.gmra.mxu2 %vm56_vm0, %v201_v11  ;;  %759 = vmatpush.msrb.mxu1 %v53_v3 }
  0x19   :  { %375 = vmatpush.msrb.mxu3 %v51_v8  ;;  %685 = vmatpush.msrb.mxu0 %v51_v8 }
  0x1a   :  { %292 = vmatpush.msrb.mxu2 %v53_v3  ;;  %760 = vmatpush.msrb.mxu1 %v52_v4 }
  0x1b   :  { %376 = vmatpush.msrb.mxu3 %v50_v10  ;;  %686 = vmatpush.msrb.mxu0 %v50_v10 }
  0x1c   :  { %293 = vmatpush.msrb.mxu2 %v52_v4  ;;  %761 = vmatpush.msrb.mxu1 %v51_v8 }
  0x1d   :  { %604 = vmatpush.msra.mxu3 %v53_v3 }
  0x1e   :  { %294 = vmatpush.msrb.mxu2 %v51_v8  ;;  %762 = vmatpush.msrb.mxu1 %v50_v10 }
  0x1f   :  { %605 = vmatpush.msra.mxu3 %v52_v4 }
  0x20   :  { %295 = vmatpush.msrb.mxu2 %v50_v10 }
  0x21   :  { %606 = vmatpush.msra.mxu3 %v51_v8 }
  0x22   :  { %528 = vmatpush.msra.mxu2 %v53_v3 }
  0x23   :  { %607 = vmatpush.msra.mxu3 %v50_v10 }
  0x24   :  { %529 = vmatpush.msra.mxu2 %v52_v4 }
  0x26   :  { %530 = vmatpush.msra.mxu2 %v51_v8 }
  0x28   :  { %531 = vmatpush.msra.mxu2 %v50_v10 }
  0x91   :  { %v80_v13 = vpop.f32.mrf.mxu0 }
  0x92   :  { %v2012_v14 = vadd.f32 %v1751_v12, %v80_v13 }
  0x94   :  { %100 = vrot.lane.b32.xlu1 %v2012_v14, %s1974_s0  ;;  %v90_v15 = vrot.slane %v2012_v14, 5 }
  0x96   :  { %91 = vrot.lane.b32.xlu0 %v90_v15, %s1974_s0 }
  0x97   :  { %v83_v16 = vpop.f32.mrf.mxu3 }
  0x98   :  { %v2018_v17 = vadd.f32 %v1751_v12, %v83_v16 }
  0x9a   :  { %v87_v18 = vrot.slane %v2018_v17, 7  ;;  %v94_v19 = vrot.slane %v2018_v17, 4 }
  0x9b   :  { %v222_v28 = vpop.f32.mrf.mxu2 }
  0x9c   :  { %103 = vrot.lane.b32.xlu1 %v87_v18, %s1974_s0  ;;  %v131_v20 = vsel %vm130_vm2, %v2012_v14, %v87_v18 }
  0x9e   :  { %95 = vrot.lane.b32.xlu0 %v94_v19, %s1974_s0 }
 0x106   :  { %v101_v22 = vpop.permute.xlu1 %100 }
 0x108   :  { %v92_v21 = vpop.permute.xlu0 %91 }
 0x109   :  { %v133_v23 = vsel %vm132_vm3, %v131_v20, %v92_v21  ;;  %v110_v21 = vrot.slane %v2012_v14, 3 }
 0x10e   :  { %v104_v29 = vpop.permute.xlu1 %103 }
 0x110   :  { %v96_v24 = vpop.permute.xlu0 %95 }
 0x111   :  { %v135_v25 = vsel %vm134_vm4, %v133_v23, %v96_v24 }
 0x112   :  { %v137_v26 = vsel %vm136_vm5, %v135_v25, %v90_v15  ;;  %v122_v25 = vrot.slane %v2012_v14, 6 }
 0x113   :  { %v139_v27 = vsel %vm138_vm6, %v137_v26, %v94_v19  ;;  %v114_v26 = vrot.slane %v2018_v17, 2 }
 0x114   :  { %v141_v30 = vsel %vm140_vm7, %v139_v27, %v101_v22  ;;  %v126_v22 = vrot.slane %v2018_v17, 5 }
 0x115   :  { %v143_v31 = vsel %vm142_vm8, %v141_v30, %v104_v29  ;;  %v108_v30 = vrot.slane %v2018_v17, 1 }
 0x116   :  { %v225_v32 = vadd.f32 %v222_v28, %v143_v31 }
 0x118   :  { %1755 = vtanh.f32 %v225_v32  ;;  %v1697_v34 = vmul.f32 -1.442695, %v225_v32 }
 0x11a   :  { %1757 = vpow2.f32 %v1697_v34 }
 0x11e   :  { %v1756_v33 = vpop.eup %1755 }
 0x11f   :  { %248 = vrot.lane.b32.xlu2 %v1756_v33, %s1975_s1 }
 0x120   :  { %v1758_v35 = vpop.eup %1757 }
 0x121   :  { %v229_v36 = vadd.f32 1.0, %v1758_v35 }
 0x123   :  { %1759 = vrcp.f32 %v229_v36  ;;  %v241_v42 = vand.u32 2147483648, %v229_v36  ;;  %vm235_vm10 = vweird.f32 %v229_v36  ;;  %v239_v43 = vand.u32 2147483647, %v229_v36 }
 0x125   :  { %v242_v45 = vor.u32 1.1754944e-38, %v241_v42  ;;  %vm240_vm12 = vcmp.eq.f32.partialorder %v239_v43, 8.507059e+37 }
 0x129   :  { %v1760_v37 = vpop.eup %1759 }
 0x12a   :  { %v231_v38 = vmul.f32 %v1760_v37, %v229_v36  ;;  %vm236_vm9 = vweird.f32 %v1760_v37 }
 0x12b   :  { %vm237_vm11 = vmor %vm235_vm10, %vm236_vm9 }
 0x12c   :  { %v232_v39 = vsub.f32 1.0, %v231_v38 }
 0x12e   :  { %v233_v40 = vmul.f32 %v1760_v37, %v232_v39  ;;  %v120_v39 = vrot.slane %v2018_v17, 6 }
 0x130   :  { %v234_v41 = vadd.f32 %v1760_v37, %v233_v40 }
 0x132   :  { %v238_v44 = vsel %vm237_vm11, %v1760_v37, %v234_v41  ;;  %v118_v37 = vrot.slane %v2012_v14, 7 }
 0x133   :  { %v243_v47 = vsel %vm240_vm12, %v242_v45, %v238_v44  ;;  %vm353_vm12 = vcmask 261254  }
 0x134   :  { %v246_v49 = vmul.f32 0.0, %v243_v47 }
 0x179   :  { %v249_v46 = vpop.permute.xlu2 %248 }
 0x17a   :  { %v251_v48 = vmul.f32 %v249_v46, %v243_v47 }
 0x17c   :  { %253 = vrot.lane.b32.xlu2 %v251_v48, %s1976_s21 }
 0x1d6   :  { %v254_v50 = vpop.permute.xlu2 %253 }
 0x1d7   :  { %v256_v51 = vadd.f32 %v254_v50, %v246_v49 }
 0x1d9   :  { %1761 = vtanh.f32 %v256_v51  ;;  %v325_v15 = vrot.slane %v256_v51, 4 }
 0x1df   :  { %v1762_v52 = vpop.eup %1761 }
 0x1e0   :  { %259 = vrot.lane.b32.xlu0 %v1762_v52, %s1976_s21 }
 0x252   :  { %v260_v53 = vpop.permute.xlu0 %259 }
 0x253   :  { %v262_v54 = vmul.f32 %v260_v53, %v243_v47 }
 0x255   :  { %269 = vrot.lane.b32.xlu2 %v262_v54, %s1977_s22  ;;  %264 = vrot.lane.b32.xlu1 %v262_v54, %s1978_s23 }
 0x2af   :  { %v270_v55 = vpop.permute.xlu2 %269 }
 0x2b0   :  { %273 = vst.msk [vmem:[#allocation4] sm:$0xc] %vm272_vm13, %v270_v55 }
 0x2b1   :  { %275 = vst.msk [vmem:[#allocation2 + $0xc] sm:$0xc] %vm272_vm13, %v270_v55 }
 0x2c7   :  { %v265_v56 = vpop.permute.xlu1 %264 }
 0x2c8   :  { %268 = vst.msk [vmem:[#allocation4] sm:$0x3] %vm267_vm14, %v265_v56 }
 0x2c9   :  { %274 = vst.msk [vmem:[#allocation2] sm:$0x3] %vm267_vm14, %v265_v56 }
 0x2cf   :  { %v276_v57 = vld [vmem:[#allocation4] sm:$0xf] }
 0x2d0   :  { %1698 = vmatmul.msk.f32.vlgmr.msrb.gmra.mxu2 %vm56_vm0, %v276_v57 }
 0x353   :  { %v297_v58 = vpop.f32.mrf.mxu2 }
 0x354   :  { %v301_v59 = vrot.slane %v297_v58, 4 }
 0x356   :  { %v303_v60 = vadd.f32 %v301_v59, %v143_v31  ;;  %v106_v31 = vrot.slane %v2012_v14, 2 }
 0x358   :  { %1763 = vtanh.f32 %v303_v60  ;;  %v1699_v62 = vmul.f32 -1.442695, %v303_v60  ;;  %v144_v34 = vsel %vm130_vm2, %v106_v31, %v108_v30 }
 0x35a   :  { %1765 = vpow2.f32 %v1699_v62 }
 0x35e   :  { %v1764_v61 = vpop.eup %1763 }
 0x35f   :  { %329 = vrot.lane.b32.xlu0 %v1764_v61, %s1975_s1 }
 0x360   :  { %v1766_v63 = vpop.eup %1765 }
 0x361   :  { %v307_v0 = vadd.f32 1.0, %v1766_v63 }
 0x363   :  { %1767 = vrcp.f32 %v307_v0  ;;  %v319_v6 = vand.u32 2147483648, %v307_v0  ;;  %vm313_vm9 = vweird.f32 %v307_v0  ;;  %v317_v7 = vand.u32 2147483647, %v307_v0 }
 0x365   :  { %v320_v10 = vor.u32 1.1754944e-38, %v319_v6  ;;  %vm318_vm11 = vcmp.eq.f32.partialorder %v317_v7, 8.507059e+37 }
 0x369   :  { %v1768_v1 = vpop.eup %1767 }
 0x36a   :  { %v309_v2 = vmul.f32 %v1768_v1, %v307_v0  ;;  %vm314_vm15 = vweird.f32 %v1768_v1 }
 0x36b   :  { %vm315_vm10 = vmor %vm313_vm9, %vm314_vm15  ;;  %vm348_vm15 = vcmask 128004  }
 0x36c   :  { %v310_v3 = vsub.f32 1.0, %v309_v2 }
 0x36e   :  { %v311_v4 = vmul.f32 %v1768_v1, %v310_v3 }
 0x370   :  { %v312_v5 = vadd.f32 %v1768_v1, %v311_v4 }
 0x372   :  { %v316_v8 = vsel %vm315_vm10, %v1768_v1, %v312_v5 }
 0x373   :  { %v321_v12 = vsel %vm318_vm11, %v320_v10, %v316_v8 }
 0x374   :  { %v327_v16 = vmul.f32 %v325_v15, %v321_v12 }
 0x3d1   :  { %v330_v11 = vpop.permute.xlu0 %329 }
 0x3d2   :  { %v332_v13 = vmul.f32 %v330_v11, %v321_v12 }
 0x3d4   :  { %334 = vrot.lane.b32.xlu1 %v332_v13, %s1976_s21 }
 0x446   :  { %v335_v18 = vpop.permute.xlu1 %334 }
 0x447   :  { %v2044_v19 = vadd.f32 %v335_v18, %v327_v16 }
 0x449   :  { %1769 = vtanh.f32 %v2044_v19  ;;  %v403_v63 = vrot.slane %v2044_v19, 4 }
 0x44f   :  { %v1770_v20 = vpop.eup %1769 }
 0x450   :  { %340 = vrot.lane.b32.xlu2 %v1770_v20, %s1976_s21 }
 0x458   :  { %111 = vrot.lane.b32.xlu2 %v110_v21, %s1974_s0 }
 0x460   :  { %127 = vrot.lane.b32.xlu2 %v126_v22, %s1974_s0 }
 0x4aa   :  { %v341_v23 = vpop.permute.xlu2 %340 }
 0x4ab   :  { %v343_v24 = vmul.f32 %v341_v23, %v321_v12 }
 0x4ad   :  { %350 = vrot.lane.b32.xlu1 %v343_v24, %s1977_s22  ;;  %345 = vrot.lane.b32.xlu0 %v343_v24, %s1978_s23 }
 0x4b2   :  { %v112_v32 = vpop.permute.xlu2 %111 }
 0x4b3   :  { %v145_v35 = vsel %vm132_vm3, %v144_v34, %v112_v32 }
 0x4b5   :  { %123 = vrot.lane.b32.xlu1 %v122_v25, %s1974_s0  ;;  %115 = vrot.lane.b32.xlu0 %v114_v26, %s1974_s0 }
 0x4ba   :  { %v128_v43 = vpop.permute.xlu2 %127 }
 0x51f   :  { %v351_v27 = vpop.permute.xlu1 %350  ;;  %v346_v28 = vpop.permute.xlu0 %345 }
 0x520   :  { %354 = vst.msk [vmem:[#allocation4 - $0x4] sm:$0xc0] %vm353_vm12, %v351_v27 }
 0x521   :  { %356 = vst.msk [vmem:[#allocation2 + $0x6] sm:$0xc0] %vm353_vm12, %v351_v27 }
 0x522   :  { %349 = vst.msk [vmem:[#allocation4 - $0x4] sm:$0x30] %vm348_vm15, %v346_v28 }
 0x523   :  { %355 = vst.msk [vmem:[#allocation2 - $0x2] sm:$0x30] %vm348_vm15, %v346_v28 }
 0x527   :  { %v116_v33 = vpop.permute.xlu0 %115  ;;  %v124_v41 = vpop.permute.xlu1 %123 }
 0x528   :  { %v146_v36 = vsel %vm134_vm4, %v145_v35, %v116_v33 }
 0x529   :  { %v357_v29 = vld [vmem:[#allocation4] sm:$0xf]  ;;  %v147_v38 = vsel %vm136_vm5, %v146_v36, %v118_v37 }
 0x52a   :  { %1700 = vmatmul.msk.f32.vlgmr.msrb.gmra.mxu3 %vm56_vm0, %v357_v29  ;;  %v148_v40 = vsel %vm138_vm6, %v147_v38, %v120_v39 }
 0x52b   :  { %v149_v42 = vsel %vm140_vm7, %v148_v40, %v124_v41 }
 0x52c   :  { %v150_v44 = vsel %vm142_vm8, %v149_v42, %v128_v43 }
 0x5ad   :  { %v378_v45 = vpop.f32.mrf.mxu3 }
 0x5ae   :  { %v381_v46 = vadd.f32 %v378_v45, %v150_v44  ;;  %v153_v45 = vrot.slane %v2018_v17, 3 }
 0x5b0   :  { %1771 = vtanh.f32 %v381_v46  ;;  %v1701_v48 = vmul.f32 -1.442695, %v381_v46 }
 0x5b2   :  { %1773 = vpow2.f32 %v1701_v48  ;;  %v151_v48 = vrot.slane %v2012_v14, 4 }
 0x5b6   :  { %v1772_v47 = vpop.eup %1771 }
 0x5b7   :  { %407 = vrot.lane.b32.xlu0 %v1772_v47, %s1975_s1 }
 0x5b8   :  { %v1774_v49 = vpop.eup %1773 }
 0x5b9   :  { %v385_v50 = vadd.f32 1.0, %v1774_v49 }
 0x5bb   :  { %1775 = vrcp.f32 %v385_v50  ;;  %v397_v56 = vand.u32 2147483648, %v385_v50  ;;  %vm391_vm10 = vweird.f32 %v385_v50  ;;  %v395_v57 = vand.u32 2147483647, %v385_v50 }
 0x5bd   :  { %v398_v59 = vor.u32 1.1754944e-38, %v397_v56  ;;  %vm396_vm1 = vcmp.eq.f32.partialorder %v395_v57, 8.507059e+37 }
 0x5c1   :  { %v1776_v51 = vpop.eup %1775 }
 0x5c2   :  { %v387_v52 = vmul.f32 %v1776_v51, %v385_v50  ;;  %vm392_vm9 = vweird.f32 %v1776_v51 }
 0x5c3   :  { %vm393_vm11 = vmor %vm391_vm10, %vm392_vm9 }
 0x5c4   :  { %v388_v53 = vsub.f32 1.0, %v387_v52 }
 0x5c6   :  { %v389_v54 = vmul.f32 %v1776_v51, %v388_v53 }
 0x5c8   :  { %v390_v55 = vadd.f32 %v1776_v51, %v389_v54  ;;  %v185_v54 = vsel %vm130_vm2, %v151_v48, %v153_v45 }
 0x5ca   :  { %v394_v58 = vsel %vm393_vm11, %v1776_v51, %v390_v55 }
 0x5cb   :  { %v399_v61 = vsel %vm396_vm1, %v398_v59, %v394_v58 }
 0x5cc   :  { %v405_v0 = vmul.f32 %v403_v63, %v399_v61 }
 0x629   :  { %v408_v60 = vpop.permute.xlu0 %407 }
 0x62a   :  { %v410_v62 = vmul.f32 %v408_v60, %v399_v61 }
 0x62c   :  { %412 = vrot.lane.b32.xlu1 %v410_v62, %s1976_s21 }
 0x69e   :  { %v413_v1 = vpop.permute.xlu1 %412 }
 0x69f   :  { %v415_v2 = vadd.f32 %v413_v1, %v405_v0 }
 0x6a1   :  { %1777 = vtanh.f32 %v415_v2  ;;  %v482_v38 = vrot.slane %v415_v2, 4 }
 0x6a7   :  { %v1778_v3 = vpop.eup %1777 }
 0x6a8   :  { %418 = vrot.lane.b32.xlu2 %v1778_v3, %s1976_s21 }
 0x702   :  { %v419_v4 = vpop.permute.xlu2 %418 }
 0x703   :  { %v421_v5 = vmul.f32 %v419_v4, %v399_v61 }
 0x705   :  { %427 = vrot.lane.b32.xlu1 %v421_v5, %s1977_s22  ;;  %423 = vrot.lane.b32.xlu0 %v421_v5, %s1978_s23 }
 0x777   :  { %v428_v6 = vpop.permute.xlu1 %427  ;;  %v424_v7 = vpop.permute.xlu0 %423 }
 0x778   :  { %430 = vst.msk [vmem:[#allocation4] sm:$0xc] %vm272_vm13, %v428_v6 }
 0x779   :  { %432 = vst.msk [vmem:[#allocation2 + $0x8] sm:$0xc] %vm272_vm13, %v428_v6 }
 0x77a   :  { %426 = vst.msk [vmem:[#allocation4] sm:$0x3] %vm267_vm14, %v424_v7 }
 0x77b   :  { %431 = vst.msk [vmem:[#allocation2 + $0x4] sm:$0x3] %vm267_vm14, %v424_v7 }
 0x781   :  { %v433_v8 = vld [vmem:[#allocation4] sm:$0xf] }
 0x782   :  { %1702 = vmatmul.msk.f32.vlgmr.msra.gmra.mxu1 %vm56_vm0, %v433_v8 }
 0x7ff   :  { %v454_v10 = vpop.f32.mrf.mxu1 }
 0x800   :  { %v458_v11 = vrot.slane %v454_v10, 4 }
 0x802   :  { %v460_v12 = vadd.f32 %v458_v11, %v150_v44  ;;  %v155_v44 = vrot.slane %v2012_v14, 1 }
 0x804   :  { %1779 = vtanh.f32 %v460_v12  ;;  %v1703_v15 = vmul.f32 -1.442695, %v460_v12 }
 0x806   :  { %1781 = vpow2.f32 %v1703_v15 }
 0x80a   :  { %v1780_v13 = vpop.eup %1779 }
 0x80b   :  { %486 = vrot.lane.b32.xlu2 %v1780_v13, %s1975_s1 }
 0x80c   :  { %v1782_v16 = vpop.eup %1781 }
 0x80d   :  { %v464_v18 = vadd.f32 1.0, %v1782_v16 }
 0x80f   :  { %1783 = vrcp.f32 %v464_v18  ;;  %v476_v28 = vand.u32 2147483648, %v464_v18  ;;  %vm470_vm9 = vweird.f32 %v464_v18  ;;  %v474_v29 = vand.u32 2147483647, %v464_v18 }
 0x811   :  { %v477_v33 = vor.u32 1.1754944e-38, %v476_v28  ;;  %vm475_vm11 = vcmp.eq.f32.partialorder %v474_v29, 8.507059e+37 }
 0x815   :  { %v1784_v19 = vpop.eup %1783 }
 0x816   :  { %v466_v20 = vmul.f32 %v1784_v19, %v464_v18  ;;  %vm471_vm1 = vweird.f32 %v1784_v19 }
 0x817   :  { %vm472_vm10 = vmor %vm470_vm9, %vm471_vm1 }
 0x818   :  { %v467_v23 = vsub.f32 1.0, %v466_v20 }
 0x81a   :  { %v468_v24 = vmul.f32 %v1784_v19, %v467_v23 }
 0x81c   :  { %v469_v27 = vadd.f32 %v1784_v19, %v468_v24 }
 0x81e   :  { %v473_v32 = vsel %vm472_vm10, %v1784_v19, %v469_v27 }
 0x81f   :  { %v478_v35 = vsel %vm475_vm11, %v477_v33, %v473_v32 }
 0x820   :  { %v484_v40 = vmul.f32 %v482_v38, %v478_v35 }
 0x865   :  { %v487_v34 = vpop.permute.xlu2 %486 }
 0x866   :  { %v489_v36 = vmul.f32 %v487_v34, %v478_v35 }
 0x868   :  { %491 = vrot.lane.b32.xlu0 %v489_v36, %s1976_s21 }
 0x8da   :  { %v492_v41 = vpop.permute.xlu0 %491 }
 0x8db   :  { %v2103_v42 = vadd.f32 %v492_v41, %v484_v40 }
 0x8dd   :  { %1785 = vtanh.f32 %v2103_v42  ;;  %v558_v20 = vrot.slane %v2103_v42, 4 }
 0x8e3   :  { %v1786_v43 = vpop.eup %1785 }
 0x8e4   :  { %497 = vrot.lane.b32.xlu1 %v1786_v43, %s1976_s21 }
 0x8ec   :  { %156 = vrot.lane.b32.xlu1 %v155_v44, %s1974_s0 }
 0x8f4   :  { %166 = vrot.lane.b32.xlu1 %v153_v45, %s1974_s0 }
 0x956   :  { %v498_v46 = vpop.permute.xlu1 %497 }
 0x957   :  { %v500_v47 = vmul.f32 %v498_v46, %v478_v35 }
 0x959   :  { %506 = vrot.lane.b32.xlu0 %v500_v47, %s1977_s22  ;;  %502 = vrot.lane.b32.xlu2 %v500_v47, %s1978_s23 }
 0x95e   :  { %v157_v52 = vpop.permute.xlu1 %156 }
 0x95f   :  { %v186_v55 = vsel %vm132_vm3, %v185_v54, %v157_v52 }
 0x961   :  { %163 = vrot.lane.b32.xlu0 %v151_v48, %s1974_s0  ;;  %159 = vrot.lane.b32.xlu2 %v2018_v17, %s1974_s0 }
 0x966   :  { %v167_v61 = vpop.permute.xlu1 %166 }
 0x9b3   :  { %v503_v49 = vpop.permute.xlu2 %502 }
 0x9b4   :  { %505 = vst.msk [vmem:[#allocation4 - $0x4] sm:$0x30] %vm348_vm15, %v503_v49 }
 0x9b5   :  { %510 = vst.msk [vmem:[#allocation2 + $0x2] sm:$0x30] %vm348_vm15, %v503_v49 }
 0x9bb   :  { %v160_v53 = vpop.permute.xlu2 %159 }
 0x9bc   :  { %v187_v56 = vsel %vm134_vm4, %v186_v55, %v160_v53 }
 0x9bd   :  { %v188_v57 = vsel %vm136_vm5, %v187_v56, %v155_v44 }
 0x9be   :  { %v189_v59 = vsel %vm138_vm6, %v188_v57, %v2018_v17 }
 0x9cb   :  { %v507_v50 = vpop.permute.xlu0 %506 }
 0x9cc   :  { %509 = vst.msk [vmem:[#allocation4 - $0x4] sm:$0xc0] %vm353_vm12, %v507_v50 }
 0x9cd   :  { %511 = vst.msk [vmem:[#allocation2 + $0x2] sm:$0xc0] %vm353_vm12, %v507_v50 }
 0x9d3   :  { %v512_v51 = vld [vmem:[#allocation4] sm:$0xf]  ;;  %v164_v58 = vpop.permute.xlu0 %163 }
 0x9d4   :  { %1704 = vmatmul.msk.f32.vlgmr.msra.gmra.mxu2 %vm56_vm0, %v512_v51  ;;  %v190_v60 = vsel %vm140_vm7, %v189_v59, %v164_v58 }
 0x9d5   :  { %v191_v62 = vsel %vm142_vm8, %v190_v60, %v167_v61 }
 0xa57   :  { %v533_v63 = vpop.f32.mrf.mxu2 }
 0xa58   :  { %v536_v0 = vadd.f32 %v533_v63, %v191_v62 }
 0xa5a   :  { %1787 = vtanh.f32 %v536_v0  ;;  %v1705_v2 = vmul.f32 -1.442695, %v536_v0 }
 0xa5c   :  { %1789 = vpow2.f32 %v1705_v2 }
 0xa60   :  { %v1788_v1 = vpop.eup %1787 }
 0xa61   :  { %562 = vrot.lane.b32.xlu2 %v1788_v1, %s1975_s1 }
 0xa62   :  { %v1790_v3 = vpop.eup %1789 }
 0xa63   :  { %v540_v4 = vadd.f32 1.0, %v1790_v3 }
 0xa65   :  { %1791 = vrcp.f32 %v540_v4  ;;  %v552_v11 = vand.u32 2147483648, %v540_v4  ;;  %vm546_vm9 = vweird.f32 %v540_v4  ;;  %v550_v12 = vand.u32 2147483647, %v540_v4 }
 0xa67   :  { %v553_v15 = vor.u32 1.1754944e-38, %v552_v11  ;;  %vm551_vm11 = vcmp.eq.f32.partialorder %v550_v12, 8.507059e+37 }
 0xa6b   :  { %v1792_v5 = vpop.eup %1791 }
 0xa6c   :  { %v542_v6 = vmul.f32 %v1792_v5, %v540_v4  ;;  %vm547_vm1 = vweird.f32 %v1792_v5 }
 0xa6d   :  { %vm548_vm10 = vmor %vm546_vm9, %vm547_vm1 }
 0xa6e   :  { %v543_v7 = vsub.f32 1.0, %v542_v6 }
 0xa70   :  { %v544_v8 = vmul.f32 %v1792_v5, %v543_v7 }
 0xa72   :  { %v545_v10 = vadd.f32 %v1792_v5, %v544_v8 }
 0xa74   :  { %v549_v13 = vsel %vm548_vm10, %v1792_v5, %v545_v10 }
 0xa75   :  { %v554_v18 = vsel %vm551_vm11, %v553_v15, %v549_v13 }
 0xa76   :  { %v560_v23 = vmul.f32 %v558_v20, %v554_v18 }
 0xabb   :  { %v563_v16 = vpop.permute.xlu2 %562 }
 0xabc   :  { %v565_v19 = vmul.f32 %v563_v16, %v554_v18 }
 0xabe   :  { %567 = vrot.lane.b32.xlu0 %v565_v19, %s1976_s21 }
 0xb30   :  { %v568_v24 = vpop.permute.xlu0 %567 }
 0xb31   :  { %v570_v27 = vadd.f32 %v568_v24, %v560_v23 }
 0xb33   :  { %1793 = vtanh.f32 %v570_v27  ;;  %v637_v57 = vrot.slane %v570_v27, 4 }
 0xb39   :  { %v1794_v28 = vpop.eup %1793 }
 0xb3a   :  { %573 = vrot.lane.b32.xlu1 %v1794_v28, %s1976_s21 }
 0xbac   :  { %v574_v29 = vpop.permute.xlu1 %573 }
 0xbad   :  { %v576_v32 = vmul.f32 %v574_v29, %v554_v18 }
 0xbaf   :  { %582 = vrot.lane.b32.xlu0 %v576_v32, %s1977_s22  ;;  %578 = vrot.lane.b32.xlu2 %v576_v32, %s1978_s23 }
 0xc09   :  { %v579_v33 = vpop.permute.xlu2 %578 }
 0xc0a   :  { %581 = vst.msk [vmem:[#allocation4] sm:$0x3] %vm267_vm14, %v579_v33 }
 0xc0b   :  { %586 = vst.msk [vmem:[#allocation2 + $0x8] sm:$0x3] %vm267_vm14, %v579_v33 }
 0xc21   :  { %v583_v34 = vpop.permute.xlu0 %582 }
 0xc22   :  { %585 = vst.msk [vmem:[#allocation4] sm:$0xc] %vm272_vm13, %v583_v34 }
 0xc23   :  { %587 = vst.msk [vmem:[#allocation2 + $0x4] sm:$0xc] %vm272_vm13, %v583_v34 }
 0xc29   :  { %v588_v35 = vld [vmem:[#allocation4] sm:$0xf] }
 0xc2a   :  { %1706 = vmatmul.msk.f32.vlgmr.msra.gmra.mxu3 %vm56_vm0, %v588_v35 }
 0xcad   :  { %v609_v36 = vpop.f32.mrf.mxu3 }
 0xcae   :  { %v613_v38 = vrot.slane %v609_v36, 4 }
 0xcb0   :  { %v615_v40 = vadd.f32 %v613_v38, %v191_v62 }
 0xcb2   :  { %1795 = vtanh.f32 %v615_v40  ;;  %v1707_v42 = vmul.f32 -1.442695, %v615_v40 }
 0xcb4   :  { %1797 = vpow2.f32 %v1707_v42 }
 0xcb8   :  { %v1796_v41 = vpop.eup %1795 }
 0xcb9   :  { %641 = vrot.lane.b32.xlu1 %v1796_v41, %s1975_s1 }
 0xcba   :  { %v1798_v43 = vpop.eup %1797 }
 0xcbb   :  { %v619_v44 = vadd.f32 1.0, %v1798_v43 }
 0xcbd   :  { %1799 = vrcp.f32 %v619_v44  ;;  %v631_v50 = vand.u32 2147483648, %v619_v44  ;;  %vm625_vm9 = vweird.f32 %v619_v44  ;;  %v629_v51 = vand.u32 2147483647, %v619_v44 }
 0xcbf   :  { %v632_v53 = vor.u32 1.1754944e-38, %v631_v50  ;;  %vm630_vm11 = vcmp.eq.f32.partialorder %v629_v51, 8.507059e+37 }
 0xcc3   :  { %v1800_v45 = vpop.eup %1799 }
 0xcc4   :  { %v621_v46 = vmul.f32 %v1800_v45, %v619_v44  ;;  %vm626_vm1 = vweird.f32 %v1800_v45 }
 0xcc5   :  { %vm627_vm10 = vmor %vm625_vm9, %vm626_vm1 }
 0xcc6   :  { %v622_v47 = vsub.f32 1.0, %v621_v46 }
 0xcc8   :  { %v623_v48 = vmul.f32 %v1800_v45, %v622_v47 }
 0xcca   :  { %v624_v49 = vadd.f32 %v1800_v45, %v623_v48 }
 0xccc   :  { %v628_v52 = vsel %vm627_vm10, %v1800_v45, %v624_v49 }
 0xccd   :  { %v633_v55 = vsel %vm630_vm11, %v632_v53, %v628_v52 }
 0xcce   :  { %v639_v58 = vmul.f32 %v637_v57, %v633_v55 }
 0xd2b   :  { %v642_v54 = vpop.permute.xlu1 %641 }
 0xd2c   :  { %v644_v56 = vmul.f32 %v642_v54, %v633_v55 }
 0xd2e   :  { %646 = vrot.lane.b32.xlu2 %v644_v56, %s1976_s21 }
 0xd88   :  { %v647_v59 = vpop.permute.xlu2 %646 }
 0xd89   :  { %v649_v60 = vadd.f32 %v647_v59, %v639_v58 }
 0xd8b   :  { %1801 = vtanh.f32 %v649_v60  ;;  %v713_v29 = vrot.slane %v649_v60, 4 }
 0xd91   :  { %v1802_v61 = vpop.eup %1801 }
 0xd92   :  { %652 = vrot.lane.b32.xlu0 %v1802_v61, %s1976_s21 }
 0xd9a   :  { %171 = vrot.lane.b32.xlu0 %v118_v37, %s1974_s0 }
 0xda2   :  { %182 = vrot.lane.b32.xlu0 %v108_v30, %s1974_s0 }
 0xe04   :  { %v653_v62 = vpop.permute.xlu0 %652 }
 0xe05   :  { %v655_v63 = vmul.f32 %v653_v62, %v633_v55 }
 0xe07   :  { %661 = vrot.lane.b32.xlu2 %v655_v63, %s1977_s22  ;;  %657 = vrot.lane.b32.xlu1 %v655_v63, %s1978_s23 }
 0xe0c   :  { %v172_v1 = vpop.permute.xlu0 %171 }
 0xe0f   :  { %179 = vrot.lane.b32.xlu2 %v106_v31, %s1974_s0  ;;  %174 = vrot.lane.b32.xlu1 %v120_v39, %s1974_s0  ;;  %v192_v31 = vsel %vm130_vm2, %v122_v25, %v126_v22 }
 0xe10   :  { %v193_v39 = vsel %vm132_vm3, %v192_v31, %v172_v1  ;;  %v827_v31 = vld [vmem:[#allocation8 + $0x60] sm:$0xff] }
 0xe11   :  { %852 = vmatpush.msrb.mxu2 %v827_v31 }
 0xe14   :  { %v183_v8 = vpop.permute.xlu0 %182 }
 0xe61   :  { %v662_v0 = vpop.permute.xlu2 %661 }
 0xe62   :  { %664 = vst.msk [vmem:[#allocation4 - $0x4] sm:$0xc0] %vm353_vm12, %v662_v0 }
 0xe63   :  { %666 = vst.msk [vmem:[#allocation2 - $0x2] sm:$0xc0] %vm353_vm12, %v662_v0 }
 0xe69   :  { %v180_v6 = vpop.permute.xlu2 %179 }
 0xe79   :  { %v658_v30 = vpop.permute.xlu1 %657 }
 0xe7a   :  { %660 = vst.msk [vmem:[#allocation4 - $0x4] sm:$0x30] %vm348_vm15, %v658_v30 }
 0xe7b   :  { %665 = vst.msk [vmem:[#allocation2 + $0x6] sm:$0x30] %vm348_vm15, %v658_v30 }
 0xe81   :  { %v667_v37 = vld [vmem:[#allocation4] sm:$0xf]  ;;  %v175_v2 = vpop.permute.xlu1 %174 }
 0xe82   :  { %1708 = vmatmul.msk.f32.vlgmr.msrb.gmra.mxu0 %vm56_vm0, %v667_v37  ;;  %v194_v3 = vsel %vm134_vm4, %v193_v39, %v175_v2  ;;  %v826_v39 = vld [vmem:[#allocation8 + $0x58] sm:$0xff] }
 0xe83   :  { %v195_v4 = vsel %vm136_vm5, %v194_v3, %v110_v21  ;;  %v825_v3 = vld [vmem:[#allocation8 + $0x50] sm:$0xff]  ;;  %853 = vmatpush.msrb.mxu2 %v826_v39 }
 0xe84   :  { %v196_v5 = vsel %vm138_vm6, %v195_v4, %v114_v26  ;;  %v824_v4 = vld [vmem:[#allocation8 + $0x48] sm:$0xff] }
 0xe85   :  { %v197_v7 = vsel %vm140_vm7, %v196_v5, %v180_v6  ;;  %854 = vmatpush.msrb.mxu2 %v825_v3  ;;  %v831_v5 = vld [vmem:[#allocation8 + $0x88] sm:$0xff]  ;;  %v830_v6 = vld [vmem:[#allocation8 + $0x80] sm:$0xff] }
 0xe86   :  { %v198_v10 = vsel %vm142_vm8, %v197_v7, %v183_v8  ;;  %930 = vmatpush.msrb.mxu3 %v831_v5  ;;  %1003 = vmatpush.msra.mxu0 %v831_v5  ;;  %v829_v7 = vld [vmem:[#allocation8 + $0x78] sm:$0xff]  ;;  %v828_v8 = vld [vmem:[#allocation8 + $0x70] sm:$0xff] }
 0xe87   :  { %855 = vmatpush.msrb.mxu2 %v824_v4  ;;  %1082 = vmatpush.msra.mxu1 %v831_v5 }
 0xe88   :  { %931 = vmatpush.msrb.mxu3 %v830_v6  ;;  %1004 = vmatpush.msra.mxu0 %v830_v6 }
 0xe89   :  { %1392 = vmatpush.msra.mxu2 %v831_v5  ;;  %1083 = vmatpush.msra.mxu1 %v830_v6 }
 0xe8a   :  { %932 = vmatpush.msrb.mxu3 %v829_v7  ;;  %1005 = vmatpush.msra.mxu0 %v829_v7 }
 0xe8b   :  { %1393 = vmatpush.msra.mxu2 %v830_v6  ;;  %1084 = vmatpush.msra.mxu1 %v829_v7 }
 0xe8c   :  { %933 = vmatpush.msrb.mxu3 %v828_v8  ;;  %1006 = vmatpush.msra.mxu0 %v828_v8 }
 0xe8d   :  { %1394 = vmatpush.msra.mxu2 %v829_v7  ;;  %1085 = vmatpush.msra.mxu1 %v828_v8 }
 0xe8e   :  { %1158 = vmatpush.msra.mxu3 %v831_v5  ;;  %1237 = vmatpush.msrb.mxu0 %v831_v5 }
 0xe8f   :  { %1395 = vmatpush.msra.mxu2 %v828_v8 }
 0xe90   :  { %1159 = vmatpush.msra.mxu3 %v830_v6  ;;  %1238 = vmatpush.msrb.mxu0 %v830_v6 }
 0xe92   :  { %1160 = vmatpush.msra.mxu3 %v829_v7  ;;  %1239 = vmatpush.msrb.mxu0 %v829_v7 }
 0xe94   :  { %1161 = vmatpush.msra.mxu3 %v828_v8  ;;  %1240 = vmatpush.msrb.mxu0 %v828_v8 }
 0xeff   :  { %v688_v11 = vpop.f32.mrf.mxu0 }
 0xf00   :  { %v691_v22 = vadd.f32 %v688_v11, %v198_v10 }
 0xf02   :  { %1803 = vtanh.f32 %v691_v22  ;;  %v1709_v12 = vmul.f32 -1.442695, %v691_v22 }
 0xf04   :  { %1805 = vpow2.f32 %v1709_v12 }
 0xf08   :  { %v1804_v25 = vpop.eup %1803 }
 0xf09   :  { %717 = vrot.lane.b32.xlu1 %v1804_v25, %s1975_s1 }
 0xf0a   :  { %v1806_v14 = vpop.eup %1805 }
 0xf0b   :  { %v695_v21 = vadd.f32 1.0, %v1806_v14  ;;  %v1752_v14 = vld [vmem:[#allocation8 + $0x68] ss:$0 sm:$0xff] }
 0xf0d   :  { %1807 = vrcp.f32 %v695_v21  ;;  %v707_v18 = vand.u32 2147483648, %v695_v21  ;;  %vm701_vm4 = vweird.f32 %v695_v21  ;;  %v705_v19 = vand.u32 2147483647, %v695_v21 }
 0xf0f   :  { %v708_v23 = vor.u32 1.1754944e-38, %v707_v18  ;;  %vm706_vm8 = vcmp.eq.f32.partialorder %v705_v19, 8.507059e+37 }
 0xf13   :  { %v1808_v17 = vpop.eup %1807 }
 0xf14   :  { %v697_v13 = vmul.f32 %v1808_v17, %v695_v21  ;;  %vm702_vm2 = vweird.f32 %v1808_v17 }
 0xf15   :  { %vm703_vm6 = vmor %vm701_vm4, %vm702_vm2  ;;  %vm2367_vm2 = vcmask 257024  }
 0xf16   :  { %v698_v26 = vsub.f32 1.0, %v697_v13 }
 0xf18   :  { %v699_v15 = vmul.f32 %v1808_v17, %v698_v26 }
 0xf1a   :  { %v700_v16 = vadd.f32 %v1808_v17, %v699_v15 }
 0xf1c   :  { %v704_v20 = vsel %vm703_vm6, %v1808_v17, %v700_v16 }
 0xf1d   :  { %v709_v27 = vsel %vm706_vm8, %v708_v23, %v704_v20 }
 0xf1e   :  { %v715_v32 = vmul.f32 %v713_v29, %v709_v27 }
 0xf7b   :  { %v718_v24 = vpop.permute.xlu1 %717 }
 0xf7c   :  { %v720_v28 = vmul.f32 %v718_v24, %v709_v27 }
 0xf7e   :  { %722 = vrot.lane.b32.xlu2 %v720_v28, %s1976_s21 }
 0xfd8   :  { %v723_v33 = vpop.permute.xlu2 %722 }
 0xfd9   :  { %v725_v34 = vadd.f32 %v723_v33, %v715_v32 }
 0xfdb   :  { %1809 = vtanh.f32 %v725_v34  ;;  %v792_v62 = vrot.slane %v725_v34, 4 }
 0xfe1   :  { %v1810_v35 = vpop.eup %1809 }
 0xfe2   :  { %728 = vrot.lane.b32.xlu0 %v1810_v35, %s1976_s21 }
0x1054   :  { %v729_v36 = vpop.permute.xlu0 %728 }
0x1055   :  { %v731_v38 = vmul.f32 %v729_v36, %v709_v27 }
0x1057   :  { %737 = vrot.lane.b32.xlu2 %v731_v38, %s1977_s22  ;;  %733 = vrot.lane.b32.xlu1 %v731_v38, %s1978_s23 }
0x10b1   :  { %v738_v40 = vpop.permute.xlu2 %737 }
0x10b2   :  { %740 = vst.msk [vmem:[#allocation4] sm:$0xc] %vm272_vm13, %v738_v40 }
0x10b3   :  { %742 = vst.msk [vmem:[#allocation2] sm:$0xc] %vm272_vm13, %v738_v40 }
0x10c9   :  { %v734_v41 = vpop.permute.xlu1 %733 }
0x10ca   :  { %736 = vst.msk [vmem:[#allocation4] sm:$0x3] %vm267_vm14, %v734_v41 }
0x10cb   :  { %741 = vst.msk [vmem:[#allocation2 + $0xc] sm:$0x3] %vm267_vm14, %v734_v41 }
0x10d1   :  { %v743_v42 = vld [vmem:[#allocation4] sm:$0xf] }
0x10d2   :  { %1710 = vmatmul.msk.f32.vlgmr.msrb.gmra.mxu1 %vm56_vm0, %v743_v42 }
0x10d3   :  { %1313 = vmatpush.msrb.mxu1 %v831_v5 }
0x10d5   :  { %1314 = vmatpush.msrb.mxu1 %v830_v6 }
0x10d7   :  { %1315 = vmatpush.msrb.mxu1 %v829_v7 }
0x10d9   :  { %1316 = vmatpush.msrb.mxu1 %v828_v8 }
0x114f   :  { %v764_v43 = vpop.f32.mrf.mxu1 }
0x1150   :  { %v768_v44 = vrot.slane %v764_v43, 4 }
0x1152   :  { %v770_v45 = vadd.f32 %v768_v44, %v198_v10 }
0x1154   :  { %1811 = vtanh.f32 %v770_v45  ;;  %v1711_v47 = vmul.f32 -1.442695, %v770_v45 }
0x1156   :  { %1813 = vpow2.f32 %v1711_v47 }
0x115a   :  { %v1812_v46 = vpop.eup %1811 }
0x115b   :  { %796 = vrot.lane.b32.xlu0 %v1812_v46, %s1975_s1 }
0x115c   :  { %v1814_v48 = vpop.eup %1813 }
0x115d   :  { %v774_v49 = vadd.f32 1.0, %v1814_v48 }
0x115f   :  { %1815 = vrcp.f32 %v774_v49  ;;  %v786_v55 = vand.u32 2147483648, %v774_v49  ;;  %vm780_vm9 = vweird.f32 %v774_v49  ;;  %v784_v56 = vand.u32 2147483647, %v774_v49 }
0x1161   :  { %v787_v58 = vor.u32 1.1754944e-38, %v786_v55  ;;  %vm785_vm11 = vcmp.eq.f32.partialorder %v784_v56, 8.507059e+37 }
0x1165   :  { %v1816_v50 = vpop.eup %1815 }
0x1166   :  { %v776_v51 = vmul.f32 %v1816_v50, %v774_v49  ;;  %vm781_vm1 = vweird.f32 %v1816_v50 }
0x1167   :  { %vm782_vm10 = vmor %vm780_vm9, %vm781_vm1 }
0x1168   :  { %v777_v52 = vsub.f32 1.0, %v776_v51 }
0x116a   :  { %v778_v53 = vmul.f32 %v1816_v50, %v777_v52 }
0x116c   :  { %v779_v54 = vadd.f32 %v1816_v50, %v778_v53 }
0x116e   :  { %v783_v57 = vsel %vm782_vm10, %v1816_v50, %v779_v54 }
0x116f   :  { %v788_v60 = vsel %vm785_vm11, %v787_v58, %v783_v57 }
0x1170   :  { %v794_v63 = vmul.f32 %v792_v62, %v788_v60 }
0x11cd   :  { %v797_v59 = vpop.permute.xlu0 %796 }
0x11ce   :  { %v799_v61 = vmul.f32 %v797_v59, %v788_v60 }
0x11d0   :  { %801 = vrot.lane.b32.xlu1 %v799_v61, %s1976_s21 }
0x1242   :  { %v802_v0 = vpop.permute.xlu1 %801 }
0x1243   :  { %v804_v30 = vadd.f32 %v802_v0, %v794_v63 }
0x1245   :  { %1817 = vtanh.f32 %v804_v30 }
0x124b   :  { %v1818_v37 = vpop.eup %1817 }
0x124c   :  { %807 = vrot.lane.b32.xlu2 %v1818_v37, %s1976_s21 }
0x12a6   :  { %v808_v1 = vpop.permute.xlu2 %807 }
0x12a7   :  { %v810_v2 = vmul.f32 %v808_v1, %v788_v60 }
0x12a9   :  { %812 = vrot.lane.b32.xlu1 %v810_v2, %s1978_s23  ;;  %816 = vrot.lane.b32.xlu0 %v810_v2, %s1977_s22 }
0x131b   :  { %v813_v10 = vpop.permute.xlu1 %812  ;;  %v817_v11 = vpop.permute.xlu0 %816 }
0x131c   :  { %815 = vst.msk [vmem:[#allocation4 - $0x4] sm:$0x30] %vm348_vm15, %v813_v10 }
0x131d   :  { %820 = vst.msk [vmem:[#allocation2 + $0xa] sm:$0x30] %vm348_vm15, %v813_v10 }
0x131e   :  { %819 = vst.msk [vmem:[#allocation4 - $0x4] sm:$0xc0] %vm353_vm12, %v817_v11 }
0x131f   :  { %821 = vst.msk [vmem:[#allocation2 - $0x6] sm:$0xc0] %vm353_vm12, %v817_v11 }
0x1320   :  { %913 = vst.msk [vmem:[#allocation4] sm:$0xf] %vm2367_vm2, %v1973_v9 }
0x1324   :  { %v823_v12 = vld [vmem:[#allocation2 + $0x8] sm:$0xff] }
0x1326   :  { %v822_v22 = vld [vmem:[#allocation2] sm:$0xff] }
0x1327   :  { %1712 = vmatmul.msk.f32.vlgmr.msrb.gmra.mxu2 %vm56_vm0, %v822_v22  ;;  %v914_v25 = vld [vmem:[#allocation4] sm:$0xf] }
0x1328   :  { %1714 = vmatmul.msk.f32.vlgmr.msrb.gmra.mxu3 %vm56_vm0, %v914_v25 }
0x1329   :  { %1468 = vmatpush.msrb.mxu3 %v831_v5 }
0x132b   :  { %1469 = vmatpush.msrb.mxu3 %v830_v6 }
0x132d   :  { %1470 = vmatpush.msrb.mxu3 %v829_v7 }
0x132f   :  { %1713 = vmatmul.msk.f32.gmra.mxu2 %vm56_vm0, %v823_v12  ;;  %1471 = vmatpush.msrb.mxu3 %v828_v8 }
0x13aa   :  { %v857_v21 = vpop.f32.mrf.mxu2 }
0x13ab   :  { %v2202_v17 = vadd.f32 %v1752_v14, %v857_v21  ;;  %v935_v20 = vpop.f32.mrf.mxu3 }
0x13ad   :  { %v869_v19 = vrot.slane %v2202_v17, 6 }
0x13b2   :  { %v860_v13 = vpop.f32.mrf.mxu2 }
0x13b3   :  { %v2204_v26 = vadd.f32 %v1752_v14, %v860_v13 }
0x13b5   :  { %v871_v9 = vrot.slane %v2204_v26, 6  ;;  %v864_v15 = vrot.slane %v2204_v26, 4  ;;  %v882_v13 = vrot.slane %v2204_v26, 2 }
0x13b7   :  { %872 = vrot.lane.b32.xlu0 %v871_v9, %s1974_s0  ;;  %865 = vrot.lane.b32.xlu2 %v864_v15, %s1974_s0 }
0x1411   :  { %v866_v16 = vpop.permute.xlu2 %865 }
0x1412   :  { %v901_v18 = vsel %vm132_vm3, %v2202_v17, %v866_v16 }
0x1413   :  { %v902_v24 = vsel %vm136_vm5, %v901_v18, %v869_v19 }
0x1429   :  { %v873_v23 = vpop.permute.xlu0 %872 }
0x142a   :  { %v903_v27 = vsel %vm140_vm7, %v902_v24, %v873_v23  ;;  %v875_v24 = vrot.slane %v2202_v17, 4 }
0x142b   :  { %v938_v28 = vadd.f32 %v935_v20, %v903_v27 }
0x142d   :  { %1819 = vtanh.f32 %v938_v28  ;;  %v1715_v32 = vmul.f32 -1.442695, %v938_v28 }
0x142f   :  { %1821 = vpow2.f32 %v1715_v32 }
0x1433   :  { %v1820_v29 = vpop.eup %1819 }
0x1434   :  { %961 = vrot.lane.b32.xlu1 %v1820_v29, %s1975_s1  ;;  %v880_v29 = vrot.slane %v2202_v17, 2 }
0x1435   :  { %v1822_v33 = vpop.eup %1821 }
0x1436   :  { %v942_v34 = vadd.f32 1.0, %v1822_v33 }
0x1438   :  { %1823 = vrcp.f32 %v942_v34  ;;  %v954_v42 = vand.u32 2147483648, %v942_v34  ;;  %vm948_vm6 = vweird.f32 %v942_v34  ;;  %v952_v43 = vand.u32 2147483647, %v942_v34 }
0x143a   :  { %v955_v45 = vor.u32 1.1754944e-38, %v954_v42  ;;  %vm953_vm1 = vcmp.eq.f32.partialorder %v952_v43, 8.507059e+37 }
0x143e   :  { %v1824_v35 = vpop.eup %1823 }
0x143f   :  { %v944_v36 = vmul.f32 %v1824_v35, %v942_v34  ;;  %vm949_vm4 = vweird.f32 %v1824_v35 }
0x1440   :  { %vm950_vm8 = vmor %vm948_vm6, %vm949_vm4 }
0x1441   :  { %v945_v38 = vsub.f32 1.0, %v944_v36 }
0x1443   :  { %v946_v40 = vmul.f32 %v1824_v35, %v945_v38 }
0x1445   :  { %v947_v41 = vadd.f32 %v1824_v35, %v946_v40 }
0x1447   :  { %v951_v44 = vsel %vm950_vm8, %v1824_v35, %v947_v41 }
0x1448   :  { %v956_v47 = vsel %vm953_vm1, %v955_v45, %v951_v44 }
0x1449   :  { %v959_v49 = vmul.f32 0.0, %v956_v47 }
0x14a6   :  { %v962_v46 = vpop.permute.xlu1 %961 }
0x14a7   :  { %v964_v48 = vmul.f32 %v962_v46, %v956_v47 }
0x14a9   :  { %966 = vrot.lane.b32.xlu2 %v964_v48, %s1976_s21 }
0x1503   :  { %v967_v50 = vpop.permute.xlu2 %966 }
0x1504   :  { %v969_v51 = vadd.f32 %v967_v50, %v959_v49 }
0x1506   :  { %1825 = vtanh.f32 %v969_v51  ;;  %v1036_v10 = vrot.slane %v969_v51, 4 }
0x150c   :  { %v1826_v52 = vpop.eup %1825 }
0x150d   :  { %972 = vrot.lane.b32.xlu0 %v1826_v52, %s1976_s21 }
0x157f   :  { %v973_v53 = vpop.permute.xlu0 %972 }
0x1580   :  { %v975_v54 = vmul.f32 %v973_v53, %v956_v47 }
0x1582   :  { %981 = vrot.lane.b32.xlu2 %v975_v54, %s1977_s22  ;;  %977 = vrot.lane.b32.xlu1 %v975_v54, %s1978_s23 }
0x15dc   :  { %v982_v55 = vpop.permute.xlu2 %981 }
0x15dd   :  { %984 = vst.msk [vmem:[#allocation4] sm:$0xc] %vm272_vm13, %v982_v55 }
0x15de   :  { %986 = vst.msk [vmem:[#allocation3 + $0xc] sm:$0xc] %vm272_vm13, %v982_v55 }
0x15f4   :  { %v978_v56 = vpop.permute.xlu1 %977 }
0x15f5   :  { %980 = vst.msk [vmem:[#allocation4] sm:$0x3] %vm267_vm14, %v978_v56 }
0x15f6   :  { %985 = vst.msk [vmem:[#allocation3] sm:$0x3] %vm267_vm14, %v978_v56 }
0x15fc   :  { %v987_v57 = vld [vmem:[#allocation4] sm:$0xf] }
0x15fd   :  { %1716 = vmatmul.msk.f32.vlgmr.msra.gmra.mxu0 %vm56_vm0, %v987_v57 }
0x167a   :  { %v1008_v58 = vpop.f32.mrf.mxu0 }
0x167b   :  { %v1012_v59 = vrot.slane %v1008_v58, 4 }
0x167d   :  { %v1014_v60 = vadd.f32 %v1012_v59, %v903_v27 }
0x167f   :  { %1827 = vtanh.f32 %v1014_v60  ;;  %v1717_v62 = vmul.f32 -1.442695, %v1014_v60 }
0x1681   :  { %1829 = vpow2.f32 %v1717_v62 }
0x1685   :  { %v1828_v61 = vpop.eup %1827 }
0x1686   :  { %1040 = vrot.lane.b32.xlu0 %v1828_v61, %s1975_s1 }
0x1687   :  { %v1830_v63 = vpop.eup %1829 }
0x1688   :  { %v1018_v0 = vadd.f32 1.0, %v1830_v63 }
0x168a   :  { %1831 = vrcp.f32 %v1018_v0  ;;  %v1030_v39 = vand.u32 2147483648, %v1018_v0  ;;  %vm1024_vm10 = vweird.f32 %v1018_v0  ;;  %v1028_v3 = vand.u32 2147483647, %v1018_v0 }
0x168c   :  { %v1031_v5 = vor.u32 1.1754944e-38, %v1030_v39  ;;  %vm1029_vm2 = vcmp.eq.f32.partialorder %v1028_v3, 8.507059e+37 }
0x1690   :  { %v1832_v30 = vpop.eup %1831 }
0x1691   :  { %v1020_v37 = vmul.f32 %v1832_v30, %v1018_v0  ;;  %vm1025_vm9 = vweird.f32 %v1832_v30 }
0x1692   :  { %vm1026_vm11 = vmor %vm1024_vm10, %vm1025_vm9 }
0x1693   :  { %v1021_v1 = vsub.f32 1.0, %v1020_v37 }
0x1695   :  { %v1022_v2 = vmul.f32 %v1832_v30, %v1021_v1 }
0x1697   :  { %v1023_v31 = vadd.f32 %v1832_v30, %v1022_v2 }
0x1699   :  { %v1027_v4 = vsel %vm1026_vm11, %v1832_v30, %v1023_v31 }
0x169a   :  { %v1032_v7 = vsel %vm1029_vm2, %v1031_v5, %v1027_v4 }
0x169b   :  { %v1038_v11 = vmul.f32 %v1036_v10, %v1032_v7 }
0x16f8   :  { %v1041_v6 = vpop.permute.xlu0 %1040 }
0x16f9   :  { %v1043_v8 = vmul.f32 %v1041_v6, %v1032_v7 }
0x16fb   :  { %1045 = vrot.lane.b32.xlu1 %v1043_v8, %s1976_s21 }
0x176d   :  { %v1046_v22 = vpop.permute.xlu1 %1045 }
0x176e   :  { %v1048_v25 = vadd.f32 %v1046_v22, %v1038_v11 }
0x1770   :  { %1833 = vtanh.f32 %v1048_v25  ;;  %v1112_v54 = vrot.slane %v1048_v25, 4 }
0x1776   :  { %v1834_v12 = vpop.eup %1833 }
0x1777   :  { %1051 = vrot.lane.b32.xlu2 %v1834_v12, %s1976_s21 }
0x177f   :  { %877 = vrot.lane.b32.xlu2 %v2204_v26, %s1974_s0 }
0x17d1   :  { %v1052_v14 = vpop.permute.xlu2 %1051 }
0x17d2   :  { %v1054_v21 = vmul.f32 %v1052_v14, %v1032_v7 }
0x17d4   :  { %1060 = vrot.lane.b32.xlu1 %v1054_v21, %s1977_s22  ;;  %1056 = vrot.lane.b32.xlu0 %v1054_v21, %s1978_s23 }
0x17d9   :  { %v878_v23 = vpop.permute.xlu2 %877 }
0x17da   :  { %v904_v27 = vsel %vm132_vm3, %v875_v24, %v878_v23 }
0x17db   :  { %v905_v32 = vsel %vm136_vm5, %v904_v27, %v880_v29 }
0x17dc   :  { %883 = vrot.lane.b32.xlu0 %v882_v13, %s1974_s0 }
0x1846   :  { %v1061_v16 = vpop.permute.xlu1 %1060  ;;  %v1057_v18 = vpop.permute.xlu0 %1056 }
0x1847   :  { %1063 = vst.msk [vmem:[#allocation4 - $0x4] sm:$0xc0] %vm353_vm12, %v1061_v16 }
0x1848   :  { %1065 = vst.msk [vmem:[#allocation3 + $0x6] sm:$0xc0] %vm353_vm12, %v1061_v16 }
0x1849   :  { %1059 = vst.msk [vmem:[#allocation4 - $0x4] sm:$0x30] %vm348_vm15, %v1057_v18 }
0x184a   :  { %1064 = vst.msk [vmem:[#allocation3 - $0x2] sm:$0x30] %vm348_vm15, %v1057_v18 }
0x184e   :  { %v884_v28 = vpop.permute.xlu0 %883 }
0x184f   :  { %v906_v33 = vsel %vm140_vm7, %v905_v32, %v884_v28 }
0x1850   :  { %v1066_v20 = vld [vmem:[#allocation4] sm:$0xf] }
0x1851   :  { %1718 = vmatmul.msk.f32.vlgmr.msra.gmra.mxu1 %vm56_vm0, %v1066_v20 }
0x18ce   :  { %v1087_v34 = vpop.f32.mrf.mxu1 }
0x18cf   :  { %v1090_v35 = vadd.f32 %v1087_v34, %v906_v33 }
0x18d1   :  { %1835 = vtanh.f32 %v1090_v35  ;;  %v1719_v38 = vmul.f32 -1.442695, %v1090_v35 }
0x18d3   :  { %1837 = vpow2.f32 %v1719_v38 }
0x18d7   :  { %v1836_v36 = vpop.eup %1835 }
0x18d8   :  { %1116 = vrot.lane.b32.xlu1 %v1836_v36, %s1975_s1 }
0x18d9   :  { %v1838_v40 = vpop.eup %1837 }
0x18da   :  { %v1094_v41 = vadd.f32 1.0, %v1838_v40 }
0x18dc   :  { %1839 = vrcp.f32 %v1094_v41  ;;  %v1106_v47 = vand.u32 2147483648, %v1094_v41  ;;  %vm1100_vm6 = vweird.f32 %v1094_v41  ;;  %v1104_v48 = vand.u32 2147483647, %v1094_v41 }
0x18de   :  { %v1107_v50 = vor.u32 1.1754944e-38, %v1106_v47  ;;  %vm1105_vm1 = vcmp.eq.f32.partialorder %v1104_v48, 8.507059e+37 }
0x18e2   :  { %v1840_v42 = vpop.eup %1839 }
0x18e3   :  { %v1096_v43 = vmul.f32 %v1840_v42, %v1094_v41  ;;  %vm1101_vm4 = vweird.f32 %v1840_v42 }
0x18e4   :  { %vm1102_vm8 = vmor %vm1100_vm6, %vm1101_vm4 }
0x18e5   :  { %v1097_v44 = vsub.f32 1.0, %v1096_v43 }
0x18e7   :  { %v1098_v45 = vmul.f32 %v1840_v42, %v1097_v44 }
0x18e9   :  { %v1099_v46 = vadd.f32 %v1840_v42, %v1098_v45 }
0x18eb   :  { %v1103_v49 = vsel %vm1102_vm8, %v1840_v42, %v1099_v46 }
0x18ec   :  { %v1108_v52 = vsel %vm1105_vm1, %v1107_v50, %v1103_v49 }
0x18ed   :  { %v1114_v55 = vmul.f32 %v1112_v54, %v1108_v52 }
0x194a   :  { %v1117_v51 = vpop.permute.xlu1 %1116 }
0x194b   :  { %v1119_v53 = vmul.f32 %v1117_v51, %v1108_v52 }
0x194d   :  { %1121 = vrot.lane.b32.xlu2 %v1119_v53, %s1976_s21 }
0x19a7   :  { %v1122_v56 = vpop.permute.xlu2 %1121 }
0x19a8   :  { %v1124_v57 = vadd.f32 %v1122_v56, %v1114_v55 }
0x19aa   :  { %1841 = vtanh.f32 %v1124_v57  ;;  %v1191_v21 = vrot.slane %v1124_v57, 4 }
0x19b0   :  { %v1842_v58 = vpop.eup %1841 }
0x19b1   :  { %1127 = vrot.lane.b32.xlu0 %v1842_v58, %s1976_s21 }
0x1a23   :  { %v1128_v59 = vpop.permute.xlu0 %1127 }
0x1a24   :  { %v1130_v60 = vmul.f32 %v1128_v59, %v1108_v52 }
0x1a26   :  { %1136 = vrot.lane.b32.xlu2 %v1130_v60, %s1977_s22  ;;  %1132 = vrot.lane.b32.xlu1 %v1130_v60, %s1978_s23 }
0x1a80   :  { %v1137_v61 = vpop.permute.xlu2 %1136 }
0x1a81   :  { %1139 = vst.msk [vmem:[#allocation4] sm:$0xc] %vm272_vm13, %v1137_v61 }
0x1a82   :  { %1141 = vst.msk [vmem:[#allocation3 + $0x8] sm:$0xc] %vm272_vm13, %v1137_v61 }
0x1a98   :  { %v1133_v62 = vpop.permute.xlu1 %1132 }
0x1a99   :  { %1135 = vst.msk [vmem:[#allocation4] sm:$0x3] %vm267_vm14, %v1133_v62 }
0x1a9a   :  { %1140 = vst.msk [vmem:[#allocation3 + $0x4] sm:$0x3] %vm267_vm14, %v1133_v62 }
0x1aa0   :  { %v1142_v63 = vld [vmem:[#allocation4] sm:$0xf] }
0x1aa1   :  { %1720 = vmatmul.msk.f32.vlgmr.msra.gmra.mxu3 %vm56_vm0, %v1142_v63 }
0x1b24   :  { %v1163_v0 = vpop.f32.mrf.mxu3 }
0x1b25   :  { %v1167_v30 = vrot.slane %v1163_v0, 4 }
0x1b27   :  { %v1169_v37 = vadd.f32 %v1167_v30, %v906_v33 }
0x1b29   :  { %1843 = vtanh.f32 %v1169_v37  ;;  %v1721_v2 = vmul.f32 -1.442695, %v1169_v37 }
0x1b2b   :  { %1845 = vpow2.f32 %v1721_v2 }
0x1b2f   :  { %v1844_v1 = vpop.eup %1843 }
0x1b30   :  { %1195 = vrot.lane.b32.xlu0 %v1844_v1, %s1975_s1 }
0x1b31   :  { %v1846_v31 = vpop.eup %1845 }
0x1b32   :  { %v1173_v39 = vadd.f32 1.0, %v1846_v31 }
0x1b34   :  { %1847 = vrcp.f32 %v1173_v39  ;;  %v1185_v8 = vand.u32 2147483648, %v1173_v39  ;;  %vm1179_vm10 = vweird.f32 %v1173_v39  ;;  %v1183_v10 = vand.u32 2147483647, %v1173_v39 }
0x1b36   :  { %v1186_v22 = vor.u32 1.1754944e-38, %v1185_v8  ;;  %vm1184_vm2 = vcmp.eq.f32.partialorder %v1183_v10, 8.507059e+37 }
0x1b3a   :  { %v1848_v3 = vpop.eup %1847 }
0x1b3b   :  { %v1175_v4 = vmul.f32 %v1848_v3, %v1173_v39  ;;  %vm1180_vm9 = vweird.f32 %v1848_v3 }
0x1b3c   :  { %vm1181_vm11 = vmor %vm1179_vm10, %vm1180_vm9 }
0x1b3d   :  { %v1176_v5 = vsub.f32 1.0, %v1175_v4 }
0x1b3f   :  { %v1177_v6 = vmul.f32 %v1848_v3, %v1176_v5 }
0x1b41   :  { %v1178_v7 = vadd.f32 %v1848_v3, %v1177_v6 }
0x1b43   :  { %v1182_v11 = vsel %vm1181_vm11, %v1848_v3, %v1178_v7 }
0x1b44   :  { %v1187_v12 = vsel %vm1184_vm2, %v1186_v22, %v1182_v11 }
0x1b45   :  { %v1193_v16 = vmul.f32 %v1191_v21, %v1187_v12 }
0x1ba2   :  { %v1196_v25 = vpop.permute.xlu0 %1195 }
0x1ba3   :  { %v1198_v14 = vmul.f32 %v1196_v25, %v1187_v12 }
0x1ba5   :  { %1200 = vrot.lane.b32.xlu1 %v1198_v14, %s1976_s21 }
0x1c17   :  { %v1201_v18 = vpop.permute.xlu1 %1200 }
0x1c18   :  { %v1203_v20 = vadd.f32 %v1201_v18, %v1193_v16 }
0x1c1a   :  { %1849 = vtanh.f32 %v1203_v20  ;;  %v1267_v57 = vrot.slane %v1203_v20, 4 }
0x1c20   :  { %v1850_v23 = vpop.eup %1849 }
0x1c21   :  { %1206 = vrot.lane.b32.xlu2 %v1850_v23, %s1976_s21 }
0x1c29   :  { %886 = vrot.lane.b32.xlu2 %v875_v24, %s1974_s0 }
0x1c7b   :  { %v1207_v27 = vpop.permute.xlu2 %1206 }
0x1c7c   :  { %v1209_v28 = vmul.f32 %v1207_v27, %v1187_v12 }
0x1c7e   :  { %1215 = vrot.lane.b32.xlu1 %v1209_v28, %s1977_s22  ;;  %1211 = vrot.lane.b32.xlu0 %v1209_v28, %s1978_s23 }
0x1c83   :  { %v887_v34 = vpop.permute.xlu2 %886 }
0x1c84   :  { %v907_v35 = vsel %vm132_vm3, %v2204_v26, %v887_v34 }
0x1c86   :  { %890 = vrot.lane.b32.xlu0 %v869_v19, %s1974_s0  ;;  %v908_v19 = vsel %vm136_vm5, %v907_v35, %v871_v9 }
0x1cf0   :  { %v1216_v32 = vpop.permute.xlu1 %1215  ;;  %v1212_v33 = vpop.permute.xlu0 %1211 }
0x1cf1   :  { %1220 = vst.msk [vmem:[#allocation3 + $0x2] sm:$0xc0] %vm353_vm12, %v1216_v32 }
0x1cf2   :  { %1218 = vst.msk [vmem:[#allocation4 - $0x4] sm:$0xc0] %vm353_vm12, %v1216_v32 }
0x1cf3   :  { %1219 = vst.msk [vmem:[#allocation3 + $0x2] sm:$0x30] %vm348_vm15, %v1212_v33 }
0x1cf4   :  { %1214 = vst.msk [vmem:[#allocation4 - $0x4] sm:$0x30] %vm348_vm15, %v1212_v33 }
0x1cf8   :  { %v891_v36 = vpop.permute.xlu0 %890 }
0x1cf9   :  { %v909_v38 = vsel %vm140_vm7, %v908_v19, %v891_v36 }
0x1cfb   :  { %v1221_v24 = vld [vmem:[#allocation4] sm:$0xf] }
0x1cfc   :  { %1722 = vmatmul.msk.f32.vlgmr.msrb.gmra.mxu0 %vm56_vm0, %v1221_v24 }
0x1d79   :  { %v1242_v40 = vpop.f32.mrf.mxu0 }
0x1d7a   :  { %v1245_v41 = vadd.f32 %v1242_v40, %v909_v38 }
0x1d7c   :  { %1851 = vtanh.f32 %v1245_v41  ;;  %v1723_v43 = vmul.f32 -1.442695, %v1245_v41 }
0x1d7e   :  { %1853 = vpow2.f32 %v1723_v43 }
0x1d82   :  { %v1852_v42 = vpop.eup %1851 }
0x1d83   :  { %1271 = vrot.lane.b32.xlu1 %v1852_v42, %s1975_s1 }
0x1d84   :  { %v1854_v44 = vpop.eup %1853 }
0x1d85   :  { %v1249_v45 = vadd.f32 1.0, %v1854_v44 }
0x1d87   :  { %1855 = vrcp.f32 %v1249_v45  ;;  %v1261_v9 = vand.u32 2147483648, %v1249_v45  ;;  %vm1255_vm6 = vweird.f32 %v1249_v45  ;;  %v1259_v51 = vand.u32 2147483647, %v1249_v45 }
0x1d89   :  { %v1262_v53 = vor.u32 1.1754944e-38, %v1261_v9  ;;  %vm1260_vm1 = vcmp.eq.f32.partialorder %v1259_v51, 8.507059e+37 }
0x1d8d   :  { %v1856_v46 = vpop.eup %1855 }
0x1d8e   :  { %v1251_v47 = vmul.f32 %v1856_v46, %v1249_v45  ;;  %vm1256_vm4 = vweird.f32 %v1856_v46 }
0x1d8f   :  { %vm1257_vm8 = vmor %vm1255_vm6, %vm1256_vm4 }
0x1d90   :  { %v1252_v48 = vsub.f32 1.0, %v1251_v47 }
0x1d92   :  { %v1253_v49 = vmul.f32 %v1856_v46, %v1252_v48 }
0x1d94   :  { %v1254_v50 = vadd.f32 %v1856_v46, %v1253_v49 }
0x1d96   :  { %v1258_v52 = vsel %vm1257_vm8, %v1856_v46, %v1254_v50 }
0x1d97   :  { %v1263_v55 = vsel %vm1260_vm1, %v1262_v53, %v1258_v52  ;;  %vm1582_vm1 = vcmask 392192  }
0x1d98   :  { %v1269_v58 = vmul.f32 %v1267_v57, %v1263_v55 }
0x1df5   :  { %v1272_v54 = vpop.permute.xlu1 %1271 }
0x1df6   :  { %v1274_v56 = vmul.f32 %v1272_v54, %v1263_v55 }
0x1df8   :  { %1276 = vrot.lane.b32.xlu2 %v1274_v56, %s1976_s21 }
0x1e52   :  { %v1277_v59 = vpop.permute.xlu2 %1276 }
0x1e53   :  { %v1279_v60 = vadd.f32 %v1277_v59, %v1269_v58 }
0x1e55   :  { %1857 = vtanh.f32 %v1279_v60  ;;  %v1346_v20 = vrot.slane %v1279_v60, 4 }
0x1e5b   :  { %v1858_v61 = vpop.eup %1857 }
0x1e5c   :  { %1282 = vrot.lane.b32.xlu0 %v1858_v61, %s1976_s21 }
0x1ece   :  { %v1283_v62 = vpop.permute.xlu0 %1282 }
0x1ecf   :  { %v1285_v63 = vmul.f32 %v1283_v62, %v1263_v55 }
0x1ed1   :  { %1291 = vrot.lane.b32.xlu2 %v1285_v63, %s1977_s22  ;;  %1287 = vrot.lane.b32.xlu1 %v1285_v63, %s1978_s23 }
0x1f2b   :  { %v1292_v0 = vpop.permute.xlu2 %1291 }
0x1f2c   :  { %1296 = vst.msk [vmem:[#allocation3 + $0x4] sm:$0xc] %vm272_vm13, %v1292_v0 }
0x1f2d   :  { %1294 = vst.msk [vmem:[#allocation4] sm:$0xc] %vm272_vm13, %v1292_v0 }
0x1f43   :  { %v1288_v30 = vpop.permute.xlu1 %1287 }
0x1f44   :  { %1295 = vst.msk [vmem:[#allocation3 + $0x8] sm:$0x3] %vm267_vm14, %v1288_v30 }
0x1f45   :  { %1290 = vst.msk [vmem:[#allocation4] sm:$0x3] %vm267_vm14, %v1288_v30 }
0x1f4c   :  { %v1297_v37 = vld [vmem:[#allocation4] sm:$0xf] }
0x1f4d   :  { %1724 = vmatmul.msk.f32.vlgmr.msrb.gmra.mxu1 %vm56_vm0, %v1297_v37 }
0x1fca   :  { %v1318_v1 = vpop.f32.mrf.mxu1 }
0x1fcb   :  { %v1322_v2 = vrot.slane %v1318_v1, 4 }
0x1fcd   :  { %v1324_v31 = vadd.f32 %v1322_v2, %v909_v38 }
0x1fcf   :  { %1859 = vtanh.f32 %v1324_v31  ;;  %v1725_v3 = vmul.f32 -1.442695, %v1324_v31 }
0x1fd1   :  { %1861 = vpow2.f32 %v1725_v3 }
0x1fd5   :  { %v1860_v39 = vpop.eup %1859 }
0x1fd6   :  { %1350 = vrot.lane.b32.xlu0 %v1860_v39, %s1975_s1 }
0x1fd7   :  { %v1862_v4 = vpop.eup %1861 }
0x1fd8   :  { %v1328_v5 = vadd.f32 1.0, %v1862_v4 }
0x1fda   :  { %1863 = vrcp.f32 %v1328_v5  ;;  %v1340_v22 = vand.u32 2147483648, %v1328_v5  ;;  %vm1334_vm10 = vweird.f32 %v1328_v5  ;;  %v1338_v25 = vand.u32 2147483647, %v1328_v5 }
0x1fdc   :  { %v1341_v14 = vor.u32 1.1754944e-38, %v1340_v22  ;;  %vm1339_vm2 = vcmp.eq.f32.partialorder %v1338_v25, 8.507059e+37 }
0x1fe0   :  { %v1864_v6 = vpop.eup %1863 }
0x1fe1   :  { %v1330_v7 = vmul.f32 %v1864_v6, %v1328_v5  ;;  %vm1335_vm9 = vweird.f32 %v1864_v6 }
0x1fe2   :  { %vm1336_vm11 = vmor %vm1334_vm10, %vm1335_vm9 }
0x1fe3   :  { %v1331_v8 = vsub.f32 1.0, %v1330_v7 }
0x1fe5   :  { %v1332_v10 = vmul.f32 %v1864_v6, %v1331_v8 }
0x1fe7   :  { %v1333_v11 = vadd.f32 %v1864_v6, %v1332_v10 }
0x1fe9   :  { %v1337_v12 = vsel %vm1336_vm11, %v1864_v6, %v1333_v11  ;;  %vm1650_vm11 = vcmask 253952  }
0x1fea   :  { %v1342_v16 = vsel %vm1339_vm2, %v1341_v14, %v1337_v12 }
0x1feb   :  { %v1348_v23 = vmul.f32 %v1346_v20, %v1342_v16 }
0x2048   :  { %v1351_v21 = vpop.permute.xlu0 %1350 }
0x2049   :  { %v1353_v18 = vmul.f32 %v1351_v21, %v1342_v16 }
0x204b   :  { %1355 = vrot.lane.b32.xlu1 %v1353_v18, %s1976_s21 }
0x20bd   :  { %v1356_v27 = vpop.permute.xlu1 %1355 }
0x20be   :  { %v1358_v28 = vadd.f32 %v1356_v27, %v1348_v23 }
0x20c0   :  { %1865 = vtanh.f32 %v1358_v28  ;;  %v1422_v55 = vrot.slane %v1358_v28, 4 }
0x20c6   :  { %v1866_v32 = vpop.eup %1865 }
0x20c7   :  { %1361 = vrot.lane.b32.xlu2 %v1866_v32, %s1976_s21 }
0x20cf   :  { %894 = vrot.lane.b32.xlu2 %v2202_v17, %s1974_s0 }
0x2121   :  { %v1362_v33 = vpop.permute.xlu2 %1361 }
0x2122   :  { %v1364_v24 = vmul.f32 %v1362_v33, %v1342_v16  ;;  %v1536_v33 = vld [vmem:[#allocation8 + $0xa8] sm:$0xff] }
0x2123   :  { %1557 = vmatpush.msra.mxu0 %v1536_v33 }
0x2124   :  { %1370 = vrot.lane.b32.xlu1 %v1364_v24, %s1977_s22  ;;  %1366 = vrot.lane.b32.xlu0 %v1364_v24, %s1978_s23  ;;  %v1535_v24 = vld [vmem:[#allocation8 + $0xa0] sm:$0xff] }
0x2125   :  { %1558 = vmatpush.msra.mxu0 %v1535_v24 }
0x2129   :  { %v895_v19 = vpop.permute.xlu2 %894 }
0x212a   :  { %v910_v38 = vsel %vm132_vm3, %v864_v15, %v895_v19  ;;  %v1578_v19 = vld [vmem:[#allocation8 + $0xd8] sm:$0xff] }
0x212c   :  { %898 = vrot.lane.b32.xlu0 %v880_v29, %s1974_s0  ;;  %v911_v29 = vsel %vm136_vm5, %v910_v38, %v882_v13  ;;  %v1577_v38 = vld [vmem:[#allocation8 + $0xd0] sm:$0xff] }
0x2196   :  { %v1371_v34 = vpop.permute.xlu1 %1370  ;;  %v1367_v35 = vpop.permute.xlu0 %1366 }
0x2197   :  { %1375 = vst.msk [vmem:[#allocation3 - $0x2] sm:$0xc0] %vm353_vm12, %v1371_v34 }
0x2198   :  { %1373 = vst.msk [vmem:[#allocation4 - $0x4] sm:$0xc0] %vm353_vm12, %v1371_v34  ;;  %v1534_v34 = vld [vmem:[#allocation8 + $0x98] sm:$0xff] }
0x2199   :  { %1374 = vst.msk [vmem:[#allocation3 + $0x6] sm:$0x30] %vm348_vm15, %v1367_v35  ;;  %1559 = vmatpush.msra.mxu0 %v1534_v34 }
0x219a   :  { %1369 = vst.msk [vmem:[#allocation4 - $0x4] sm:$0x30] %vm348_vm15, %v1367_v35  ;;  %v1533_v35 = vld [vmem:[#allocation8 + $0x90] sm:$0xff] }
0x219b   :  { %1560 = vmatpush.msra.mxu0 %v1533_v35 }
0x219e   :  { %v899_v17 = vpop.permute.xlu0 %898 }
0x219f   :  { %v912_v40 = vsel %vm140_vm7, %v911_v29, %v899_v17 }
0x21a1   :  { %v1376_v36 = vld [vmem:[#allocation4] sm:$0xf] }
0x21a2   :  { %1726 = vmatmul.msk.f32.vlgmr.msra.gmra.mxu2 %vm56_vm0, %v1376_v36  ;;  %v1579_v36 = vld [vmem:[#allocation8 + $0xe0] sm:$0xff] }
0x21a3   :  { %1599 = vmatpush.msra.mxu1 %v1579_v36 }
0x21a5   :  { %1600 = vmatpush.msra.mxu1 %v1578_v19 }
0x21a7   :  { %1601 = vmatpush.msra.mxu1 %v1577_v38 }
0x2225   :  { %v1397_v41 = vpop.f32.mrf.mxu2 }
0x2226   :  { %v1400_v42 = vadd.f32 %v1397_v41, %v912_v40 }
0x2228   :  { %1867 = vtanh.f32 %v1400_v42  ;;  %v1727_v44 = vmul.f32 -1.442695, %v1400_v42  ;;  %v1576_v42 = vld [vmem:[#allocation8 + $0xc8] sm:$0xff] }
0x2229   :  { %1602 = vmatpush.msra.mxu1 %v1576_v42 }
0x222a   :  { %1869 = vpow2.f32 %v1727_v44  ;;  %v1574_v44 = vld [vmem:[#allocation8 + $0xb8] sm:$0xff] }
0x222e   :  { %v1868_v43 = vpop.eup %1867 }
0x222f   :  { %1426 = vrot.lane.b32.xlu1 %v1868_v43, %s1975_s1  ;;  %v1575_v43 = vld [vmem:[#allocation8 + $0xc0] sm:$0xff] }
0x2230   :  { %v1870_v45 = vpop.eup %1869  ;;  %1603 = vmatpush.msra.mxu1 %v1575_v43 }
0x2231   :  { %v1404_v46 = vadd.f32 1.0, %v1870_v45  ;;  %v1753_v45 = vld [vmem:[#allocation8 + $0xb0] ss:$0 sm:$0xff] }
0x2232   :  { %1604 = vmatpush.msra.mxu1 %v1574_v44 }
0x2233   :  { %1871 = vrcp.f32 %v1404_v46  ;;  %v1416_v13 = vand.u32 2147483648, %v1404_v46  ;;  %vm1410_vm5 = vweird.f32 %v1404_v46  ;;  %v1414_v50 = vand.u32 2147483647, %v1404_v46 }
0x2235   :  { %v1417_v51 = vor.u32 1.1754944e-38, %v1416_v13  ;;  %vm1415_vm4 = vcmp.eq.f32.partialorder %v1414_v50, 8.507059e+37 }
0x2239   :  { %v1872_v47 = vpop.eup %1871 }
0x223a   :  { %v1406_v15 = vmul.f32 %v1872_v47, %v1404_v46  ;;  %vm1411_vm3 = vweird.f32 %v1872_v47 }
0x223b   :  { %vm1412_vm7 = vmor %vm1410_vm5, %vm1411_vm3  ;;  %vm1652_vm3 = vcmask 256002   ;;  %vm1654_vm5 = vcmask 258052  }
0x223c   :  { %v1407_v48 = vsub.f32 1.0, %v1406_v15 }
0x223e   :  { %v1408_v49 = vmul.f32 %v1872_v47, %v1407_v48 }
0x2240   :  { %v1409_v26 = vadd.f32 %v1872_v47, %v1408_v49 }
0x2242   :  { %v1413_v9 = vsel %vm1412_vm7, %v1872_v47, %v1409_v26  ;;  %vm1656_vm7 = vcmask 260102  }
0x2243   :  { %v1418_v53 = vsel %vm1415_vm4, %v1417_v51, %v1413_v9  ;;  %v1754_v9 = vld [vmem:[#allocation8 + $0xe8] ss:$0 sm:$0xff]  ;;  %vm1662_vm4 = vcmask 254977  }
0x2244   :  { %v1424_v56 = vmul.f32 %v1422_v55, %v1418_v53 }
0x22a1   :  { %v1427_v52 = vpop.permute.xlu1 %1426 }
0x22a2   :  { %v1429_v54 = vmul.f32 %v1427_v52, %v1418_v53 }
0x22a4   :  { %1431 = vrot.lane.b32.xlu2 %v1429_v54, %s1976_s21 }
0x22fe   :  { %v1432_v57 = vpop.permute.xlu2 %1431 }
0x22ff   :  { %v1434_v58 = vadd.f32 %v1432_v57, %v1424_v56 }
0x2301   :  { %1873 = vtanh.f32 %v1434_v58  ;;  %v1501_v16 = vrot.slane %v1434_v58, 4 }
0x2307   :  { %v1874_v59 = vpop.eup %1873 }
0x2308   :  { %1437 = vrot.lane.b32.xlu0 %v1874_v59, %s1976_s21 }
0x237a   :  { %v1438_v60 = vpop.permute.xlu0 %1437 }
0x237b   :  { %v1440_v61 = vmul.f32 %v1438_v60, %v1418_v53 }
0x237d   :  { %1446 = vrot.lane.b32.xlu2 %v1440_v61, %s1977_s22  ;;  %1442 = vrot.lane.b32.xlu1 %v1440_v61, %s1978_s23 }
0x23d7   :  { %v1447_v62 = vpop.permute.xlu2 %1446 }
0x23d8   :  { %1451 = vst.msk [vmem:[#allocation3] sm:$0xc] %vm272_vm13, %v1447_v62 }
0x23d9   :  { %1449 = vst.msk [vmem:[#allocation4] sm:$0xc] %vm272_vm13, %v1447_v62 }
0x23ef   :  { %v1443_v63 = vpop.permute.xlu1 %1442 }
0x23f0   :  { %1450 = vst.msk [vmem:[#allocation3 + $0xc] sm:$0x3] %vm267_vm14, %v1443_v63 }
0x23f1   :  { %1445 = vst.msk [vmem:[#allocation4] sm:$0x3] %vm267_vm14, %v1443_v63 }
0x23f8   :  { %v1452_v0 = vld [vmem:[#allocation4] sm:$0xf] }
0x23f9   :  { %1728 = vmatmul.msk.f32.vlgmr.msrb.gmra.mxu3 %vm56_vm0, %v1452_v0 }
0x247c   :  { %v1473_v30 = vpop.f32.mrf.mxu3 }
0x247d   :  { %v1477_v37 = vrot.slane %v1473_v30, 4 }
0x247f   :  { %v1479_v1 = vadd.f32 %v1477_v37, %v912_v40 }
0x2481   :  { %1875 = vtanh.f32 %v1479_v1  ;;  %v1729_v31 = vmul.f32 -1.442695, %v1479_v1 }
0x2483   :  { %1877 = vpow2.f32 %v1729_v31 }
0x2487   :  { %v1876_v2 = vpop.eup %1875 }
0x2488   :  { %1505 = vrot.lane.b32.xlu0 %v1876_v2, %s1975_s1 }
0x2489   :  { %v1878_v39 = vpop.eup %1877 }
0x248a   :  { %v1483_v3 = vadd.f32 1.0, %v1878_v39 }
0x248c   :  { %1879 = vrcp.f32 %v1483_v3  ;;  %v1495_v10 = vand.u32 2147483648, %v1483_v3  ;;  %vm1489_vm14 = vweird.f32 %v1483_v3  ;;  %v1493_v11 = vand.u32 2147483647, %v1483_v3 }
0x248e   :  { %v1496_v25 = vor.u32 1.1754944e-38, %v1495_v10  ;;  %vm1494_vm8 = vcmp.eq.f32.partialorder %v1493_v11, 8.507059e+37 }
0x2492   :  { %v1880_v4 = vpop.eup %1879 }
0x2493   :  { %v1485_v5 = vmul.f32 %v1880_v4, %v1483_v3  ;;  %vm1490_vm13 = vweird.f32 %v1880_v4 }
0x2494   :  { %vm1491_vm6 = vmor %vm1489_vm14, %vm1490_vm13  ;;  %vm1664_vm13 = vcmask 257027  }
0x2495   :  { %v1486_v6 = vsub.f32 1.0, %v1485_v5 }
0x2497   :  { %v1487_v7 = vmul.f32 %v1880_v4, %v1486_v6 }
0x2499   :  { %v1488_v8 = vadd.f32 %v1880_v4, %v1487_v7 }
0x249b   :  { %v1492_v22 = vsel %vm1491_vm6, %v1880_v4, %v1488_v8  ;;  %vm1666_vm6 = vcmask 259077  }
0x249c   :  { %v1497_v14 = vsel %vm1494_vm8, %v1496_v25, %v1492_v22  ;;  %vm1668_vm8 = vcmask 261127  }
0x249d   :  { %v1503_v18 = vmul.f32 %v1501_v16, %v1497_v14 }
0x24fa   :  { %v1506_v12 = vpop.permute.xlu0 %1505 }
0x24fb   :  { %v1508_v21 = vmul.f32 %v1506_v12, %v1497_v14 }
0x24fd   :  { %1510 = vrot.lane.b32.xlu1 %v1508_v21, %s1976_s21 }
0x256f   :  { %v1511_v20 = vpop.permute.xlu1 %1510 }
0x2570   :  { %v1513_v23 = vadd.f32 %v1511_v20, %v1503_v18 }
0x2572   :  { %1881 = vtanh.f32 %v1513_v23 }
0x2578   :  { %v1882_v27 = vpop.eup %1881 }
0x2579   :  { %1516 = vrot.lane.b32.xlu2 %v1882_v27, %s1976_s21 }
0x25d3   :  { %v1517_v28 = vpop.permute.xlu2 %1516 }
0x25d4   :  { %v1519_v32 = vmul.f32 %v1517_v28, %v1497_v14 }
0x25d6   :  { %1521 = vrot.lane.b32.xlu1 %v1519_v32, %s1978_s23  ;;  %1525 = vrot.lane.b32.xlu0 %v1519_v32, %s1977_s22 }
0x2648   :  { %v1522_v17 = vpop.permute.xlu1 %1521  ;;  %v1526_v29 = vpop.permute.xlu0 %1525 }
0x2649   :  { %1524 = vst.msk [vmem:[#allocation4 - $0x4] sm:$0x30] %vm348_vm15, %v1522_v17 }
0x264a   :  { %1529 = vst.msk [vmem:[#allocation3 + $0xa] sm:$0x30] %vm348_vm15, %v1522_v17 }
0x264b   :  { %1528 = vst.msk [vmem:[#allocation4 - $0x4] sm:$0xc0] %vm353_vm12, %v1526_v29 }
0x264c   :  { %1530 = vst.msk [vmem:[#allocation3 - $0x6] sm:$0xc0] %vm353_vm12, %v1526_v29 }
0x2651   :  { %v1532_v41 = vld [vmem:[#allocation3 + $0x8] sm:$0xff] }
0x2653   :  { %v1531_v40 = vld [vmem:[#allocation3] sm:$0xff] }
0x2654   :  { %1730 = vmatmul.msk.f32.vlgmr.msra.gmra.mxu0 %vm56_vm0, %v1531_v40 }
0x265c   :  { %1731 = vmatmul.msk.f32.gmra.mxu0 %vm56_vm0, %v1532_v41 }
0x26d1   :  { %v1562_v46 = vpop.f32.mrf.mxu0 }
0x26d2   :  { %v1563_v47 = vadd.f32 %v1753_v45, %v1562_v46 }
0x26d4   :  { %vm1568_vm15 = vcmp.gt.f32.partialorder %v1563_v47, 0.0  ;;  %v1570_v15 = vmul.f32 0.01, %v1563_v47 }
0x26d6   :  { %v1572_v48 = vsel %vm1568_vm15, %v1563_v47, %v1570_v15 }
0x26d7   :  { %1732 = vmatmul.msk.f32.vlgmr.msra.gmra.mxu1 %vm1582_vm1, %v1572_v48 }
0x26d9   :  { %v1565_v49 = vpop.f32.mrf.mxu0 }
0x26da   :  { %v1566_v26 = vadd.f32 %v1753_v45, %v1565_v49 }
0x26dc   :  { %v1571_v13 = vmul.f32 0.01, %v1566_v26  ;;  %vm1569_vm12 = vcmp.gt.f32.partialorder %v1566_v26, 0.0 }
0x26de   :  { %v1573_v50 = vsel %vm1569_vm12, %v1566_v26, %v1571_v13 }
0x26df   :  { %1733 = vmatmul.msk.f32.gmra.mxu1 %vm1582_vm1, %v1573_v50 }
0x2754   :  { %v1606_v51 = vpop.f32.mrf.mxu1 }
0x2755   :  { %v1607_v52 = vadd.f32 %v1754_v9, %v1606_v51 }
0x2757   :  { %v1734_v53 = vmul.f32 -1.442695, %v1607_v52 }
0x2759   :  { %1883 = vpow2.f32 %v1734_v53 }
0x275c   :  { %v1609_v54 = vpop.f32.mrf.mxu1 }
0x275d   :  { %v1610_v55 = vadd.f32 %v1754_v9, %v1609_v54 }
0x275f   :  { %v1884_v56 = vpop.eup %1883  ;;  %v1735_v57 = vmul.f32 -1.442695, %v1610_v55 }
0x2760   :  { %v1618_v58 = vadd.f32 1.0, %v1884_v56 }
0x2761   :  { %1885 = vpow2.f32 %v1735_v57 }
0x2762   :  { %1887 = vrcp.f32 %v1618_v58  ;;  %v1631_v0 = vand.u32 2147483648, %v1618_v58  ;;  %v1629_v37 = vand.u32 2147483647, %v1618_v58  ;;  %vm1625_vm9 = vweird.f32 %v1618_v58 }
0x2764   :  { %v1632_v31 = vor.u32 1.1754944e-38, %v1631_v0  ;;  %vm1630_vm2 = vcmp.eq.f32.partialorder %v1629_v37, 8.507059e+37 }
0x2767   :  { %v1886_v59 = vpop.eup %1885 }
0x2768   :  { %v1888_v60 = vpop.eup %1887  ;;  %v1619_v61 = vadd.f32 1.0, %v1886_v59 }
0x2769   :  { %v1621_v62 = vmul.f32 %v1888_v60, %v1618_v58  ;;  %vm1626_vm0 = vweird.f32 %v1888_v60 }
0x276a   :  { %1889 = vrcp.f32 %v1619_v61  ;;  %vm1627_vm10 = vmor %vm1625_vm9, %vm1626_vm0  ;;  %v1646_v6 = vand.u32 2147483648, %v1619_v61  ;;  %v1644_v8 = vand.u32 2147483647, %v1619_v61  ;;  %vm1640_vm15 = vweird.f32 %v1619_v61 }
0x276b   :  { %v1622_v63 = vsub.f32 1.0, %v1621_v62 }
0x276c   :  { %v1647_v11 = vor.u32 1.1754944e-38, %v1646_v6  ;;  %vm1645_vm12 = vcmp.eq.f32.partialorder %v1644_v8, 8.507059e+37 }
0x276d   :  { %v1623_v30 = vmul.f32 %v1888_v60, %v1622_v63 }
0x276f   :  { %v1624_v1 = vadd.f32 %v1888_v60, %v1623_v30 }
0x2770   :  { %v1890_v2 = vpop.eup %1889 }
0x2771   :  { %v1628_v39 = vsel %vm1627_vm10, %v1888_v60, %v1624_v1  ;;  %v1636_v3 = vmul.f32 %v1890_v2, %v1619_v61  ;;  %vm1641_vm14 = vweird.f32 %v1890_v2 }
0x2772   :  { %v1633_v4 = vsel %vm1630_vm2, %v1632_v31, %v1628_v39  ;;  %vm1642_vm1 = vmor %vm1640_vm15, %vm1641_vm14 }
0x2773   :  { %1651 = vst.msk [vmem:[#allocation10] sm:$0x1] %vm1650_vm11, %v1633_v4  ;;  %v1637_v5 = vsub.f32 1.0, %v1636_v3 }
0x2774   :  { %1653 = vst.msk [vmem:[#allocation10 - $0x1] sm:$0x4] %vm1652_vm3, %v1633_v4 }
0x2775   :  { %1655 = vst.msk [vmem:[#allocation10 - $0x2] sm:$0x10] %vm1654_vm5, %v1633_v4  ;;  %v1638_v7 = vmul.f32 %v1890_v2, %v1637_v5 }
0x2776   :  { %1657 = vst.msk [vmem:[#allocation10 - $0x3] sm:$0x40] %vm1656_vm7, %v1633_v4 }
0x2777   :  { %1663 = vst.msk [vmem:[#allocation10 + $0x7] sm:$0x2] %vm1662_vm4, %v1633_v4  ;;  %v1639_v10 = vadd.f32 %v1890_v2, %v1638_v7 }
0x2778   :  { %1665 = vst.msk [vmem:[#allocation10 + $0x6] sm:$0x8] %vm1664_vm13, %v1633_v4 }
0x2779   :  { %1667 = vst.msk [vmem:[#allocation10 + $0x5] sm:$0x20] %vm1666_vm6, %v1633_v4  ;;  %v1643_v22 = vsel %vm1642_vm1, %v1890_v2, %v1639_v10 }
0x277a   :  { %1669 = vst.msk [vmem:[#allocation10 + $0x4] sm:$0x80] %vm1668_vm8, %v1633_v4  ;;  %v1648_v25 = vsel %vm1645_vm12, %v1647_v11, %v1643_v22 }
0x277b   :  { %1658 = vst.msk [vmem:[#allocation10 + $0x4] sm:$0x1] %vm1650_vm11, %v1648_v25 }
0x277c   :  { %1659 = vst.msk [vmem:[#allocation10 + $0x3] sm:$0x4] %vm1652_vm3, %v1648_v25 }
0x277d   :  { %1660 = vst.msk [vmem:[#allocation10 + $0x2] sm:$0x10] %vm1654_vm5, %v1648_v25 }
0x277e   :  { %1661 = vst.msk [vmem:[#allocation10 + $0x1] sm:$0x40] %vm1656_vm7, %v1648_v25 }
0x277f   :  { %1670 = vst.msk [vmem:[#allocation10 + $0xb] sm:$0x2] %vm1662_vm4, %v1648_v25 }
0x2780   :  { %1671 = vst.msk [vmem:[#allocation10 + $0xa] sm:$0x8] %vm1664_vm13, %v1648_v25 }
0x2781   :  { %1672 = vst.msk [vmem:[#allocation10 + $0x9] sm:$0x20] %vm1666_vm6, %v1648_v25 }
0x2782   :  { %1673 = vst.msk [vmem:[#allocation10 + $0x8] sm:$0x80] %vm1668_vm8, %v1648_v25 }
0x2783   :  { %1686 = dma.vmem_to_hbm [thread:$0]  %s1679_s25, 256, %s1681_s28, [#allocation7], %s1970_s17, %s1970_s17, %s1971_s18  }
0x2784   :  { %1967 = dma.done.wait [#allocation7], 256  }
0x2785   :  { %1968 = vsyncadd [#allocation7], 4294967040 }
0x2786   :  { %1691 = vsyncpa [#allocation6], 1 }
0x2787   :  { %1692 = vsyncpa [#allocation9], 1 }
0x2788   :  { %1693 = vsyncpa [#allocation7], 1 }

</bundles_post_ra>
